<compile_context>
chip_gen: v5e
topology: v5e:2x2
jax: 0.10.0
libtpu: 0.0.40
codegen_flags: <defaults>
</compile_context>

<pallas_src>
import jax
import jax.numpy as jnp
from jax.experimental import pallas as pl
from jax.experimental.pallas import tpu as pltpu

EPS = 1e-12  # torch.nn.functional.normalize default eps


def _round_up(x, m):
    return ((x + m - 1) // m) * m


def _prototypes_kernel(x_ref, wn_ref, o_ref):
    # x_ref : (tm, D)  row tile of features
    # wn_ref: (D, P)   pre-normalized prototype matrix (resident, constant block)
    # o_ref : (tm, P)  cosine logits tile (unpadded)
    x = x_ref[...].astype(jnp.float32)

    # Row-wise L2 normalization: rsqrt (EUP slot) + multiply instead of sqrt + divide.
    # max(ss, EPS*EPS)  <=>  max(||x||, EPS) of torch F.normalize.
    ss = jnp.sum(x * x, axis=1, keepdims=True)
    xn = x * jax.lax.rsqrt(jnp.maximum(ss, EPS * EPS))

    # Cosine logits on the MXU against the already-normalized prototypes.
    o_ref[...] = jnp.dot(
        xn, wn_ref[...], preferred_element_type=jnp.float32
    ).astype(o_ref.dtype)


def prototypes_forward(
    x_feats,
    proto_kernel_w,
    *,
    tm=2048,
    out_dtype=jnp.float32,
    vmem_budget_bytes=24 * 1024 * 1024,
):
    """Cosine-classifier logits.

    x_feats        : [N, output_dim]                sparse-tensor feature matrix (x.F)
    proto_kernel_w : [output_dim, num_prototypes]   k=1 conv kernel
    Returns        : [N, num_prototypes] logits in `out_dtype`.
    """
    N, D = x_feats.shape
    Dw, P = proto_kernel_w.shape
    assert D == Dw, "feature dim mismatch"

    # (1) Hoist column normalization of the (tiny) prototype matrix out of the grid.
    w = proto_kernel_w.astype(jnp.float32)
    wn = w / jnp.maximum(jnp.sqrt(jnp.sum(w * w, axis=0, keepdims=True)), EPS)

    # (2) Row-tile selection under an explicit VMEM budget (matters on v7x's 64 MiB):
    #     double-buffered input + output tiles plus the resident weight block.
    in_bytes = jnp.dtype(x_feats.dtype).itemsize
    out_bytes = jnp.dtype(out_dtype).itemsize
    w_bytes = D * P * 4
    per_row = 2 * (D * in_bytes + P * out_bytes)      # double-buffered in + out per row
    tm_cap = max(8, ((vmem_budget_bytes - w_bytes) // per_row) // 8 * 8)
    tm_eff = min(tm, tm_cap)

    if N > 1024:
        # Guarantee >= 2 row tiles so both v7x TensorCores get work.
        tm_eff = min(tm_eff, _round_up(pl.cdiv(N, 2), 8))
    else:
        # Small N: a single full-array block is legal and cheapest.
        tm_eff = min(tm_eff, N)

    grid = (pl.cdiv(N, tm_eff),)

    # Resident weights: constant block index -> single pipeline buffer is enough.
    try:
        wn_spec = pl.BlockSpec((D, P), lambda i: (0, 0), pipeline_mode=pl.Buffered(1))
    except TypeError:  # older jax without pipeline_mode on BlockSpec
        wn_spec = pl.BlockSpec((D, P), lambda i: (0, 0))

    vmem_need = per_row * tm_eff + 2 * w_bytes + (2 << 20)  # + headroom
    vmem_limit = min(max(vmem_need, 16 << 20), 48 << 20)

    out = pl.pallas_call(
        _prototypes_kernel,
        out_shape=jax.ShapeDtypeStruct((N, P), out_dtype),
        grid_spec=pltpu.PrefetchScalarGridSpec(
            num_scalar_prefetch=0,
            grid=grid,
            in_specs=[
                pl.BlockSpec((tm_eff, D), lambda i: (i, 0)),  # feature row tiles
                wn_spec,                                      # normalized weights
            ],
            out_specs=pl.BlockSpec((tm_eff, P), lambda i: (i, 0)),  # unpadded logits
        ),
        compiler_params=pltpu.CompilerParams(
            dimension_semantics=("parallel",),  # shard row tiles across TCs (v7x)
            vmem_limit_bytes=vmem_limit,
        ),
    )(x_feats, wn)

    return out


if __name__ == "__main__":
    # Shapes consistent with the module: N points, output_dim features, num_prototypes
    # classes. N=2500 exercises the multi-tile (>=2 tiles, ragged last tile) path;
    # N=100 exercises the single full-array-block path. P=64 exercises the unpadded
    # (P % 128 != 0) output path.
    output_dim, num_prototypes = 32, 64

    key = jax.random.PRNGKey(0)

    def ref_logits(xf, w):
        xn = xf / jnp.maximum(jnp.linalg.norm(xf, axis=1, keepdims=True), EPS)
        wn = w / jnp.maximum(jnp.linalg.norm(w, axis=0, keepdims=True), EPS)
        return xn @ wn

    for N in (2500, 100):
        key, kx, kw = jax.random.split(key, 3)
        x_feats = jax.random.normal(kx, (N, output_dim), dtype=jnp.float32)
        proto_w = jax.random.normal(kw, (output_dim, num_prototypes), dtype=jnp.float32) * 0.1

        logits = jax.block_until_ready(prototypes_forward(x_feats, proto_w))
        ref = ref_logits(x_feats, proto_w)

        assert logits.shape == ref.shape, f"shape mismatch vs reference (N={N})"
        assert jnp.allclose(logits, ref, atol=1e-5, rtol=1e-5), f"mismatch vs reference (N={N})"

    print("KERNEL_OK")
</pallas_src>

<mosaic_0001>
module attributes {stable_mosaic.version = 11 : i64} {
  func.func @_prototypes_kernel(%arg0: i32, %arg1: memref<1256x32xf32, #tpu.memory_space<vmem>>, %arg2: memref<32x64xf32, #tpu.memory_space<vmem>>, %arg3: memref<1256x64xf32, #tpu.memory_space<vmem>>) attributes {dimension_semantics = [#tpu.dimension_semantics<parallel>], iteration_bounds = array<i64: 2>, scalar_prefetch = 0 : i64, scratch_operands = 0 : i64, tpu.core_type = #tpu.core_type<tc>, window_params = [{transform_indices = @transform_0, window_bounds = array<i64: 1256, 32>}, {pipeline_mode = #tpu.pipeline_mode<synchronous>, transform_indices = @transform_1, window_bounds = array<i64: 32, 64>}, {transform_indices = @transform_2, window_bounds = array<i64: 1256, 64>}]} {
    %c0 = arith.constant 0 : index
    %c0_0 = arith.constant 0 : index
    %0 = vector.load %arg1[%c0, %c0_0] : memref<1256x32xf32, #tpu.memory_space<vmem>>, vector<1256x32xf32>
    %1 = arith.mulf %0, %0 : vector<1256x32xf32>
    %cst = arith.constant dense<0.000000e+00> : vector<1256xf32>
    %2 = vector.multi_reduction <add>, %1, %cst [1] : vector<1256x32xf32> to vector<1256xf32>
    %3 = vector.shape_cast %2 : vector<1256xf32> to vector<1256x1xf32>
    %cst_1 = arith.constant 1.000000e-24 : f32
    %4 = vector.broadcast %cst_1 : f32 to vector<1256x1xf32>
    %5 = arith.maximumf %3, %4 : vector<1256x1xf32>
    %6 = math.rsqrt %5 : vector<1256x1xf32>
    %7 = vector.broadcast %6 : vector<1256x1xf32> to vector<1256x32xf32>
    %8 = arith.mulf %0, %7 : vector<1256x32xf32>
    %c0_2 = arith.constant 0 : index
    %c0_3 = arith.constant 0 : index
    %9 = vector.load %arg2[%c0_2, %c0_3] : memref<32x64xf32, #tpu.memory_space<vmem>>, vector<32x64xf32>
    %cst_4 = arith.constant dense<0.000000e+00> : vector<1256x64xf32>
    %10 = tpu.matmul %8, %9, %cst_4 {dimension_numbers = #tpu.dot_dimension_numbers<[1], [0], [0], [1], [0, 0, 1, 1], [], []>} : vector<1256x32xf32>, vector<32x64xf32>, vector<1256x64xf32> -> vector<1256x64xf32>
    %c0_5 = arith.constant 0 : index
    %c0_6 = arith.constant 0 : index
    %11 = vector.load %arg3[%c0_5, %c0_6] : memref<1256x64xf32, #tpu.memory_space<vmem>>, vector<1256x64xf32>
    tpu.vector_store %arg3[%c0_5, %c0_6], %10 {strides = array<i32>} : memref<1256x64xf32, #tpu.memory_space<vmem>>, vector<1256x64xf32>,
    return
  }
  func.func @transform_0(%arg0: i32) -> (i32, i32) {
    %c0_i32 = arith.constant 0 : i32
    %c0_i32_0 = arith.constant 0 : i32
    return %arg0, %c0_i32 : i32, i32
  }
  func.func @transform_1(%arg0: i32) -> (i32, i32) {
    %c0_i32 = arith.constant 0 : i32
    %c0_i32_0 = arith.constant 0 : i32
    %c0_i32_1 = arith.constant 0 : i32
    return %c0_i32, %c0_i32_0 : i32, i32
  }
  func.func @transform_2(%arg0: i32) -> (i32, i32) {
    %c0_i32 = arith.constant 0 : i32
    %c0_i32_0 = arith.constant 0 : i32
    return %arg0, %c0_i32 : i32, i32
  }
}

</mosaic_0001>

<bundles_post_ra>
// kernel: tpu_custom_call.1
= control target key start
LH: loop header
LB: loop body
LE: loop exit
PB: predicated region body
PF: predicated region fallthrough
CT: control target
= control target key end

     0   :  { %s5137_s9 = smov 0   ;;  %s5139_s10 = smov 0   ;;  %s9998_s0 = inlined_call_operand.vmem [shape: f32[2500,32], index: 0, kind: input, shape index: {}]   ;;  %s9999_s1 = inlined_call_operand.vmem [shape: f32[32,64], index: 1, kind: input, shape index: {}]   ;;  %s10000_s2 = inlined_call_operand.vmem [shape: f32[2500,64], index: 2, kind: output, shape index: {}]  }
   0x1   :  { %s5141_s11 = smov 0  }
   0x2 LB: > { %s5150_s12 = sadd.s32 4294967295, %s5088_s11   ;;  %s5152_s13 = sadd.s32 1, %s5088_s11   ;;  %s5088_s11 = sphi %s5141_s11, %s10273_s11   ;;  %s5084_s10 = sphi %s5139_s10, %s10272_s10   ;;  %s5080_s9 = sphi %s5137_s9, %s10271_s9  }
   0x3   : > { %s63_s14 = ssub.s32 %s5088_s11, %s5152_s13  ;;  %s66_s15 = sadd.s32 1, %s5084_s10 }
   0x4   : > { %p64_p0 = scmp.eq.s32.totalorder %s63_s14, 0  ;;  %p76_p1 = scmp.ne.s32.totalorder %s5084_s10, %s5080_s9 }
   0x5   : > { %p77_p2 = scmp.eq.s32.totalorder %s5150_s12, 1  ;;  %p4299_p3 = scmp.ge.s32.totalorder %s5088_s11, 1 }
   0x6   : > { %s5160_s16 = scalar_select %p64_p0, %s5084_s10, %s66_s15  }
   0x7   : > { %p5162_p4 = por %p77_p2, %p76_p1  ;;  %p121_p5 = scmp.lt.s32.totalorder %s5088_s11, 3 }
   0x9   : > { %p122_p6 = pnand %p4299_p3, %p121_p5 }
   0xa   : > { %s5167_s18 = smul.u32 (!%p122_p6), 157, %s5150_s12  ;;  %s143_s4 = sand.u32 (!%p122_p6), 1, %s5080_s9  }
   0xb   : > { %125 = sbr.rel (%p122_p6) target bundleno = 832 (0x340), region = 28 }
   0xc   : > { %p151_p7 = scmp.lt.s32.totalorder (!%p122_p6), %s5167_s18, 312  ;;  %s6624_s5 = smul.u32 (!%p122_p6), 1256, %s143_s4 }
   0xe   : > { %s6698_s6 = scalar_lea.vmem (!%p122_p6), [#allocation2], %s6624_s5  }
  0x10   : > { %s152_s19 = scalar_select %p151_p7, %s5167_s18, 312  ;;  %vm479_vm0 = vcmask 261120  }
  0x11   : > { %s3964_s7 = ssub.s32 (%p5162_p4), 313, %s5167_s18  ;;  %s4473_s8 = smul.u32 (%p5162_p4), 1256, %s5150_s12 }
  0x12   : > { %s4300_s20 = sshll.u32 %s152_s19, 3  ;;  %p3965_p8 = scmp.lt.s32.totalorder (%p5162_p4), %s3964_s7, 157 }
  0x13   : > { %s5174_s23 = scalar_lea.vmem %s9998_s0, %s4300_s20  ;;  %s9863_s14 = scalar_lea.vmem (%p5162_p4), %s10000_s2, %s4473_s8  }
  0x14   : > { %v5177_v0 = vld [vmem:[%s5174_s23 + $0x3b0] sm:$0xff]  ;;  %v5183_v2 = vld [vmem:[%s5174_s23 + $0x138] sm:$0xff]  ;;  %v5195_v7 = vld [vmem:[%s5174_s23] sm:$0xff] }
  0x15   : > { %v5180_v1 = vld [vmem:[%s5174_s23 + $0x270] sm:$0xff]  ;;  %v440_v3 = vmul.f32 %v5177_v0, %v5177_v0  ;;  %v361_v5 = vmul.f32 %v5183_v2, %v5183_v2  ;;  %v5192_v6 = vld [vmem:[%s5174_s23 + $0x278] sm:$0xff]  ;;  %v5201_v11 = vld [vmem:[%s5174_s23 + $0x280] sm:$0xff]  ;;  %v322_v13 = vmul.f32 %v5195_v7, %v5195_v7 }
  0x16   : > { %v400_v4 = vmul.f32 %v5180_v1, %v5180_v1  ;;  %v401_v12 = vmul.f32 %v5192_v6, %v5192_v6  ;;  %v402_v14 = vmul.f32 %v5201_v11, %v5201_v11  ;;  %v5213_v18 = vld [vmem:[%s5174_s23 + $0x3b8] sm:$0xff]  ;;  %v5216_v19 = vld [vmem:[%s5174_s23 + $0x8] sm:$0xff]  ;;  %v5219_v20 = vld [vmem:[%s5174_s23 + $0x140] sm:$0xff] }
  0x17   : > { %v834_v8 = vsel %vm479_vm0, %v440_v3, 0.0  ;;  %v597_v10 = vsel %vm479_vm0, %v361_v5, 0.0  ;;  %v480_v16 = vsel %vm479_vm0, %v322_v13, 0.0  ;;  %v441_v21 = vmul.f32 %v5213_v18, %v5213_v18  ;;  %v5231_v27 = vld [vmem:[%s5174_s23 + $0x288] sm:$0xff]  ;;  %v5234_v28 = vld [vmem:[%s5174_s23 + $0x3c0] sm:$0xff]  ;;  %v5237_v29 = vld [vmem:[%s5174_s23 + $0x10] sm:$0xff] }
  0x18   : > { %v714_v9 = vsel %vm479_vm0, %v400_v4, 0.0  ;;  %835 = vadd.xlane.f32.xlu1 %v834_v8  ;;  %598 = vadd.xlane.f32.xlu2 %v597_v10  ;;  %v717_v15 = vsel %vm479_vm0, %v401_v12, 0.0  ;;  %v720_v17 = vsel %vm479_vm0, %v402_v14, 0.0  ;;  %v323_v22 = vmul.f32 %v5216_v19, %v5216_v19  ;;  %v5249_v36 = vld [vmem:[%s5174_s23 + $0x148] sm:$0xff]  ;;  %v5252_v37 = vld [vmem:[%s5174_s23 + $0x290] sm:$0xff]  ;;  %v168_v45 = vld [vmem:[%s5174_s23 + $0x18] sm:$0xff] }
  0x19   : > { %715 = vadd.xlane.f32.xlu0 %v714_v9  ;;  %v362_v23 = vmul.f32 %v5219_v20, %v5219_v20  ;;  %v837_v24 = vsel %vm479_vm0, %v441_v21, 0.0  ;;  %v403_v30 = vmul.f32 %v5231_v27, %v5231_v27  ;;  %v442_v31 = vmul.f32 %v5234_v28, %v5234_v28  ;;  %v286_v38 = vld [vmem:[%s5174_s23 + $0x3c8] sm:$0xff]  ;;  %v207_v46 = vld [vmem:[%s5174_s23 + $0x150] sm:$0xff]  ;;  %v248_v47 = vld [vmem:[%s5174_s23 + $0x298] sm:$0xff] }
  0x1a   : > { %v483_v25 = vsel %vm479_vm0, %v323_v22, 0.0  ;;  %v324_v32 = vmul.f32 %v5237_v29, %v5237_v29  ;;  %v363_v39 = vmul.f32 %v5249_v36, %v5249_v36  ;;  %v404_v40 = vmul.f32 %v5252_v37, %v5252_v37  ;;  %v287_v54 = vld [vmem:[%s5174_s23 + $0x3d0] sm:$0xff]  ;;  %v169_v55 = vld [vmem:[%s5174_s23 + $0x20] sm:$0xff]  ;;  %v208_v56 = vld [vmem:[%s5174_s23 + $0x158] sm:$0xff] }
  0x1b   : > { %v600_v26 = vsel %vm479_vm0, %v362_v23, 0.0  ;;  %v723_v33 = vsel %vm479_vm0, %v403_v30, 0.0  ;;  %v840_v34 = vsel %vm479_vm0, %v442_v31, 0.0  ;;  %v443_v41 = vmul.f32 %v286_v38, %v286_v38  ;;  %v249_v63 = vld [vmem:[%s5174_s23 + $0x2a0] sm:$0xff]  ;;  %v288_v3 = vld [vmem:[%s5174_s23 + $0x3d8] sm:$0xff]  ;;  %v170_v4 = vld [vmem:[%s5174_s23 + $0x28] sm:$0xff] }
  0x1c   : > { %v486_v35 = vsel %vm479_vm0, %v324_v32, 0.0  ;;  %v603_v42 = vsel %vm479_vm0, %v363_v39, 0.0  ;;  %v726_v43 = vsel %vm479_vm0, %v404_v40, 0.0  ;;  %v325_v48 = vmul.f32 %v168_v45, %v168_v45  ;;  %v209_v14 = vld [vmem:[%s5174_s23 + $0x160] sm:$0xff]  ;;  %v210_v30 = vld [vmem:[%s5174_s23 + $0x168] sm:$0xff]  ;;  %v251_v31 = vld [vmem:[%s5174_s23 + $0x2b0] sm:$0xff] }
  0x1d   : > { %v843_v44 = vsel %vm479_vm0, %v443_v41, 0.0  ;;  %v364_v49 = vmul.f32 %v207_v46, %v207_v46  ;;  %v405_v50 = vmul.f32 %v248_v47, %v248_v47  ;;  %v444_v57 = vmul.f32 %v287_v54, %v287_v54  ;;  %v290_v40 = vld [vmem:[%s5174_s23 + $0x3e8] sm:$0xff]  ;;  %v172_v41 = vld [vmem:[%s5174_s23 + $0x38] sm:$0xff] }
  0x1e   : > { %v489_v51 = vsel %vm479_vm0, %v325_v48, 0.0  ;;  %v326_v58 = vmul.f32 %v169_v55, %v169_v55  ;;  %v365_v59 = vmul.f32 %v208_v56, %v208_v56  ;;  %v406_v5 = vmul.f32 %v249_v63, %v249_v63 }
  0x1f   : > { %v606_v52 = vsel %vm479_vm0, %v364_v49, 0.0  ;;  %v729_v53 = vsel %vm479_vm0, %v405_v50, 0.0  ;;  %v846_v60 = vsel %vm479_vm0, %v444_v57, 0.0  ;;  %v445_v8 = vmul.f32 %v288_v3, %v288_v3  ;;  %v252_v49 = vld [vmem:[%s5174_s23 + $0x2b8] sm:$0xff]  ;;  %v291_v50 = vld [vmem:[%s5174_s23 + $0x3f0] sm:$0xff] }
  0x20   : > { %481 = vadd.xlane.f32.xlu1 %v480_v16  ;;  %721 = vadd.xlane.f32.xlu2 %v720_v17  ;;  %v492_v61 = vsel %vm479_vm0, %v326_v58, 0.0  ;;  %v609_v62 = vsel %vm479_vm0, %v365_v59, 0.0  ;;  %v327_v9 = vmul.f32 %v170_v4, %v170_v4  ;;  %v732_v10 = vsel %vm479_vm0, %v406_v5, 0.0  ;;  %v289_v16 = vld [vmem:[%s5174_s23 + $0x3e0] sm:$0xff]  ;;  %v212_v58 = vld [vmem:[%s5174_s23 + $0x178] sm:$0xff] }
  0x21   : > { %718 = vadd.xlane.f32.xlu0 %v717_v15  ;;  %v849_v12 = vsel %vm479_vm0, %v445_v8, 0.0  ;;  %v250_v15 = vld [vmem:[%s5174_s23 + $0x2a8] sm:$0xff]  ;;  %v366_v17 = vmul.f32 %v209_v14, %v209_v14  ;;  %v446_v22 = vmul.f32 %v289_v16, %v289_v16  ;;  %v253_v59 = vld [vmem:[%s5174_s23 + $0x2c0] sm:$0xff] }
  0x22   : > { %v495_v13 = vsel %vm479_vm0, %v327_v9, 0.0  ;;  %v407_v21 = vmul.f32 %v250_v15, %v250_v15  ;;  %v174_v8 = vld [vmem:[%s5174_s23 + $0x48] sm:$0xff]  ;;  %v213_v9 = vld [vmem:[%s5174_s23 + $0x180] sm:$0xff]  ;;  %v2838_v15 = vld [vmem:[%s9999_s1 + $0x18] sm:$0xff] }
  0x23   : > { %v612_v23 = vsel %vm479_vm0, %v366_v17, 0.0  ;;  %4476 = vmatpush.msra.mxu1 %v2838_v15  ;;  %4477 = vmatpush.msra.mxu2 %v2838_v15 }
  0x24   : > { %4478 = vmatpush.msra.mxu3 %v2838_v15  ;;  %3322 = vmatpush.msra.mxu0 %v2838_v15 }
  0x28   : > { %484 = vadd.xlane.f32.xlu1 %v483_v25  ;;  %601 = vadd.xlane.f32.xlu2 %v600_v26  ;;  %v852_v25 = vsel %vm479_vm0, %v446_v22, 0.0  ;;  %v171_v26 = vld [vmem:[%s5174_s23 + $0x30] sm:$0xff]  ;;  %v293_v22 = vld [vmem:[%s5174_s23 + $0x400] sm:$0xff] }
  0x29   : > { %838 = vadd.xlane.f32.xlu0 %v837_v24  ;;  %v735_v24 = vsel %vm479_vm0, %v407_v21, 0.0  ;;  %v328_v32 = vmul.f32 %v171_v26, %v171_v26  ;;  %v2836_v26 = vld [vmem:[%s9999_s1 + $0x8] sm:$0xff] }
  0x30   : > { %841 = vadd.xlane.f32.xlu1 %v840_v34  ;;  %487 = vadd.xlane.f32.xlu2 %v486_v35  ;;  %v408_v34 = vmul.f32 %v251_v31, %v251_v31  ;;  %v498_v35 = vsel %vm479_vm0, %v328_v32, 0.0 }
  0x31   : > { %724 = vadd.xlane.f32.xlu0 %v723_v33  ;;  %v367_v33 = vmul.f32 %v210_v30, %v210_v30  ;;  %v450_v30 = vmul.f32 %v293_v22, %v293_v22 }
  0x32   : > { %v738_v39 = vsel %vm479_vm0, %v408_v34, 0.0 }
  0x33   : > { %v615_v38 = vsel %vm479_vm0, %v367_v33, 0.0  ;;  %v2835_v33 = vld [vmem:[%s9999_s1] sm:$0xff]  ;;  %v864_v34 = vsel %vm479_vm0, %v450_v30, 0.0 }
  0x38   : > { %727 = vadd.xlane.f32.xlu1 %v726_v43  ;;  %844 = vadd.xlane.f32.xlu2 %v843_v44  ;;  %v447_v43 = vmul.f32 %v290_v40, %v290_v40  ;;  %v329_v44 = vmul.f32 %v172_v41, %v172_v41  ;;  %v294_v40 = vld [vmem:[%s5174_s23 + $0x408] sm:$0xff]  ;;  %v176_v41 = vld [vmem:[%s5174_s23 + $0x58] sm:$0xff] }
  0x39   : > { %604 = vadd.xlane.f32.xlu0 %v603_v42  ;;  %v211_v42 = vld [vmem:[%s5174_s23 + $0x170] sm:$0xff] }
  0x3a   : > { %v368_v45 = vmul.f32 %v211_v42, %v211_v42  ;;  %v855_v46 = vsel %vm479_vm0, %v447_v43, 0.0  ;;  %v501_v47 = vsel %vm479_vm0, %v329_v44, 0.0  ;;  %v451_v43 = vmul.f32 %v294_v40, %v294_v40 }
  0x3b   : > { %v333_v44 = vmul.f32 %v176_v41, %v176_v41 }
  0x3c   : > { %v618_v48 = vsel %vm479_vm0, %v368_v45, 0.0 }
  0x40   : > { %607 = vadd.xlane.f32.xlu1 %v606_v52  ;;  %730 = vadd.xlane.f32.xlu2 %v729_v53  ;;  %v409_v52 = vmul.f32 %v252_v49, %v252_v49  ;;  %v448_v53 = vmul.f32 %v291_v50, %v291_v50  ;;  %v215_v50 = vld [vmem:[%s5174_s23 + $0x190] sm:$0xff] }
  0x41   : > { %490 = vadd.xlane.f32.xlu0 %v489_v51  ;;  %v173_v51 = vld [vmem:[%s5174_s23 + $0x40] sm:$0xff] }
  0x42   : > { %v330_v54 = vmul.f32 %v173_v51, %v173_v51  ;;  %v741_v55 = vsel %vm479_vm0, %v409_v52, 0.0  ;;  %v858_v56 = vsel %vm479_vm0, %v448_v53, 0.0  ;;  %v256_v51 = vld [vmem:[%s5174_s23 + $0x2d8] sm:$0xff] }
  0x44   : > { %v504_v57 = vsel %vm479_vm0, %v330_v54, 0.0  ;;  %v867_v54 = vsel %vm479_vm0, %v451_v43, 0.0  ;;  %v258_v43 = vld [vmem:[%s5174_s23 + $0x2e8] sm:$0xff] }
  0x48   : > { %493 = vadd.xlane.f32.xlu1 %v492_v61  ;;  %610 = vadd.xlane.f32.xlu2 %v609_v62  ;;  %v369_v61 = vmul.f32 %v212_v58, %v212_v58  ;;  %v410_v62 = vmul.f32 %v253_v59, %v253_v59  ;;  %v413_v58 = vmul.f32 %v256_v51, %v256_v51  ;;  %v177_v59 = vld [vmem:[%s5174_s23 + $0x60] sm:$0xff] }
  0x49   : > { %847 = vadd.xlane.f32.xlu0 %v846_v60  ;;  %v292_v60 = vld [vmem:[%s5174_s23 + $0x3f8] sm:$0xff] }
  0x4a   : > { %v449_v63 = vmul.f32 %v292_v60, %v292_v60  ;;  %v621_v3 = vsel %vm479_vm0, %v369_v61, 0.0  ;;  %v744_v4 = vsel %vm479_vm0, %v410_v62, 0.0  ;;  %v257_v60 = vld [vmem:[%s5174_s23 + $0x2e0] sm:$0xff]  ;;  %v216_v61 = vld [vmem:[%s5174_s23 + $0x198] sm:$0xff] }
  0x4b   : > { %v296_v62 = vld [vmem:[%s5174_s23 + $0x418] sm:$0xff] }
  0x4c   : > { %v861_v5 = vsel %vm479_vm0, %v449_v63, 0.0  ;;  %v453_v22 = vmul.f32 %v296_v62, %v296_v62 }
  0x50   : > { %850 = vadd.xlane.f32.xlu1 %v849_v12  ;;  %496 = vadd.xlane.f32.xlu2 %v495_v13  ;;  %v331_v12 = vmul.f32 %v174_v8, %v174_v8  ;;  %v370_v13 = vmul.f32 %v213_v9, %v213_v9 }
  0x51   : > { %733 = vadd.xlane.f32.xlu0 %v732_v10  ;;  %v254_v10 = vld [vmem:[%s5174_s23 + $0x2c8] sm:$0xff] }
  0x52   : > { %v411_v14 = vmul.f32 %v254_v10, %v254_v10  ;;  %v507_v16 = vsel %vm479_vm0, %v331_v12, 0.0  ;;  %v624_v17 = vsel %vm479_vm0, %v370_v13, 0.0  ;;  %v753_v12 = vsel %vm479_vm0, %v413_v58, 0.0 }
  0x53   : > { %v414_v13 = vmul.f32 %v257_v60, %v257_v60 }
  0x54   : > { %v747_v21 = vsel %vm479_vm0, %v411_v14, 0.0 }
  0x58   : > { %736 = vadd.xlane.f32.xlu1 %v735_v24  ;;  %853 = vadd.xlane.f32.xlu2 %v852_v25  ;;  %v2837_v24 = vld [vmem:[%s9999_s1 + $0x10] sm:$0xff]  ;;  %v214_v25 = vld [vmem:[%s5174_s23 + $0x188] sm:$0xff] }
  0x59   : > { %613 = vadd.xlane.f32.xlu0 %v612_v23  ;;  %v175_v23 = vld [vmem:[%s5174_s23 + $0x50] sm:$0xff]  ;;  %4479 = vmatpush.msra.mxu1 %v2837_v24  ;;  %v371_v32 = vmul.f32 %v214_v25, %v214_v25 }
  0x5a   : > { %4480 = vmatpush.msra.mxu2 %v2837_v24  ;;  %v332_v31 = vmul.f32 %v175_v23, %v175_v23  ;;  %4481 = vmatpush.msra.mxu3 %v2837_v24 }
  0x5b   : > { %4482 = vmatpush.msra.mxu1 %v2836_v26  ;;  %3323 = vmatpush.msra.mxu0 %v2837_v24 }
  0x5c   : > { %4483 = vmatpush.msra.mxu2 %v2836_v26  ;;  %4484 = vmatpush.msra.mxu3 %v2836_v26 }
  0x5d   : > { %4485 = vmatpush.msra.mxu1 %v2835_v33  ;;  %3324 = vmatpush.msra.mxu0 %v2836_v26 }
  0x5e   : > { %4486 = vmatpush.msra.mxu2 %v2835_v33  ;;  %4487 = vmatpush.msra.mxu3 %v2835_v33 }
  0x5f   : > { %3325 = vmatpush.msra.mxu0 %v2835_v33 }
  0x60   : > { %616 = vadd.xlane.f32.xlu1 %v615_v38  ;;  %739 = vadd.xlane.f32.xlu2 %v738_v39  ;;  %v627_v38 = vsel %vm479_vm0, %v371_v32, 0.0  ;;  %v255_v39 = vld [vmem:[%s5174_s23 + $0x2d0] sm:$0xff] }
  0x61   : > { %499 = vadd.xlane.f32.xlu0 %v498_v35  ;;  %v510_v35 = vsel %vm479_vm0, %v332_v31, 0.0  ;;  %v412_v42 = vmul.f32 %v255_v39, %v255_v39  ;;  %v756_v39 = vsel %vm479_vm0, %v414_v13, 0.0 }
  0x63   : > { %v750_v53 = vsel %vm479_vm0, %v412_v42, 0.0  ;;  %v5388_v42 = vsel %vm479_vm0, %v453_v22, 0.0 }
  0x68   : > { %502 = vadd.xlane.f32.xlu1 %v501_v47  ;;  %619 = vadd.xlane.f32.xlu2 %v618_v48 }
  0x69   : > { %856 = vadd.xlane.f32.xlu0 %v855_v46 }
  0x70   : > { %859 = vadd.xlane.f32.xlu1 %v858_v56  ;;  %505 = vadd.xlane.f32.xlu2 %v504_v57  ;;  %v372_v56 = vmul.f32 %v215_v50, %v215_v50  ;;  %v295_v57 = vld [vmem:[%s5174_s23 + $0x410] sm:$0xff] }
  0x71   : > { %742 = vadd.xlane.f32.xlu0 %v741_v55  ;;  %v513_v55 = vsel %vm479_vm0, %v333_v44, 0.0  ;;  %v452_v63 = vmul.f32 %v295_v57, %v295_v57  ;;  %v179_v57 = vld [vmem:[%s5174_s23 + $0x70] sm:$0xff] }
  0x72   : > { %v630_v10 = vsel %vm479_vm0, %v372_v56, 0.0  ;;  %v5402_v56 = vmul.f32 %v258_v43, %v258_v43  ;;  %v5426_v13 = vmul.f32 %v179_v57, %v179_v57 }
  0x73   : > { %v870_v33 = vsel %vm479_vm0, %v452_v63, 0.0  ;;  %v297_v63 = vld [vmem:[%s5174_s23 + $0x420] sm:$0xff] }
  0x78   : > { %745 = vadd.xlane.f32.xlu1 %v744_v4  ;;  %862 = vadd.xlane.f32.xlu2 %v861_v5  ;;  %v217_v4 = vld [vmem:[%s5174_s23 + $0x1a0] sm:$0xff]  ;;  %v178_v5 = vld [vmem:[%s5174_s23 + $0x68] sm:$0xff] }
  0x79   : > { %622 = vadd.xlane.f32.xlu0 %v621_v3  ;;  %v334_v3 = vmul.f32 %v177_v59, %v177_v59  ;;  %v374_v26 = vmul.f32 %v217_v4, %v217_v4  ;;  %v335_v30 = vmul.f32 %v178_v5, %v178_v5 }
  0x80   : > { %625 = vadd.xlane.f32.xlu1 %v624_v17  ;;  %748 = vadd.xlane.f32.xlu2 %v747_v21  ;;  %v373_v21 = vmul.f32 %v216_v61, %v216_v61 }
  0x81   : > { %508 = vadd.xlane.f32.xlu0 %v507_v16 }
  0x82   : > { %v633_v41 = vsel %vm479_vm0, %v373_v21, 0.0 }
  0x88   : > { %511 = vadd.xlane.f32.xlu1 %v510_v35  ;;  %628 = vadd.xlane.f32.xlu2 %v627_v38 }
  0x89   : > { %865 = vadd.xlane.f32.xlu0 %v864_v34  ;;  %v516_v34 = vsel %vm479_vm0, %v334_v3, 0.0 }
  0x8b   : > { %v836_v45 = vpop.xlane.xlu1 %835  ;;  %v599_v49 = vpop.xlane.xlu2 %598 }
  0x8c   : > { %v716_v46 = vpop.xlane.xlu0 %715  ;;  %v5337_v47 = vmax.f32 %v836_v45, 1e-24  ;;  %v5343_v52 = vmax.f32 %v599_v49, 1e-24  ;;  %v5396_v49 = vsel %vm479_vm0, %v335_v30, 0.0 }
  0x8d   : > { %v5339_v48 = vmax.f32 %v716_v46, 1e-24  ;;  %v5393_v46 = vsel %vm479_vm0, %v374_v26, 0.0 }
  0x8e   : > { %4577 = vrsqrt.f32 %v5337_v47  ;;  %vm2294_vm1 = vweird.f32 %v5337_v47  ;;  %vm1504_vm3 = vweird.f32 %v5343_v52 }
  0x8f   : > { %4579 = vrsqrt.f32 %v5339_v48  ;;  %vm1894_vm2 = vweird.f32 %v5339_v48 }
  0x90   : > { %4581 = vrsqrt.f32 %v5343_v52  ;;  %868 = vadd.xlane.f32.xlu1 %v867_v54  ;;  %514 = vadd.xlane.f32.xlu2 %v513_v55 }
  0x91   : > { %751 = vadd.xlane.f32.xlu0 %v750_v53 }
  0x93   : > { %v482_v9 = vpop.xlane.xlu1 %481  ;;  %v722_v16 = vpop.xlane.xlu2 %721 }
  0x94   : > { %v719_v8 = vpop.xlane.xlu0 %718  ;;  %v5360_v14 = vpop.eup %4577  ;;  %v5364_v17 = vmax.f32 %v482_v9, 1e-24  ;;  %v5370_v25 = vmax.f32 %v722_v16, 1e-24 }
  0x95   : > { %v5362_v15 = vmax.f32 %v719_v8, 1e-24  ;;  %v5366_v23 = vpop.eup %4579  ;;  %v2289_v24 = vmul.f32 %v5360_v14, %v5337_v47  ;;  %vm2295_vm4 = vweird.f32 %v5360_v14 }
  0x96   : > { %v5372_v31 = vpop.eup %4581  ;;  %v1889_v32 = vmul.f32 %v5366_v23, %v5339_v48  ;;  %vm1895_vm6 = vweird.f32 %v5366_v23  ;;  %vm5436_vm7 = vmor %vm2294_vm1, %vm2295_vm4  ;;  %vm1114_vm11 = vweird.f32 %v5364_v17  ;;  %vm1914_vm13 = vweird.f32 %v5370_v25 }
  0x97   : > { %4583 = vrsqrt.f32 %v5362_v15  ;;  %v2290_v35 = vmul.f32 %v5360_v14, %v2289_v24  ;;  %v1499_v38 = vmul.f32 %v5372_v31, %v5343_v52  ;;  %vm1505_vm5 = vweird.f32 %v5372_v31  ;;  %vm1896_vm10 = vmor %vm1894_vm2, %vm1895_vm6 }
  0x98   : > { %4585 = vrsqrt.f32 %v5370_v25  ;;  %v1890_v40 = vmul.f32 %v5366_v23, %v1889_v32  ;;  %754 = vadd.xlane.f32.xlu1 %v753_v12  ;;  %871 = vadd.xlane.f32.xlu2 %v870_v33  ;;  %v5440_v24 = vmul.f32 %v297_v63, %v297_v63  ;;  %vm1506_vm8 = vmor %vm1504_vm3, %vm1505_vm5  ;;  %vm1904_vm9 = vweird.f32 %v5362_v15 }
  0x99   : > { %4587 = vrsqrt.f32 %v5364_v17  ;;  %631 = vadd.xlane.f32.xlu0 %v630_v10  ;;  %v2291_v44 = vmul.f32 0.5, %v2290_v35  ;;  %v1500_v45 = vmul.f32 %v5372_v31, %v1499_v38 }
  0x9a   : > { %v1891_v50 = vmul.f32 0.5, %v1890_v40 }
  0x9b   : > { %v2292_v51 = vsub.f32 1.5, %v2291_v44  ;;  %v1501_v53 = vmul.f32 0.5, %v1500_v45  ;;  %v485_v55 = vpop.xlane.xlu1 %484  ;;  %v602_v61 = vpop.xlane.xlu2 %601 }
  0x9c   : > { %v839_v54 = vpop.xlane.xlu0 %838  ;;  %v1892_v59 = vsub.f32 1.5, %v1891_v50  ;;  %v5409_v62 = vmax.f32 %v485_v55, 1e-24  ;;  %v5417_v8 = vmax.f32 %v602_v61, 1e-24 }
  0x9d   : > { %v5405_v58 = vpop.eup %4583  ;;  %v5407_v60 = vmax.f32 %v839_v54, 1e-24  ;;  %v1502_v4 = vsub.f32 1.5, %v1501_v53  ;;  %v2293_v9 = vmul.f32 %v5360_v14, %v2292_v51 }
  0x9e   : > { %v5413_v3 = vpop.eup %4585  ;;  %v1899_v5 = vmul.f32 %v5405_v58, %v5362_v15  ;;  %v1893_v47 = vmul.f32 %v5366_v23, %v1892_v59  ;;  %vm1905_vm12 = vweird.f32 %v5405_v58  ;;  %vm1514_vm2 = vweird.f32 %v5417_v8 }
  0x9f   : > { %v5420_v10 = vpop.eup %4587  ;;  %v1909_v12 = vmul.f32 %v5413_v3, %v5370_v25  ;;  %4589 = vrsqrt.f32 %v5407_v60  ;;  %v1503_v30 = vmul.f32 %v5372_v31, %v1502_v4  ;;  %vm1906_vm15 = vmor %vm1904_vm9, %vm1905_vm12  ;;  %vm1124_vm3 = vweird.f32 %v5409_v62 }
  0xa0   : > { %v1900_v16 = vmul.f32 %v5405_v58, %v1899_v5  ;;  %v1109_v21 = vmul.f32 %v5420_v10, %v5364_v17  ;;  %4591 = vrsqrt.f32 %v5417_v8  ;;  %634 = vadd.xlane.f32.xlu1 %v633_v41  ;;  %757 = vadd.xlane.f32.xlu2 %v756_v39  ;;  %v1897_v38 = vsel %vm1896_vm10, %v5366_v23, %v1893_v47 }
  0xa1   : > { %v1910_v26 = vmul.f32 %v5413_v3, %v1909_v12  ;;  %4593 = vrsqrt.f32 %v5409_v62  ;;  %517 = vadd.xlane.f32.xlu0 %v516_v34  ;;  %v2297_v34 = vsel %vm5436_vm7, %v5360_v14, %v2293_v9  ;;  %v1507_v52 = vsel %vm1506_vm8, %v5372_v31, %v1503_v30 }
  0xa2   : > { %v1901_v32 = vmul.f32 0.5, %v1900_v16  ;;  %v1110_v33 = vmul.f32 %v5420_v10, %v1109_v21  ;;  %v2796_v40 = vmul.f32 %v2297_v34, %v5177_v0  ;;  %v2717_v39 = vmul.f32 %v1507_v52, %v5183_v2 }
  0xa3   : > { %v1911_v35 = vmul.f32 0.5, %v1910_v26  ;;  %v2756_v44 = vmul.f32 %v1897_v38, %v5180_v1  ;;  %v842_v48 = vpop.xlane.xlu1 %841  ;;  %v488_v31 = vpop.xlane.xlu2 %487  ;;  %vm1115_vm14 = vweird.f32 %v5420_v10  ;;  %v759_v12 = vsel %vm479_vm0, %v5402_v56, 0.0 }
  0xa4   : > { %v1902_v41 = vsub.f32 1.5, %v1901_v32  ;;  %v1111_v43 = vmul.f32 0.5, %v1110_v33  ;;  %v725_v45 = vpop.xlane.xlu0 %724  ;;  %4419 = vmatmul.msk.f32.vlgmr.msra.gmra.mxu3 %vm479_vm0, %v2796_v40  ;;  %v5470_v23 = vmax.f32 %v842_v48, 1e-24  ;;  %4340 = vmatmul.msk.f32.vlgmr.msra.gmra.mxu1 %vm479_vm0, %v2717_v39  ;;  %v5479_v51 = vmax.f32 %v488_v31, 1e-24  ;;  %vm1116_vm1 = vmor %vm1114_vm11, %vm1115_vm14 }
  0xa5   : > { %v5464_v50 = vpop.eup %4589  ;;  %v5468_v14 = vmax.f32 %v725_v45, 1e-24  ;;  %4379 = vmatmul.msk.f32.vlgmr.msra.gmra.mxu2 %vm479_vm0, %v2756_v44  ;;  %v1912_v57 = vsub.f32 1.5, %v1911_v35  ;;  %vm1915_vm4 = vweird.f32 %v5413_v3  ;;  %vm2304_vm10 = vweird.f32 %v5407_v60 }
  0xa6   : > { %v5473_v0 = vpop.eup %4591  ;;  %v1112_v2 = vsub.f32 1.5, %v1111_v43  ;;  %v2299_v1 = vmul.f32 %v5464_v50, %v5407_v60  ;;  %v1903_v53 = vmul.f32 %v5405_v58, %v1902_v41  ;;  %vm5548_vm7 = vmor %vm1914_vm13, %vm1915_vm4  ;;  %vm2305_vm8 = vweird.f32 %v5464_v50  ;;  %v218_v60 = vld [vmem:[%s5174_s23 + $0x1a8] sm:$0xff] }
  0xa7   : > { %v5482_v54 = vpop.eup %4593  ;;  %v1509_v55 = vmul.f32 %v5473_v0, %v5417_v8  ;;  %4595 = vrsqrt.f32 %v5468_v14  ;;  %vm1515_vm6 = vweird.f32 %v5473_v0  ;;  %vm2306_vm12 = vmor %vm2304_vm10, %vm2305_vm8  ;;  %vm1924_vm13 = vweird.f32 %v5468_v14 }
  0xa8   : > { %v2300_v59 = vmul.f32 %v5464_v50, %v2299_v1  ;;  %v1119_v61 = vmul.f32 %v5482_v54, %v5409_v62  ;;  %4597 = vrsqrt.f32 %v5479_v51  ;;  %520 = vadd.xlane.f32.xlu1 %v5396_v49  ;;  %v1113_v4 = vmul.f32 %v5420_v10, %v1112_v2  ;;  %637 = vadd.xlane.f32.xlu2 %v5393_v46  ;;  %vm1516_vm11 = vmor %vm1514_vm2, %vm1515_vm6 }
  0xa9   : > { %v1510_v63 = vmul.f32 %v5473_v0, %v1509_v55  ;;  %4599 = vrsqrt.f32 %v5470_v23  ;;  %874 = vadd.xlane.f32.xlu0 %v5388_v42  ;;  %v1907_v5 = vsel %vm1906_vm15, %v5405_v58, %v1903_v53  ;;  %v522_v42 = vsel %vm479_vm0, %v5426_v13, 0.0 }
  0xaa   : > { %v1120_v9 = vmul.f32 %v5482_v54, %v1119_v61  ;;  %v2757_v15 = vmul.f32 %v1907_v5, %v5192_v6  ;;  %v2301_v49 = vmul.f32 0.5, %v2300_v59  ;;  %v1117_v21 = vsel %vm1116_vm1, %v5420_v10, %v1113_v4 }
  0xab   : > { %v1511_v16 = vmul.f32 0.5, %v1510_v63  ;;  %v876_v58 = vsel %vm479_vm0, %v5440_v24, 0.0  ;;  %v2678_v6 = vmul.f32 %v1117_v21, %v5195_v7  ;;  %v728_v22 = vpop.xlane.xlu1 %727  ;;  %v845_v13 = vpop.xlane.xlu2 %844  ;;  %v1913_v10 = vmul.f32 %v5413_v3, %v1912_v57 }
  0xac   : > { %v1121_v46 = vmul.f32 0.5, %v1120_v9  ;;  %v605_v17 = vpop.xlane.xlu0 %604  ;;  %v5522_v30 = vmax.f32 %v728_v22, 1e-24  ;;  %v5532_v33 = vmax.f32 %v845_v13, 1e-24  ;;  %v2302_v35 = vsub.f32 1.5, %v2301_v49 }
  0xad   : > { %v5518_v56 = vpop.eup %4595  ;;  %v5520_v26 = vmax.f32 %v605_v17, 1e-24  ;;  %v1512_v47 = vsub.f32 1.5, %v1511_v16  ;;  %4301 = vmatmul.msk.f32.vlgmr.msra.gmra.mxu0 %vm479_vm0, %v2678_v6  ;;  %4380 = vmatmul.msk.f32.gmra.mxu2 %vm479_vm0, %v2757_v15  ;;  %vm1125_vm5 = vweird.f32 %v5482_v54  ;;  %v1917_v39 = vsel %vm5548_vm7, %v5413_v3, %v1913_v10  ;;  %v298_v49 = vld [vmem:[%s5174_s23 + $0x428] sm:$0xff] }
  0xae   : > { %v5526_v24 = vpop.eup %4597  ;;  %v1122_v32 = vsub.f32 1.5, %v1121_v46  ;;  %v1919_v7 = vmul.f32 %v5518_v56, %v5468_v14  ;;  %vm1126_vm9 = vmor %vm1124_vm3, %vm1125_vm5  ;;  %v2303_v3 = vmul.f32 %v5464_v50, %v2302_v35  ;;  %v2758_v1 = vmul.f32 %v1917_v39, %v5201_v11 }
  0xaf   : > { %v5534_v34 = vpop.eup %4599  ;;  %v1129_v52 = vmul.f32 %v5526_v24, %v5479_v51  ;;  %4601 = vrsqrt.f32 %v5520_v26  ;;  %v1513_v45 = vmul.f32 %v5473_v0, %v1512_v47  ;;  %v375_v9 = vmul.f32 %v218_v60, %v218_v60  ;;  %v219_v60 = vld [vmem:[%s5174_s23 + $0x1b0] sm:$0xff] }
  0xb0   : > { %v2309_v38 = vmul.f32 %v5534_v34, %v5470_v23  ;;  %4603 = vrsqrt.f32 %v5532_v33  ;;  %v1920_v41 = vmul.f32 %v5518_v56, %v1919_v7  ;;  %877 = vadd.xlane.f32.xlu1 %v876_v58  ;;  %523 = vadd.xlane.f32.xlu2 %v522_v42  ;;  %v1123_v44 = vmul.f32 %v5482_v54, %v1122_v32  ;;  %v259_v58 = vld [vmem:[%s5174_s23 + $0x2f0] sm:$0xff] }
  0xb1   : > { %v1130_v43 = vmul.f32 %v5526_v24, %v1129_v52  ;;  %4605 = vrsqrt.f32 %v5522_v30  ;;  %760 = vadd.xlane.f32.xlu0 %v759_v12  ;;  %v1517_v2 = vsel %vm1516_vm11, %v5473_v0, %v1513_v45  ;;  %v2307_v61 = vsel %vm2306_vm12, %v5464_v50, %v2303_v3 }
  0xb2   : > { %v2310_v25 = vmul.f32 %v5534_v34, %v2309_v38  ;;  %v1127_v31 = vsel %vm1126_vm9, %v5482_v54, %v1123_v44  ;;  %v1921_v57 = vmul.f32 0.5, %v1920_v41  ;;  %v2718_v59 = vmul.f32 %v1517_v2, %v5219_v20 }
  0xb3   : > { %v1131_v48 = vmul.f32 0.5, %v1130_v43  ;;  %v608_v53 = vpop.xlane.xlu1 %607  ;;  %v2679_v8 = vmul.f32 %v1127_v31, %v5216_v19  ;;  %v731_v54 = vpop.xlane.xlu2 %730  ;;  %v2797_v4 = vmul.f32 %v2307_v61, %v5213_v18  ;;  %vm1134_vm14 = vweird.f32 %v5479_v51 }
  0xb4   : > { %v491_v62 = vpop.xlane.xlu0 %490  ;;  %v2311_v11 = vmul.f32 0.5, %v2310_v25  ;;  %4341 = vmatmul.msk.f32.gmra.mxu1 %vm479_vm0, %v2718_v59  ;;  %v5598_v50 = vmax.f32 %v731_v54, 1e-24  ;;  %v5604_v42 = vmax.f32 %v608_v53, 1e-24  ;;  %v1922_v16 = vsub.f32 1.5, %v1921_v57 }
  0xb5   : > { %v5578_v55 = vpop.eup %4601  ;;  %4381 = vmatmul.msk.f32.gmra.mxu2 %vm479_vm0, %v2758_v1  ;;  %4302 = vmatmul.msk.f32.gmra.mxu0 %vm479_vm0, %v2679_v8  ;;  %v5596_v20 = vmax.f32 %v491_v62, 1e-24  ;;  %v1132_v15 = vsub.f32 1.5, %v1131_v48  ;;  %vm1135_vm15 = vweird.f32 %v5526_v24  ;;  %vm2314_vm1 = vweird.f32 %v5470_v23  ;;  %v180_v1 = vld [vmem:[%s5174_s23 + $0x78] sm:$0xff] }
  0xb6   : > { %v5583_v63 = vpop.eup %4603  ;;  %v1519_v0 = vmul.f32 %v5578_v55, %v5520_v26  ;;  %4420 = vmatmul.msk.f32.gmra.mxu3 %vm479_vm0, %v2797_v4  ;;  %v2312_v46 = vsub.f32 1.5, %v2311_v11  ;;  %v639_v17 = vsel %vm479_vm0, %v375_v9, 0.0  ;;  %v455_v22 = vmul.f32 %v298_v49, %v298_v49  ;;  %vm1136_vm3 = vmor %vm1134_vm14, %vm1135_vm15  ;;  %v260_v62 = vld [vmem:[%s5174_s23 + $0x2f8] sm:$0xff] }
  0xb7   : > { %v5590_v5 = vpop.eup %4605  ;;  %v2319_v19 = vmul.f32 %v5583_v63, %v5532_v33  ;;  %4607 = vrsqrt.f32 %v5596_v20  ;;  %vm2315_vm2 = vweird.f32 %v5534_v34  ;;  %v416_v10 = vmul.f32 %v259_v58, %v259_v58  ;;  %v4893_v58 = vld [vmem:[%s5174_s23 + $0x150] sm:$0xff] }
  0xb8   : > { %v1520_v12 = vmul.f32 %v5578_v55, %v1519_v0  ;;  %v1929_v18 = vmul.f32 %v5590_v5, %v5522_v30  ;;  %4609 = vrsqrt.f32 %v5598_v50  ;;  %v1133_v47 = vmul.f32 %v5526_v24, %v1132_v15  ;;  %vm2316_vm6 = vmor %vm2314_vm1, %vm2315_vm2 }
  0xb9   : > { %v2320_v21 = vmul.f32 %v5583_v63, %v2319_v19  ;;  %4611 = vrsqrt.f32 %v5604_v42  ;;  %640 = vadd.xlane.f32.xlu0 %v639_v17  ;;  %v879_v52 = vsel %vm479_vm0, %v455_v22, 0.0  ;;  %v1923_v38 = vmul.f32 %v5518_v56, %v1922_v16 }
  0xba   : > { %v1930_v6 = vmul.f32 %v5590_v5, %v1929_v18  ;;  %v5618_v13 = vmul.f32 0.5, %v1520_v12  ;;  %vm1925_vm4 = vweird.f32 %v5518_v56  ;;  %880 = vadd.xlane.f32.xlu2 %v879_v52  ;;  %v762_v43 = vsel %vm479_vm0, %v416_v10, 0.0 }
  0xbb   : > { %v494_v7 = vpop.xlane.xlu1 %493  ;;  %v5625_v35 = vmul.f32 0.5, %v2320_v21  ;;  %v611_v40 = vpop.xlane.xlu2 %610  ;;  %v1137_v39 = vsel %vm1136_vm3, %v5526_v24, %v1133_v47  ;;  %vm1926_vm5 = vmor %vm1924_vm13, %vm1925_vm4  ;;  %v2313_v51 = vmul.f32 %v5534_v34, %v2312_v46  ;;  %763 = vadd.xlane.f32.xlu1 %v762_v43  ;;  %vm1524_vm7 = vweird.f32 %v5520_v26 }
  0xbc   : > { %v848_v32 = vpop.xlane.xlu0 %847  ;;  %v1931_v41 = vmul.f32 0.5, %v1930_v6  ;;  %v2680_v44 = vmul.f32 %v1137_v39, %v5237_v29  ;;  %v1927_v45 = vsel %vm1926_vm5, %v5518_v56, %v1923_v38  ;;  %v5645_v14 = vmax.f32 %v611_v40, 1e-24  ;;  %v299_v40 = vld [vmem:[%s5174_s23 + $0x430] sm:$0xff]  ;;  %v220_v39 = vld [vmem:[%s5174_s23 + $0x1b8] sm:$0xff] }
  0xbd   : > { %v5635_v25 = vpop.eup %4607  ;;  %v5643_v24 = vmax.f32 %v848_v32, 1e-24  ;;  %v2759_v23 = vmul.f32 %v1927_v45, %v5231_v27  ;;  %v2317_v31 = vsel %vm2316_vm6, %v5534_v34, %v2313_v51  ;;  %v1522_v53 = vsub.f32 1.5, %v5618_v13  ;;  %v181_v51 = vld [vmem:[%s5174_s23 + $0x80] sm:$0xff] }
  0xbe   : > { %v5647_v3 = vpop.eup %4609  ;;  %v1139_v48 = vmul.f32 %v5635_v25, %v5596_v20  ;;  %4303 = vmatmul.msk.f32.gmra.mxu0 %vm479_vm0, %v2680_v44  ;;  %v2798_v56 = vmul.f32 %v2317_v31, %v5234_v28  ;;  %vm1525_vm8 = vweird.f32 %v5578_v55  ;;  %v2322_v27 = vsub.f32 1.5, %v5625_v35 }
  0xbf   : > { %v5653_v2 = vpop.eup %4611  ;;  %v1939_v29 = vmul.f32 %v5647_v3, %v5598_v50  ;;  %4613 = vrsqrt.f32 %v5643_v24  ;;  %4382 = vmatmul.msk.f32.gmra.mxu2 %vm479_vm0, %v2759_v23  ;;  %v1932_v57 = vsub.f32 1.5, %v1931_v41  ;;  %v5673_v28 = vmax.f32 %v494_v7, 1e-24  ;;  %vm5690_vm13 = vmor %vm1524_vm7, %vm1525_vm8  ;;  %v182_v7 = vld [vmem:[%s5174_s23 + $0x88] sm:$0xff] }
  0xc0   : > { %v1529_v34 = vmul.f32 %v5653_v2, %v5604_v42  ;;  %v1140_v8 = vmul.f32 %v5635_v25, %v1139_v48  ;;  %4421 = vmatmul.msk.f32.gmra.mxu3 %vm479_vm0, %v2798_v56  ;;  %4615 = vrsqrt.f32 %v5645_v14  ;;  %v337_v54 = vmul.f32 %v180_v1, %v180_v1 }
  0xc1   : > { %v1940_v59 = vmul.f32 %v5647_v3, %v1939_v29  ;;  %v417_v11 = vmul.f32 %v260_v62, %v260_v62  ;;  %vm2324_vm9 = vweird.f32 %v5532_v33  ;;  %vm1935_vm10 = vweird.f32 %v5590_v5 }
  0xc2   : > { %v1530_v61 = vmul.f32 %v5653_v2, %v1529_v34  ;;  %4617 = vrsqrt.f32 %v5673_v28  ;;  %v376_v19 = vmul.f32 %v219_v60, %v219_v60  ;;  %vm2325_vm11 = vweird.f32 %v5583_v63 }
  0xc3   : > { %v851_v4 = vpop.xlane.xlu1 %850  ;;  %v497_v9 = vpop.xlane.xlu2 %496  ;;  %vm1934_vm12 = vweird.f32 %v5522_v30  ;;  %v525_v15 = vsel %vm479_vm0, %v337_v54, 0.0  ;;  %v765_v12 = vsel %vm479_vm0, %v417_v11, 0.0  ;;  %vm1144_vm14 = vweird.f32 %v5596_v20  ;;  %vm5721_vm1 = vmor %vm2324_vm9, %vm2325_vm11 }
  0xc4   : > { %v734_v0 = vpop.xlane.xlu0 %733  ;;  %526 = vadd.xlane.f32.xlu0 %v525_v15  ;;  %766 = vadd.xlane.f32.xlu2 %v765_v12  ;;  %v642_v30 = vsel %vm479_vm0, %v376_v19, 0.0  ;;  %v1523_v16 = vmul.f32 %v5578_v55, %v1522_v53  ;;  %v1933_v21 = vmul.f32 %v5590_v5, %v1932_v57  ;;  %vm5700_vm15 = vmor %vm1934_vm12, %vm1935_vm10  ;;  %v1141_v26 = vmul.f32 0.5, %v1140_v8  ;;  %v4892_v15 = vld [vmem:[%s5174_s23 + $0x18] sm:$0xff] }
  0xc5   : > { %v5684_v18 = vpop.eup %4613  ;;  %v1941_v46 = vmul.f32 0.5, %v1940_v59  ;;  %v1531_v6 = vmul.f32 0.5, %v1530_v61  ;;  %643 = vadd.xlane.f32.xlu1 %v642_v30  ;;  %v2323_v17 = vmul.f32 %v5583_v63, %v2322_v27  ;;  %v5713_v47 = vmax.f32 %v734_v0, 1e-24 }
  0xc6   : > { %v5705_v22 = vpop.eup %4615  ;;  %v1527_v13 = vsel %vm5690_vm13, %v5578_v55, %v1523_v16  ;;  %v1937_v10 = vsel %vm5700_vm15, %v5590_v5, %v1933_v21  ;;  %v5715_v32 = vmax.f32 %v497_v9, 1e-24  ;;  %vm1944_vm2 = vweird.f32 %v5598_v50 }
  0xc7   : > { %v2329_v55 = vmul.f32 %v5684_v18, %v5643_v24  ;;  %v1539_v5 = vmul.f32 %v5705_v22, %v5645_v14  ;;  %v2719_v35 = vmul.f32 %v1527_v13, %v5249_v36  ;;  %vm1145_vm3 = vweird.f32 %v5635_v25 }
  0xc8   : > { %v5731_v52 = vpop.eup %4617  ;;  %v2760_v33 = vmul.f32 %v1937_v10, %v5252_v37  ;;  %v2327_v38 = vsel %vm5721_vm1, %v5583_v63, %v2323_v17  ;;  %4619 = vrsqrt.f32 %v5713_v47  ;;  %v1142_v41 = vsub.f32 1.5, %v1141_v26  ;;  %v4891_v63 = vld [vmem:[%s5174_s23 + $0x3c8] sm:$0xff]  ;;  %vm5763_vm6 = vmor %vm1144_vm14, %vm1145_vm3 }
  0xc9   : > { %v1942_v43 = vsub.f32 1.5, %v1941_v46  ;;  %vm1945_vm4 = vweird.f32 %v5647_v3  ;;  %v1149_v36 = vmul.f32 %v5731_v52, %v5673_v28  ;;  %4342 = vmatmul.msk.f32.gmra.mxu1 %vm479_vm0, %v2719_v35  ;;  %v1532_v45 = vsub.f32 1.5, %v1531_v6  ;;  %v261_v46 = vld [vmem:[%s5174_s23 + $0x300] sm:$0xff] }
  0xca   : > { %4383 = vmatmul.msk.f32.gmra.mxu2 %vm479_vm0, %v2760_v33  ;;  %v2799_v48 = vmul.f32 %v4891_v63, %v2327_v38  ;;  %4621 = vrsqrt.f32 %v5715_v32  ;;  %v5751_v23 = vmax.f32 %v851_v4, 1e-24  ;;  %v2330_v29 = vmul.f32 %v5684_v18, %v2329_v55  ;;  %vm5776_vm8 = vmor %vm1944_vm2, %vm1945_vm4 }
  0xcb   : > { %v5746_v37 = vpop.xlane.xlu1 %736  ;;  %v854_v31 = vpop.xlane.xlu2 %853  ;;  %v1540_v56 = vmul.f32 %v5705_v22, %v1539_v5  ;;  %v1150_v1 = vmul.f32 %v5731_v52, %v1149_v36  ;;  %v456_v62 = vmul.f32 %v299_v40, %v299_v40  ;;  %vm1535_vm5 = vweird.f32 %v5653_v2  ;;  %v300_v40 = vld [vmem:[%s5174_s23 + $0x438] sm:$0xff] }
  0xcc   : > { %v614_v44 = vpop.xlane.xlu0 %613  ;;  %4422 = vmatmul.msk.f32.gmra.mxu3 %vm479_vm0, %v2799_v48  ;;  %4623 = vrsqrt.f32 %v5751_v23  ;;  %v377_v53 = vmul.f32 %v220_v39, %v220_v39  ;;  %v338_v27 = vmul.f32 %v181_v51, %v181_v51  ;;  %vm1534_vm7 = vweird.f32 %v5604_v42 }
  0xcd   : > { %v882_v60 = vsel %vm479_vm0, %v456_v62, 0.0  ;;  %v1143_v57 = vmul.f32 %v5635_v25, %v1142_v41  ;;  %vm2334_vm9 = vweird.f32 %v5643_v24  ;;  %v1533_v61 = vmul.f32 %v5653_v2, %v1532_v45  ;;  %vm5787_vm10 = vmor %vm1534_vm7, %vm1535_vm5 }
  0xce   : > { %v5770_v8 = vpop.eup %4619  ;;  %883 = vadd.xlane.f32.xlu0 %v882_v60  ;;  %v645_v20 = vsel %vm479_vm0, %v377_v53, 0.0  ;;  %v528_v42 = vsel %vm479_vm0, %v338_v27, 0.0  ;;  %v1943_v54 = vmul.f32 %v5647_v3, %v1942_v43  ;;  %v2331_v11 = vmul.f32 0.5, %v2330_v29 }
  0xcf   : > { %v1541_v0 = vmul.f32 0.5, %v1540_v56  ;;  %v1151_v4 = vmul.f32 0.5, %v1150_v1  ;;  %646 = vadd.xlane.f32.xlu2 %v645_v20  ;;  %529 = vadd.xlane.f32.xlu1 %v528_v42  ;;  %v1147_v19 = vsel %vm5763_vm6, %v5635_v25, %v1143_v57  ;;  %v1537_v49 = vsel %vm5787_vm10, %v5653_v2, %v1533_v61  ;;  %v4895_v42 = vld [vmem:[%s5174_s23 + $0x20] sm:$0xff] }
  0xd0   : > { %v5794_v9 = vpop.eup %4621  ;;  %v2681_v12 = vmul.f32 %v4892_v15, %v1147_v19  ;;  %v1947_v30 = vsel %vm5776_vm8, %v5647_v3, %v1943_v54  ;;  %v5803_v16 = vmax.f32 %v614_v44, 1e-24  ;;  %vm1544_vm11 = vweird.f32 %v5645_v14  ;;  %v4894_v3 = vld [vmem:[%s5174_s23 + $0x298] sm:$0xff]  ;;  %v221_v15 = vld [vmem:[%s5174_s23 + $0x1c0] sm:$0xff] }
  0xd1   : > { %v1949_v25 = vmul.f32 %v5770_v8, %v5713_v47  ;;  %v1159_v21 = vmul.f32 %v5794_v9, %v5715_v32  ;;  %v2720_v26 = vmul.f32 %v4893_v58, %v1537_v49  ;;  %vm2335_vm12 = vweird.f32 %v5684_v18 }
  0xd2   : > { %v5814_v17 = vpop.eup %4623  ;;  %4304 = vmatmul.msk.f32.gmra.mxu0 %vm479_vm0, %v2681_v12  ;;  %v2761_v13 = vmul.f32 %v4894_v3, %v1947_v30  ;;  %4625 = vrsqrt.f32 %v5803_v16  ;;  %v5820_v10 = vmax.f32 %v854_v31, 1e-24  ;;  %v2332_v5 = vsub.f32 1.5, %v2331_v11  ;;  %vm5843_vm1 = vmor %vm2334_vm9, %vm2335_vm12 }
  0xd3   : > { %v5812_v2 = vpop.xlane.xlu1 %616  ;;  %v740_v55 = vpop.xlane.xlu2 %739  ;;  %v1152_v35 = vsub.f32 1.5, %v1151_v4  ;;  %v1160_v33 = vmul.f32 %v5794_v9, %v1159_v21  ;;  %v2339_v38 = vmul.f32 %v5814_v17, %v5751_v23  ;;  %4343 = vmatmul.msk.f32.gmra.mxu1 %vm479_vm0, %v2720_v26  ;;  %v1542_v41 = vsub.f32 1.5, %v1541_v0  ;;  %v4896_v4 = vld [vmem:[%s5174_s23 + $0x158] sm:$0xff]  ;;  %v301_v26 = vld [vmem:[%s5174_s23 + $0x440] sm:$0xff] }
  0xd4   : > { %v500_v6 = vpop.xlane.xlu0 %499  ;;  %4384 = vmatmul.msk.f32.gmra.mxu2 %vm479_vm0, %v2761_v13  ;;  %4627 = vrsqrt.f32 %v5820_v10  ;;  %v5831_v43 = vmax.f32 %v5746_v37, 1e-24  ;;  %v418_v36 = vmul.f32 %v261_v46, %v261_v46  ;;  %vm1154_vm13 = vweird.f32 %v5673_v28  ;;  %v262_v46 = vld [vmem:[%s5174_s23 + $0x308] sm:$0xff] }
  0xd5   : > { %vm1155_vm14 = vweird.f32 %v5731_v52  ;;  %v1950_v39 = vmul.f32 %v5770_v8, %v1949_v25  ;;  %v339_v51 = vmul.f32 %v182_v7, %v182_v7  ;;  %vm1545_vm15 = vweird.f32 %v5705_v22 }
  0xd6   : > { %4629 = vrsqrt.f32 %v5831_v43  ;;  %v768_v44 = vsel %vm479_vm0, %v418_v36, 0.0  ;;  %v457_v45 = vmul.f32 %v300_v40, %v300_v40  ;;  %v1161_v63 = vmul.f32 0.5, %v1160_v33  ;;  %vm5854_vm2 = vmor %vm1154_vm13, %vm1155_vm14 }
  0xd7   : > { %v2340_v48 = vmul.f32 %v5814_v17, %v2339_v38  ;;  %769 = vadd.xlane.f32.xlu0 %v768_v44  ;;  %v531_v31 = vsel %vm479_vm0, %v339_v51, 0.0  ;;  %v1153_v29 = vmul.f32 %v5731_v52, %v1152_v35  ;;  %v1543_v62 = vmul.f32 %v5705_v22, %v1542_v41  ;;  %vm5867_vm3 = vmor %vm1544_vm11, %vm1545_vm15 }
  0xd8   : > { %v5850_v56 = vpop.eup %4625  ;;  %532 = vadd.xlane.f32.xlu2 %v531_v31  ;;  %v885_v24 = vsel %vm479_vm0, %v457_v45, 0.0  ;;  %v2333_v53 = vmul.f32 %v5684_v18, %v2332_v5  ;;  %v5861_v27 = vmax.f32 %v500_v6, 1e-24  ;;  %v1951_v34 = vmul.f32 0.5, %v1950_v39 }
  0xd9   : > { %v1549_v60 = vmul.f32 %v5850_v56, %v5803_v16  ;;  %886 = vadd.xlane.f32.xlu1 %v885_v24  ;;  %v1157_v57 = vsel %vm5854_vm2, %v5731_v52, %v1153_v29  ;;  %vm1954_vm4 = vweird.f32 %v5713_v47  ;;  %v1547_v54 = vsel %vm5867_vm3, %v5705_v22, %v1543_v62 }
  0xda   : > { %v5880_v14 = vpop.eup %4627  ;;  %v2682_v61 = vmul.f32 %v4895_v42, %v1157_v57  ;;  %v2337_v52 = vsel %vm5843_vm1, %v5684_v18, %v2333_v53  ;;  %4631 = vrsqrt.f32 %v5861_v27  ;;  %vm1164_vm5 = vweird.f32 %v5715_v32  ;;  %v4897_v18 = vld [vmem:[%s5174_s23 + $0x3d0] sm:$0xff]  ;;  %v4899_v57 = vld [vmem:[%s5174_s23 + $0x2a0] sm:$0xff] }
  0xdb   : > { %v5878_v20 = vpop.xlane.xlu1 %502  ;;  %v620_v50 = vpop.xlane.xlu2 %619  ;;  %v2341_v11 = vmul.f32 0.5, %v2340_v48  ;;  %v2349_v0 = vmul.f32 %v5880_v14, %v5820_v10  ;;  %v2721_v19 = vmul.f32 %v4896_v4, %v1547_v54  ;;  %v1162_v22 = vsub.f32 1.5, %v1161_v63 }
  0xdc   : > { %v5876_v59 = vpop.xlane.xlu0 %856  ;;  %v5896_v12 = vpop.eup %4629  ;;  %4305 = vmatmul.msk.f32.gmra.mxu0 %vm479_vm0, %v2682_v61  ;;  %v2800_v49 = vmul.f32 %v4897_v18, %v2337_v52  ;;  %v5900_v30 = vmax.f32 %v740_v55, 1e-24  ;;  %v5903_v25 = vmax.f32 %v5812_v2, 1e-24  ;;  %vm1955_vm6 = vweird.f32 %v5770_v8 }
  0xdd   : > { %vm2344_vm7 = vweird.f32 %v5751_v23  ;;  %v1550_v21 = vmul.f32 %v5850_v56, %v1549_v60  ;;  %v1959_v58 = vmul.f32 %v5896_v12, %v5831_v43  ;;  %4344 = vmatmul.msk.f32.gmra.mxu1 %vm479_vm0, %v2721_v19  ;;  %v1952_v6 = vsub.f32 1.5, %v1951_v34  ;;  %vm5947_vm12 = vmor %vm1954_vm4, %vm1955_vm6  ;;  %v4900_v19 = vld [vmem:[%s5174_s23 + $0x3d8] sm:$0xff] }
  0xde   : > { %vm1165_vm8 = vweird.f32 %v5794_v9  ;;  %4423 = vmatmul.msk.f32.gmra.mxu3 %vm479_vm0, %v2800_v49  ;;  %4633 = vrsqrt.f32 %v5900_v30  ;;  %v378_v2 = vmul.f32 %v221_v15, %v221_v15  ;;  %v2342_v3 = vsub.f32 1.5, %v2341_v11  ;;  %v263_v11 = vld [vmem:[%s5174_s23 + $0x310] sm:$0xff] }
  0xdf   : > { %v2350_v13 = vmul.f32 %v5880_v14, %v2349_v0  ;;  %v1960_v7 = vmul.f32 %v5896_v12, %v1959_v58  ;;  %4635 = vrsqrt.f32 %v5903_v25  ;;  %v458_v35 = vmul.f32 %v301_v26, %v301_v26  ;;  %vm5925_vm9 = vmor %vm1164_vm5, %vm1165_vm8 }
  0xe0   : > { %v5919_v55 = vpop.eup %4631  ;;  %v648_v5 = vsel %vm479_vm0, %v378_v2, 0.0  ;;  %v419_v33 = vmul.f32 %v262_v46, %v262_v46  ;;  %v1163_v38 = vmul.f32 %v5794_v9, %v1162_v22  ;;  %vm2345_vm10 = vweird.f32 %v5814_v17 }
  0xe1   : > { %v1551_v41 = vmul.f32 0.5, %v1550_v21  ;;  %vm1554_vm11 = vweird.f32 %v5803_v16  ;;  %v1961_v36 = vmul.f32 0.5, %v1960_v7  ;;  %649 = vadd.xlane.f32.xlu0 %v648_v5  ;;  %v888_v44 = vsel %vm479_vm0, %v458_v35, 0.0  ;;  %vm5972_vm14 = vmor %vm2344_vm7, %vm2345_vm10 }
  0xe2   : > { %v771_v32 = vsel %vm479_vm0, %v419_v33, 0.0  ;;  %v1167_v45 = vsel %vm5925_vm9, %v5794_v9, %v1163_v38  ;;  %v1953_v37 = vmul.f32 %v5770_v8, %v1952_v6  ;;  %v2351_v31 = vmul.f32 0.5, %v2350_v13  ;;  %889 = vadd.xlane.f32.xlu2 %v888_v44  ;;  %v4898_v9 = vld [vmem:[%s5174_s23 + $0x28] sm:$0xff] }
  0xe3   : > { %v5933_v51 = vpop.xlane.xlu1 %859  ;;  %v5941_v63 = vpop.xlane.xlu2 %505  ;;  %v1169_v29 = vmul.f32 %v5919_v55, %v5861_v27  ;;  %772 = vadd.xlane.f32.xlu1 %v771_v32  ;;  %v2683_v1 = vmul.f32 %v4898_v9, %v1167_v45  ;;  %v2343_v24 = vmul.f32 %v5814_v17, %v2342_v3  ;;  %vm2354_vm13 = vweird.f32 %v5820_v10  ;;  %v4902_v45 = vld [vmem:[%s5174_s23 + $0x2a8] sm:$0xff] }
  0xe4   : > { %v5931_v39 = vpop.xlane.xlu0 %742  ;;  %v5955_v62 = vpop.eup %4633  ;;  %v1957_v47 = vsel %vm5947_vm12, %v5770_v8, %v1953_v37  ;;  %v5962_v53 = vmax.f32 %v5876_v59, 1e-24  ;;  %v5964_v28 = vmax.f32 %v620_v50, 1e-24  ;;  %vm1555_vm15 = vweird.f32 %v5850_v56  ;;  %v183_v50 = vld [vmem:[%s5174_s23 + $0x90] sm:$0xff] }
  0xe5   : > { %v5966_v34 = vpop.eup %4635  ;;  %v1969_v8 = vmul.f32 %v5955_v62, %v5900_v30  ;;  %4306 = vmatmul.msk.f32.gmra.mxu0 %vm479_vm0, %v2683_v1  ;;  %v2762_v59 = vmul.f32 %v4899_v57, %v1957_v47  ;;  %v5982_v42 = vmax.f32 %v5878_v20, 1e-24  ;;  %v1552_v61 = vsub.f32 1.5, %v1551_v41  ;;  %v222_v20 = vld [vmem:[%s5174_s23 + $0x1c8] sm:$0xff]  ;;  %vm6011_vm3 = vmor %vm1554_vm11, %vm1555_vm15  ;;  %v184_v57 = vld [vmem:[%s5174_s23 + $0x98] sm:$0xff] }
  0xe6   : > { %v1962_v23 = vsub.f32 1.5, %v1961_v36  ;;  %v1559_v54 = vmul.f32 %v5966_v34, %v5903_v25  ;;  %v2347_v52 = vsel %vm5972_vm14, %v5814_v17, %v2343_v24  ;;  %v2352_v0 = vsub.f32 1.5, %v2351_v31  ;;  %v264_v36 = vld [vmem:[%s5174_s23 + $0x318] sm:$0xff] }
  0xe7   : > { %v1170_v4 = vmul.f32 %v5919_v55, %v1169_v29  ;;  %4385 = vmatmul.msk.f32.gmra.mxu2 %vm479_vm0, %v2762_v59  ;;  %v2801_v15 = vmul.f32 %v4900_v19, %v2347_v52  ;;  %4637 = vrsqrt.f32 %v5962_v53  ;;  %vm1964_vm1 = vweird.f32 %v5831_v43 }
  0xe8   : > { %vm1965_vm2 = vweird.f32 %v5896_v12  ;;  %v1560_v22 = vmul.f32 %v5966_v34, %v1559_v54  ;;  %4639 = vrsqrt.f32 %v5964_v28  ;;  %v1970_v17 = vmul.f32 %v5955_v62, %v1969_v8  ;;  %v223_v8 = vld [vmem:[%s5174_s23 + $0x1d0] sm:$0xff] }
  0xe9   : > { %4424 = vmatmul.msk.f32.gmra.mxu3 %vm479_vm0, %v2801_v15  ;;  %4641 = vrsqrt.f32 %v5982_v42  ;;  %v340_v18 = vmul.f32 %v183_v50, %v183_v50  ;;  %v420_v49 = vmul.f32 %v263_v11, %v263_v11  ;;  %vm2355_vm4 = vweird.f32 %v5880_v14  ;;  %vm6024_vm5 = vmor %vm1964_vm1, %vm1965_vm2 }
  0xea   : > { %v379_v46 = vmul.f32 %v222_v20, %v222_v20  ;;  %v1553_v6 = vmul.f32 %v5850_v56, %v1552_v61  ;;  %v1963_v2 = vmul.f32 %v5896_v12, %v1962_v23  ;;  %v1171_v16 = vmul.f32 0.5, %v1170_v4  ;;  %vm6044_vm6 = vmor %vm2354_vm13, %vm2355_vm4 }
  0xeb   : > { %v6005_v58 = vpop.xlane.xlu1 %745  ;;  %v6018_v3 = vpop.xlane.xlu2 %862  ;;  %v534_v7 = vsel %vm479_vm0, %v340_v18, 0.0  ;;  %v774_v5 = vsel %vm479_vm0, %v420_v49, 0.0  ;;  %v2353_v35 = vmul.f32 %v5880_v14, %v2352_v0  ;;  %v1561_v33 = vmul.f32 0.5, %v1560_v22 }
  0xec   : > { %v6003_v21 = vpop.xlane.xlu0 %622  ;;  %535 = vadd.xlane.f32.xlu0 %v534_v7  ;;  %775 = vadd.xlane.f32.xlu2 %v774_v5  ;;  %v651_v38 = vsel %vm479_vm0, %v379_v46, 0.0  ;;  %v1557_v43 = vsel %vm6011_vm3, %v5850_v56, %v1553_v6  ;;  %v1967_v40 = vsel %vm6024_vm5, %v5896_v12, %v1963_v2  ;;  %vm1174_vm7 = vweird.f32 %v5861_v27  ;;  %v4901_v56 = vld [vmem:[%s5174_s23 + $0x160] sm:$0xff]  ;;  %v4908_v7 = vld [vmem:[%s5174_s23 + $0x170] sm:$0xff] }
  0xed   : > { %v6038_v41 = vpop.eup %4637  ;;  %v1971_v44 = vmul.f32 0.5, %v1970_v17  ;;  %652 = vadd.xlane.f32.xlu1 %v651_v38  ;;  %v2722_v32 = vmul.f32 %v4901_v56, %v1557_v43  ;;  %v2763_v12 = vmul.f32 %v4902_v45, %v1967_v40  ;;  %v2357_v10 = vsel %vm6044_vm6, %v5880_v14, %v2353_v35  ;;  %v4903_v14 = vld [vmem:[%s5174_s23 + $0x3e0] sm:$0xff]  ;;  %v4904_v35 = vld [vmem:[%s5174_s23 + $0x30] sm:$0xff] }
  0xee   : > { %v6051_v37 = vpop.eup %4639  ;;  %v6057_v48 = vmax.f32 %v5931_v39, 1e-24  ;;  %v6060_v31 = vmax.f32 %v5941_v63, 1e-24  ;;  %v6063_v29 = vmax.f32 %v5933_v51, 1e-24  ;;  %vm1974_vm8 = vweird.f32 %v5900_v30 }
  0xef   : > { %v6065_v9 = vpop.eup %4641  ;;  %v1172_v1 = vsub.f32 1.5, %v1171_v16  ;;  %v1569_v24 = vmul.f32 %v6051_v37, %v5964_v28  ;;  %4345 = vmatmul.msk.f32.gmra.mxu1 %vm479_vm0, %v2722_v32  ;;  %4386 = vmatmul.msk.f32.gmra.mxu2 %vm479_vm0, %v2763_v12  ;;  %v2802_v39 = vmul.f32 %v4903_v14, %v2357_v10  ;;  %v302_v63 = vld [vmem:[%s5174_s23 + $0x448] sm:$0xff]  ;;  %v1562_v47 = vsub.f32 1.5, %v1561_v33  ;;  %v4906_v32 = vld [vmem:[%s5174_s23 + $0x2b0] sm:$0xff] }
  0xf0   : > { %v2359_v51 = vmul.f32 %v6038_v41, %v5962_v53  ;;  %v1179_v60 = vmul.f32 %v6065_v9, %v5982_v42  ;;  %4643 = vrsqrt.f32 %v6057_v48  ;;  %vm1175_vm9 = vweird.f32 %v5919_v55  ;;  %v4905_v33 = vld [vmem:[%s5174_s23 + $0x168] sm:$0xff] }
  0xf1   : > { %v1972_v59 = vsub.f32 1.5, %v1971_v44  ;;  %vm1564_vm10 = vweird.f32 %v5903_v25  ;;  %4425 = vmatmul.msk.f32.gmra.mxu3 %vm479_vm0, %v2802_v39  ;;  %4645 = vrsqrt.f32 %v6060_v31  ;;  %vm1565_vm11 = vweird.f32 %v5966_v34  ;;  %vm6100_vm13 = vmor %vm1174_vm7, %vm1175_vm9  ;;  %v185_v44 = vld [vmem:[%s5174_s23 + $0xa0] sm:$0xff] }
  0xf2   : > { %v1180_v54 = vmul.f32 %v6065_v9, %v1179_v60  ;;  %4647 = vrsqrt.f32 %v6063_v29  ;;  %v459_v52 = vmul.f32 %v302_v63, %v302_v63  ;;  %vm1975_vm12 = vweird.f32 %v5955_v62  ;;  %vm6110_vm14 = vmor %vm1564_vm10, %vm1565_vm11 }
  0xf3   : > { %v6087_v23 = vpop.xlane.xlu1 %625  ;;  %v6092_v50 = vpop.xlane.xlu2 %748  ;;  %v1570_v11 = vmul.f32 %v6051_v37, %v1569_v24  ;;  %v380_v0 = vmul.f32 %v223_v8, %v223_v8  ;;  %v341_v4 = vmul.f32 %v184_v57, %v184_v57  ;;  %v2360_v15 = vmul.f32 %v6038_v41, %v2359_v51  ;;  %vm6134_vm15 = vmor %vm1974_vm8, %vm1975_vm12  ;;  %v303_v8 = vld [vmem:[%s5174_s23 + $0x450] sm:$0xff] }
  0xf4   : > { %v6085_v61 = vpop.xlane.xlu0 %508  ;;  %v891_v20 = vsel %vm479_vm0, %v459_v52, 0.0  ;;  %v1173_v22 = vmul.f32 %v5919_v55, %v1172_v1  ;;  %v1563_v17 = vmul.f32 %v5966_v34, %v1562_v47  ;;  %v1973_v26 = vmul.f32 %v5955_v62, %v1972_v59 }
  0xf5   : > { %892 = vadd.xlane.f32.xlu0 %v891_v20  ;;  %v654_v27 = vsel %vm479_vm0, %v380_v0, 0.0  ;;  %v537_v49 = vsel %vm479_vm0, %v341_v4, 0.0  ;;  %v1181_v6 = vmul.f32 0.5, %v1180_v54  ;;  %v6126_v13 = vmax.f32 %v6003_v21, 1e-24 }
  0xf6   : > { %v6117_v46 = vpop.eup %4643  ;;  %655 = vadd.xlane.f32.xlu2 %v654_v27  ;;  %538 = vadd.xlane.f32.xlu1 %v537_v49  ;;  %v1177_v25 = vsel %vm6100_vm13, %v5919_v55, %v1173_v22  ;;  %v1567_v2 = vsel %vm6110_vm14, %v5966_v34, %v1563_v17  ;;  %v1571_v55 = vmul.f32 0.5, %v1570_v11  ;;  %v2361_v43 = vmul.f32 0.5, %v2360_v15  ;;  %v4907_v27 = vld [vmem:[%s5174_s23 + $0x38] sm:$0xff] }
  0xf7   : > { %v6128_v16 = vpop.eup %4645  ;;  %v1979_v5 = vmul.f32 %v6117_v46, %v6057_v48  ;;  %v2684_v34 = vmul.f32 %v4904_v35, %v1177_v25  ;;  %v2723_v21 = vmul.f32 %v4905_v33, %v1567_v2  ;;  %v1977_v30 = vsel %vm6134_vm15, %v5955_v62, %v1973_v26  ;;  %v4909_v33 = vld [vmem:[%s5174_s23 + $0x3e8] sm:$0xff] }
  0xf8   : > { %v6142_v38 = vpop.eup %4647  ;;  %v1189_v40 = vmul.f32 %v6128_v16, %v6060_v31  ;;  %4649 = vrsqrt.f32 %v6126_v13  ;;  %vm1574_vm1 = vweird.f32 %v5964_v28  ;;  %vm1184_vm2 = vweird.f32 %v5982_v42 }
  0xf9   : > { %v2369_v56 = vmul.f32 %v6142_v38, %v6063_v29  ;;  %4307 = vmatmul.msk.f32.gmra.mxu0 %vm479_vm0, %v2684_v34  ;;  %4346 = vmatmul.msk.f32.gmra.mxu1 %vm479_vm0, %v2723_v21  ;;  %v2764_v45 = vmul.f32 %v4906_v32, %v1977_v30  ;;  %v1182_v10 = vsub.f32 1.5, %v1181_v6  ;;  %v6165_v24 = vmax.f32 %v6018_v3, 1e-24 }
  0xfa   : > { %v1190_v1 = vmul.f32 %v6128_v16, %v1189_v40  ;;  %v6168_v14 = vmax.f32 %v6005_v58, 1e-24  ;;  %v1572_v63 = vsub.f32 1.5, %v1571_v55  ;;  %v1980_v47 = vmul.f32 %v6117_v46, %v1979_v5 }
  0xfb   : > { %v6161_v62 = vpop.xlane.xlu1 %511  ;;  %v6170_v39 = vpop.xlane.xlu2 %628  ;;  %4387 = vmatmul.msk.f32.gmra.mxu2 %vm479_vm0, %v2764_v45  ;;  %v421_v51 = vmul.f32 %v264_v36, %v264_v36  ;;  %v342_v60 = vmul.f32 %v185_v44, %v185_v44  ;;  %v2362_v57 = vsub.f32 1.5, %v2361_v43  ;;  %vm2365_vm3 = vweird.f32 %v6038_v41  ;;  %v304_v43 = vld [vmem:[%s5174_s23 + $0x458] sm:$0xff] }
  0xfc   : > { %v6159_v12 = vpop.xlane.xlu0 %865  ;;  %vm1185_vm4 = vweird.f32 %v6065_v9  ;;  %4651 = vrsqrt.f32 %v6165_v24  ;;  %vm1575_vm5 = vweird.f32 %v6051_v37  ;;  %v2370_v58 = vmul.f32 %v6142_v38, %v2369_v56 }
  0xfd   : > { %4653 = vrsqrt.f32 %v6168_v14  ;;  %v777_v3 = vsel %vm479_vm0, %v421_v51, 0.0  ;;  %v1191_v54 = vmul.f32 0.5, %v1190_v1  ;;  %v540_v52 = vsel %vm479_vm0, %v342_v60, 0.0  ;;  %vm1186_vm7 = vmor %vm1184_vm2, %vm1185_vm4 }
  0xfe   : > { %v6182_v59 = vpop.eup %4649  ;;  %778 = vadd.xlane.f32.xlu0 %v777_v3  ;;  %v460_v11 = vmul.f32 %v303_v8, %v303_v8  ;;  %v1183_v0 = vmul.f32 %v6065_v9, %v1182_v10  ;;  %vm2364_vm6 = vweird.f32 %v5962_v53  ;;  %v6189_v4 = vmul.f32 0.5, %v1980_v47  ;;  %541 = vadd.xlane.f32.xlu2 %v540_v52  ;;  %vm6198_vm8 = vmor %vm1574_vm1, %vm1575_vm5 }
  0xff   : > { %v1579_v19 = vmul.f32 %v6182_v59, %v6126_v13  ;;  %v1573_v15 = vmul.f32 %v6051_v37, %v1572_v63  ;;  %v2363_v22 = vmul.f32 %v6038_v41, %v2362_v57  ;;  %v6206_v17 = vmax.f32 %v6085_v61, 1e-24  ;;  %vm6210_vm9 = vmor %vm2364_vm6, %vm2365_vm3 }
 0x100   : > { %v894_v53 = vsel %vm479_vm0, %v460_v11, 0.0  ;;  %v1187_v42 = vsel %vm1186_vm7, %v6065_v9, %v1183_v0  ;;  %vm1984_vm10 = vweird.f32 %v6057_v48  ;;  %v6215_v28 = vmul.f32 0.5, %v2370_v58 }
 0x101   : > { %895 = vadd.xlane.f32.xlu1 %v894_v53  ;;  %v2685_v49 = vmul.f32 %v4907_v27, %v1187_v42  ;;  %v1577_v9 = vsel %vm6198_vm8, %v6051_v37, %v1573_v15  ;;  %v6222_v61 = vmax.f32 %v6092_v50, 1e-24  ;;  %v1192_v2 = vsub.f32 1.5, %v1191_v54  ;;  %v224_v37 = vld [vmem:[%s5174_s23 + $0x1d8] sm:$0xff]  ;;  %v4910_v54 = vld [vmem:[%s5174_s23 + $0x40] sm:$0xff] }
 0x102   : > { %v6228_v25 = vpop.eup %4651  ;;  %v2724_v55 = vmul.f32 %v4908_v7, %v1577_v9  ;;  %v2367_v5 = vsel %vm6210_vm9, %v6038_v41, %v2363_v22  ;;  %4655 = vrsqrt.f32 %v6206_v17  ;;  %vm1985_vm11 = vweird.f32 %v6117_v46  ;;  %v265_v41 = vld [vmem:[%s5174_s23 + $0x320] sm:$0xff]  ;;  %v4912_v7 = vld [vmem:[%s5174_s23 + $0x3f0] sm:$0xff] }
 0x103   : > { %v6226_v6 = vpop.xlane.xlu1 %868  ;;  %v6236_v50 = vpop.xlane.xlu2 %514  ;;  %vm1194_vm12 = vweird.f32 %v6060_v31  ;;  %v2379_v34 = vmul.f32 %v6228_v25, %v6165_v24  ;;  %4308 = vmatmul.msk.f32.gmra.mxu0 %vm479_vm0, %v2685_v49  ;;  %v2803_v21 = vmul.f32 %v4909_v33, %v2367_v5  ;;  %vm1195_vm13 = vweird.f32 %v6128_v16  ;;  %vm6294_vm3 = vmor %vm1984_vm10, %vm1985_vm11  ;;  %v186_v49 = vld [vmem:[%s5174_s23 + $0xa8] sm:$0xff] }
 0x104   : > { %v6224_v26 = vpop.xlane.xlu0 %751  ;;  %v6238_v35 = vpop.eup %4653  ;;  %v1580_v40 = vmul.f32 %v6182_v59, %v1579_v19  ;;  %4347 = vmatmul.msk.f32.gmra.mxu1 %vm479_vm0, %v2724_v55  ;;  %4657 = vrsqrt.f32 %v6222_v61  ;;  %v1982_v36 = vsub.f32 1.5, %v6189_v4  ;;  %v6258_v56 = vmax.f32 %v6087_v23, 1e-24  ;;  %vm6264_vm14 = vmor %vm1194_vm12, %vm1195_vm13  ;;  %v266_v5 = vld [vmem:[%s5174_s23 + $0x328] sm:$0xff] }
 0x105   : > { %v1989_v30 = vmul.f32 %v6238_v35, %v6168_v14  ;;  %v2380_v44 = vmul.f32 %v6228_v25, %v2379_v34  ;;  %4426 = vmatmul.msk.f32.gmra.mxu3 %vm479_vm0, %v2803_v21  ;;  %v381_v32 = vmul.f32 %v224_v37, %v224_v37  ;;  %v2372_v45 = vsub.f32 1.5, %v6215_v28  ;;  %v225_v37 = vld [vmem:[%s5174_s23 + $0x1e0] sm:$0xff] }
 0x106   : > { %v461_v10 = vmul.f32 %v304_v43, %v304_v43  ;;  %v422_v1 = vmul.f32 %v265_v41, %v265_v41  ;;  %v1193_v63 = vmul.f32 %v6128_v16, %v1192_v2  ;;  %vm2375_vm15 = vweird.f32 %v6142_v38 }
 0x107   : > { %v1990_v51 = vmul.f32 %v6238_v35, %v1989_v30  ;;  %4659 = vrsqrt.f32 %v6258_v56  ;;  %v657_v23 = vsel %vm479_vm0, %v381_v32, 0.0  ;;  %v1581_v8 = vmul.f32 0.5, %v1580_v40 }
 0x108   : > { %v6272_v60 = vpop.eup %4655  ;;  %658 = vadd.xlane.f32.xlu0 %v657_v23  ;;  %v897_v57 = vsel %vm479_vm0, %v461_v10, 0.0  ;;  %v780_v31 = vsel %vm479_vm0, %v422_v1, 0.0  ;;  %v1197_v58 = vsel %vm6264_vm14, %v6128_v16, %v1193_v63  ;;  %vm2374_vm1 = vweird.f32 %v6063_v29 }
 0x109   : > { %vm1584_vm2 = vweird.f32 %v6126_v13  ;;  %v6281_v3 = vmul.f32 0.5, %v2380_v44  ;;  %898 = vadd.xlane.f32.xlu2 %v897_v57  ;;  %781 = vadd.xlane.f32.xlu1 %v780_v31  ;;  %v2686_v52 = vmul.f32 %v4910_v54, %v1197_v58  ;;  %v1199_v19 = vmul.f32 %v6272_v60, %v6206_v17  ;;  %vm6311_vm4 = vmor %vm2374_vm1, %vm2375_vm15  ;;  %v4913_v31 = vld [vmem:[%s5174_s23 + $0x178] sm:$0xff] }
 0x10a   : > { %v6288_v4 = vpop.eup %4657  ;;  %v1983_v15 = vmul.f32 %v6117_v46, %v1982_v36  ;;  %v2373_v20 = vmul.f32 %v6142_v38, %v2372_v45  ;;  %v6303_v53 = vmax.f32 %v6159_v12, 1e-24  ;;  %vm2384_vm5 = vweird.f32 %v6165_v24 }
 0x10b   : > { %v6286_v0 = vpop.xlane.xlu1 %754  ;;  %v6305_v42 = vpop.xlane.xlu2 %871  ;;  %v1991_v22 = vmul.f32 0.5, %v1990_v51  ;;  %v1999_v12 = vmul.f32 %v6288_v4, %v6222_v61  ;;  %4309 = vmatmul.msk.f32.gmra.mxu0 %vm479_vm0, %v2686_v52  ;;  %v6320_v18 = vmax.f32 %v6170_v39, 1e-24  ;;  %v1582_v28 = vsub.f32 1.5, %v1581_v8  ;;  %v4911_v39 = vld [vmem:[%s5174_s23 + $0x2b8] sm:$0xff] }
 0x10c   : > { %v6284_v11 = vpop.xlane.xlu0 %631  ;;  %v1987_v29 = vsel %vm6294_vm3, %v6117_v46, %v1983_v15  ;;  %v2377_v27 = vsel %vm6311_vm4, %v6142_v38, %v2373_v20  ;;  %4661 = vrsqrt.f32 %v6303_v53  ;;  %vm1585_vm6 = vweird.f32 %v6182_v59  ;;  %v4914_v20 = vld [vmem:[%s5174_s23 + $0x2c0] sm:$0xff] }
 0x10d   : > { %v6330_v9 = vpop.eup %4659  ;;  %vm1994_vm7 = vweird.f32 %v6168_v14  ;;  %v2765_v2 = vmul.f32 %v4911_v39, %v1987_v29  ;;  %v2804_v55 = vmul.f32 %v4912_v7, %v2377_v27  ;;  %v2382_v46 = vsub.f32 1.5, %v6281_v3  ;;  %vm6355_vm8 = vmor %vm1584_vm2, %vm1585_vm6 }
 0x10e   : > { %v1200_v34 = vmul.f32 %v6272_v60, %v1199_v19  ;;  %v1589_v38 = vmul.f32 %v6330_v9, %v6258_v56  ;;  %4663 = vrsqrt.f32 %v6320_v18  ;;  %v1992_v33 = vsub.f32 1.5, %v1991_v22  ;;  %v305_v22 = vld [vmem:[%s5174_s23 + $0x460] sm:$0xff] }
 0x10f   : > { %v2000_v21 = vmul.f32 %v6288_v4, %v1999_v12  ;;  %4388 = vmatmul.msk.f32.gmra.mxu2 %vm479_vm0, %v2765_v2  ;;  %4427 = vmatmul.msk.f32.gmra.mxu3 %vm479_vm0, %v2804_v55  ;;  %v6347_v43 = vmax.f32 %v6161_v62, 1e-24  ;;  %v343_v41 = vmul.f32 %v186_v49, %v186_v49  ;;  %v423_v30 = vmul.f32 %v266_v5, %v266_v5  ;;  %v226_v12 = vld [vmem:[%s5174_s23 + $0x1e8] sm:$0xff]  ;;  %v4915_v49 = vld [vmem:[%s5174_s23 + $0x3f8] sm:$0xff] }
 0x110   : > { %v1590_v40 = vmul.f32 %v6330_v9, %v1589_v38  ;;  %v382_v36 = vmul.f32 %v225_v37, %v225_v37  ;;  %v1583_v44 = vmul.f32 %v6182_v59, %v1582_v28  ;;  %vm2385_vm9 = vweird.f32 %v6228_v25 }
 0x111   : > { %vm1995_vm10 = vweird.f32 %v6238_v35  ;;  %4665 = vrsqrt.f32 %v6347_v43  ;;  %v543_v62 = vsel %vm479_vm0, %v343_v41, 0.0  ;;  %v1201_v13 = vmul.f32 0.5, %v1200_v34  ;;  %vm6398_vm13 = vmor %vm2384_vm5, %vm2385_vm9 }
 0x112   : > { %v6367_v1 = vpop.eup %4661  ;;  %544 = vadd.xlane.f32.xlu0 %v543_v62  ;;  %v783_v63 = vsel %vm479_vm0, %v423_v30, 0.0  ;;  %v660_v47 = vsel %vm479_vm0, %v382_v36, 0.0  ;;  %v1587_v51 = vsel %vm6355_vm8, %v6182_v59, %v1583_v44  ;;  %vm1204_vm11 = vweird.f32 %v6206_v17  ;;  %vm1996_vm12 = vmor %vm1994_vm7, %vm1995_vm10  ;;  %v4919_v17 = vld [vmem:[%s5174_s23 + $0x50] sm:$0xff] }
 0x113   : > { %v6365_v10 = vpop.xlane.xlu1 %634  ;;  %v6374_v23 = vpop.xlane.xlu2 %757  ;;  %v2001_v8 = vmul.f32 0.5, %v2000_v21  ;;  %v2389_v57 = vmul.f32 %v6367_v1, %v6303_v53  ;;  %784 = vadd.xlane.f32.xlu2 %v783_v63  ;;  %661 = vadd.xlane.f32.xlu1 %v660_v47  ;;  %v2725_v58 = vmul.f32 %v4913_v31, %v1587_v51  ;;  %v1993_v3 = vmul.f32 %v6238_v35, %v1992_v33 }
 0x114   : > { %v6363_v45 = vpop.xlane.xlu0 %517  ;;  %v6381_v54 = vpop.eup %4663  ;;  %v1591_v59 = vmul.f32 0.5, %v1590_v40  ;;  %v2383_v52 = vmul.f32 %v6228_v25, %v2382_v46  ;;  %v6389_v16 = vmax.f32 %v6224_v26, 1e-24  ;;  %v6392_v19 = vmax.f32 %v6236_v50, 1e-24 }
 0x115   : > { %vm2004_vm14 = vweird.f32 %v6222_v61  ;;  %vm1594_vm15 = vweird.f32 %v6258_v56  ;;  %v1599_v14 = vmul.f32 %v6381_v54, %v6320_v18  ;;  %4348 = vmatmul.msk.f32.gmra.mxu1 %vm479_vm0, %v2725_v58  ;;  %v1997_v26 = vsel %vm1996_vm12, %v6238_v35, %v1993_v3  ;;  %v187_v35 = vld [vmem:[%s5174_s23 + $0xb0] sm:$0xff]  ;;  %v4916_v58 = vld [vmem:[%s5174_s23 + $0x48] sm:$0xff] }
 0x116   : > { %v1202_v50 = vsub.f32 1.5, %v1201_v13  ;;  %v2766_v24 = vmul.f32 %v4914_v20, %v1997_v26  ;;  %v2387_v48 = vsel %vm6398_vm13, %v6228_v25, %v2383_v52  ;;  %4667 = vrsqrt.f32 %v6389_v16  ;;  %v188_v52 = vld [vmem:[%s5174_s23 + $0xb8] sm:$0xff]  ;;  %v4917_v26 = vld [vmem:[%s5174_s23 + $0x180] sm:$0xff] }
 0x117   : > { %v6415_v28 = vpop.eup %4665  ;;  %v2002_v29 = vsub.f32 1.5, %v2001_v8  ;;  %v2390_v27 = vmul.f32 %v6367_v1, %v2389_v57  ;;  %v2805_v39 = vmul.f32 %v4915_v49, %v2387_v48  ;;  %4669 = vrsqrt.f32 %v6392_v19 }
 0x118   : > { %v1592_v2 = vsub.f32 1.5, %v1591_v59  ;;  %v1600_v7 = vmul.f32 %v6381_v54, %v1599_v14  ;;  %v1209_v25 = vmul.f32 %v6415_v28, %v6347_v43  ;;  %4389 = vmatmul.msk.f32.gmra.mxu2 %vm479_vm0, %v2766_v24  ;;  %v6426_v55 = vmax.f32 %v6226_v6, 1e-24 }
 0x119   : > { %vm1205_vm1 = vweird.f32 %v6272_v60  ;;  %vm2005_vm2 = vweird.f32 %v6288_v4  ;;  %4428 = vmatmul.msk.f32.gmra.mxu3 %vm479_vm0, %v2805_v39  ;;  %v462_v5 = vmul.f32 %v305_v22, %v305_v22  ;;  %v383_v37 = vmul.f32 %v226_v12, %v226_v12  ;;  %v306_v39 = vld [vmem:[%s5174_s23 + $0x468] sm:$0xff] }
 0x11a   : > { %vm1595_vm3 = vweird.f32 %v6330_v9  ;;  %v1210_v34 = vmul.f32 %v6415_v28, %v1209_v25  ;;  %4671 = vrsqrt.f32 %v6426_v55  ;;  %v344_v38 = vmul.f32 %v187_v35, %v187_v35  ;;  %vm6451_vm4 = vmor %vm1204_vm11, %vm1205_vm1 }
 0x11b   : > { %v6436_v33 = vpop.xlane.xlu2 %637  ;;  %v6438_v6 = vmul.f32 0.5, %v2390_v27  ;;  %v900_v21 = vsel %vm479_vm0, %v462_v5, 0.0  ;;  %v663_v41 = vsel %vm479_vm0, %v383_v37, 0.0  ;;  %v1203_v40 = vmul.f32 %v6272_v60, %v1202_v50  ;;  %v6443_v30 = vpop.xlane.xlu1 %520  ;;  %vm6466_vm5 = vmor %vm2004_vm14, %vm2005_vm2 }
 0x11c   : > { %v6431_v46 = vpop.xlane.xlu0 %874  ;;  %v6445_v36 = vpop.eup %4667  ;;  %v6455_v32 = vmul.f32 0.5, %v1600_v7  ;;  %901 = vadd.xlane.f32.xlu0 %v900_v21  ;;  %664 = vadd.xlane.f32.xlu2 %v663_v41  ;;  %v546_v62 = vsel %vm479_vm0, %v344_v38, 0.0  ;;  %v1593_v13 = vmul.f32 %v6330_v9, %v1592_v2  ;;  %v2003_v63 = vmul.f32 %v6288_v4, %v2002_v29  ;;  %vm1596_vm6 = vmor %vm1594_vm15, %vm1595_vm3 }
 0x11d   : > { %v6460_v47 = vpop.eup %4669  ;;  %v1211_v51 = vmul.f32 0.5, %v1210_v34  ;;  %v2009_v8 = vmul.f32 %v6445_v36, %v6389_v16  ;;  %547 = vadd.xlane.f32.xlu1 %v546_v62  ;;  %v1207_v57 = vsel %vm6451_vm4, %v6272_v60, %v1203_v40  ;;  %v6476_v31 = vmax.f32 %v6284_v11, 1e-24  ;;  %v267_v11 = vld [vmem:[%s5174_s23 + $0x330] sm:$0xff] }
 0x11e   : > { %v1219_v61 = vmul.f32 %v6460_v47, %v6392_v19  ;;  %v2687_v3 = vmul.f32 %v4916_v58, %v1207_v57  ;;  %vm2395_vm7 = vweird.f32 %v6367_v1  ;;  %v1597_v59 = vsel %vm1596_vm6, %v6330_v9, %v1593_v13  ;;  %v4918_v9 = vld [vmem:[%s5174_s23 + $0x2c8] sm:$0xff]  ;;  %v227_v57 = vld [vmem:[%s5174_s23 + $0x1f0] sm:$0xff]  ;;  %v4921_v58 = vld [vmem:[%s5174_s23 + $0x400] sm:$0xff] }
 0x11f   : > { %v2007_v60 = vsel %vm6466_vm5, %v6288_v4, %v2003_v63  ;;  %4673 = vrsqrt.f32 %v6476_v31  ;;  %v2392_v15 = vsub.f32 1.5, %v6438_v6  ;;  %v1602_v14 = vsub.f32 1.5, %v6455_v32 }
 0x120   : > { %v6493_v56 = vpop.eup %4671  ;;  %4310 = vmatmul.msk.f32.gmra.mxu0 %vm479_vm0, %v2687_v3  ;;  %v2726_v50 = vmul.f32 %v4917_v26, %v1597_v59  ;;  %v2767_v20 = vmul.f32 %v4918_v9, %v2007_v60  ;;  %v1212_v24 = vsub.f32 1.5, %v1211_v51  ;;  %v2010_v4 = vmul.f32 %v6445_v36, %v2009_v8  ;;  %v307_v9 = vld [vmem:[%s5174_s23 + $0x470] sm:$0xff] }
 0x121   : > { %v2399_v48 = vmul.f32 %v6493_v56, %v6426_v55  ;;  %v6504_v22 = vmax.f32 %v6305_v42, 1e-24  ;;  %v1220_v12 = vmul.f32 %v6460_v47, %v1219_v61  ;;  %v6510_v29 = vmax.f32 %v6286_v0, 1e-24 }
 0x122   : > { %4349 = vmatmul.msk.f32.gmra.mxu1 %vm479_vm0, %v2726_v50  ;;  %4390 = vmatmul.msk.f32.gmra.mxu2 %vm479_vm0, %v2767_v20  ;;  %v424_v27 = vmul.f32 %v267_v11, %v267_v11  ;;  %v345_v49 = vmul.f32 %v188_v52, %v188_v52  ;;  %vm2394_vm8 = vweird.f32 %v6303_v53  ;;  %vm1215_vm9 = vweird.f32 %v6415_v28  ;;  %v268_v20 = vld [vmem:[%s5174_s23 + $0x338] sm:$0xff] }
 0x123   : > { %v2400_v35 = vmul.f32 %v6493_v56, %v2399_v48  ;;  %4675 = vrsqrt.f32 %v6504_v22  ;;  %vm1604_vm10 = vweird.f32 %v6320_v18  ;;  %vm1605_vm11 = vweird.f32 %v6381_v54  ;;  %v6523_v2 = vpop.xlane.xlu2 %523  ;;  %vm6529_vm12 = vmor %vm2394_vm8, %vm2395_vm7  ;;  %v6536_v34 = vpop.xlane.xlu1 %877 }
 0x124   : > { %v6517_v42 = vpop.xlane.xlu0 %760  ;;  %4677 = vrsqrt.f32 %v6510_v29  ;;  %v786_v0 = vsel %vm479_vm0, %v424_v27, 0.0  ;;  %vm1214_vm13 = vweird.f32 %v6347_v43  ;;  %v549_v25 = vsel %vm479_vm0, %v345_v49, 0.0  ;;  %vm1606_vm1 = vmor %vm1604_vm10, %vm1605_vm11 }
 0x125   : > { %v6525_v7 = vpop.eup %4673  ;;  %787 = vadd.xlane.f32.xlu0 %v786_v0  ;;  %v463_v5 = vmul.f32 %v306_v39, %v306_v39  ;;  %v1213_v37 = vmul.f32 %v6415_v28, %v1212_v24  ;;  %vm6540_vm14 = vmor %vm1214_vm13, %vm1215_vm9  ;;  %v2011_v6 = vmul.f32 0.5, %v2010_v4  ;;  %vm2014_vm15 = vweird.f32 %v6389_v16  ;;  %550 = vadd.xlane.f32.xlu2 %v549_v25 }
 0x126   : > { %v1221_v21 = vmul.f32 0.5, %v1220_v12  ;;  %v1603_v43 = vmul.f32 %v6381_v54, %v1602_v14  ;;  %v2393_v41 = vmul.f32 %v6367_v1, %v2392_v15  ;;  %v2401_v44 = vmul.f32 0.5, %v2400_v35 }
 0x127   : > { %v903_v32 = vsel %vm479_vm0, %v463_v5, 0.0  ;;  %v1217_v62 = vsel %vm6540_vm14, %v6415_v28, %v1213_v37  ;;  %v6558_v13 = vmax.f32 %v6363_v45, 1e-24  ;;  %v1609_v63 = vmul.f32 %v6525_v7, %v6476_v31  ;;  %v4920_v28 = vld [vmem:[%s5174_s23 + $0x188] sm:$0xff] }
 0x128   : > { %v6547_v40 = vpop.f32.mrf.mxu2  ;;  %904 = vadd.xlane.f32.xlu1 %v903_v32  ;;  %v2688_v51 = vmul.f32 %v4919_v17, %v1217_v62  ;;  %v1607_v18 = vsel %vm1606_vm1, %v6381_v54, %v1603_v43  ;;  %v2397_v8 = vsel %vm6529_vm12, %v6367_v1, %v2393_v41  ;;  %vm1224_vm2 = vweird.f32 %v6392_v19  ;;  %v3681_v32 = vpop.f32.mrf.mxu3  ;;  %v4922_v17 = vld [vmem:[%s5174_s23 + $0x58] sm:$0xff] }
 0x129   : > { %v6568_v61 = vpop.eup %4675  ;;  %v2727_v45 = vmul.f32 %v4920_v28, %v1607_v18  ;;  %v2806_v3 = vmul.f32 %v4921_v58, %v2397_v8  ;;  %4679 = vrsqrt.f32 %v6558_v13  ;;  %v2012_v54 = vsub.f32 1.5, %v2011_v6  ;;  %v4923_v18 = vld [vmem:[%s5174_s23 + $0x2d0] sm:$0xff]  ;;  %v4924_v28 = vld [vmem:[%s5174_s23 + $0x408] sm:$0xff]  ;;  %v3444_v58 = vpop.f32.mrf.mxu1 }
 0x12a   : > { %v6574_v59 = vpop.eup %4677  ;;  %v1222_v60 = vsub.f32 1.5, %v1221_v21  ;;  %v2409_v1 = vmul.f32 %v6568_v61, %v6504_v22  ;;  %4311 = vmatmul.msk.f32.gmra.mxu0 %vm479_vm0, %v2688_v51  ;;  %v6580_v11 = vmax.f32 %v6374_v23, 1e-24  ;;  %v6582_v52 = vpop.f32.mrf.mxu0  ;;  %v2402_v15 = vsub.f32 1.5, %v2401_v44 }
 0x12b   : > { %v2019_v14 = vmul.f32 %v6574_v59, %v6510_v29  ;;  %4350 = vmatmul.msk.f32.gmra.mxu1 %vm479_vm0, %v2727_v45  ;;  %4429 = vmatmul.msk.f32.gmra.mxu3 %vm479_vm0, %v2806_v3  ;;  %v6589_v26 = vmax.f32 %v6365_v10, 1e-24  ;;  %v384_v50 = vmul.f32 %v227_v57, %v227_v57  ;;  %vm2015_vm3 = vweird.f32 %v6445_v36  ;;  %v189_v3 = vld [vmem:[%s5174_s23 + $0xc0] sm:$0xff] }
 0x12c   : > { %vm1225_vm4 = vweird.f32 %v6460_v47  ;;  %v1610_v23 = vmul.f32 %v6525_v7, %v1609_v63  ;;  %4681 = vrsqrt.f32 %v6580_v11  ;;  %vm2405_vm5 = vweird.f32 %v6493_v56  ;;  %v6602_v4 = vpop.xlane.xlu0 %640  ;;  %vm6614_vm6 = vmor %vm2014_vm15, %vm2015_vm3 }
 0x12d   : > { %v2020_v24 = vmul.f32 %v6574_v59, %v2019_v14  ;;  %4683 = vrsqrt.f32 %v6589_v26  ;;  %v666_v10 = vsel %vm479_vm0, %v384_v50, 0.0  ;;  %v2410_v48 = vmul.f32 %v6568_v61, %v2409_v1  ;;  %v6606_v39 = vpop.xlane.xlu2 %880  ;;  %vm6634_vm8 = vmor %vm1224_vm2, %vm1225_vm4 }
 0x12e   : > { %667 = vadd.xlane.f32.xlu0 %v666_v10  ;;  %v464_v12 = vmul.f32 %v307_v9, %v307_v9  ;;  %v425_v27 = vmul.f32 %v268_v20, %v268_v20  ;;  %v1223_v49 = vmul.f32 %v6460_v47, %v1222_v60  ;;  %vm2404_vm7 = vweird.f32 %v6426_v55  ;;  %v6626_v37 = vpop.xlane.xlu1 %763 }
 0x12f   : > { %v6608_v35 = vpop.eup %4679  ;;  %v2013_v53 = vmul.f32 %v6445_v36, %v2012_v54  ;;  %v2403_v25 = vmul.f32 %v6493_v56, %v2402_v15  ;;  %v6622_v5 = vmax.f32 %v6431_v46, 1e-24  ;;  %v6638_v55 = vmul.f32 0.5, %v1610_v23  ;;  %vm6648_vm10 = vmor %vm2404_vm7, %vm2405_vm5  ;;  %v269_v54 = vld [vmem:[%s5174_s23 + $0x340] sm:$0xff] }
 0x130   : > { %v6628_v38 = vpop.f32.mrf.mxu2  ;;  %vm1614_vm9 = vweird.f32 %v6476_v31  ;;  %v6641_v46 = vmul.f32 0.5, %v2020_v24  ;;  %v1229_v6 = vmul.f32 %v6608_v35, %v6558_v13  ;;  %v906_v21 = vsel %vm479_vm0, %v464_v12, 0.0  ;;  %v228_v12 = vld [vmem:[%s5174_s23 + $0x1f8] sm:$0xff] }
 0x131   : > { %vm2414_vm11 = vweird.f32 %v6504_v22  ;;  %907 = vadd.xlane.f32.xlu2 %v906_v21  ;;  %v789_v43 = vsel %vm479_vm0, %v425_v27, 0.0  ;;  %v1227_v41 = vsel %vm6634_vm8, %v6460_v47, %v1223_v49  ;;  %v2017_v44 = vsel %vm6614_vm6, %v6445_v36, %v2013_v53  ;;  %v3447_v22 = vpop.f32.mrf.mxu1 }
 0x132   : > { %v6660_v62 = vpop.eup %4681  ;;  %v6662_v63 = vmul.f32 0.5, %v2410_v48  ;;  %790 = vadd.xlane.f32.xlu1 %v789_v43  ;;  %v2689_v51 = vmul.f32 %v4922_v17, %v1227_v41  ;;  %v2768_v8 = vmul.f32 %v4923_v18, %v2017_v44  ;;  %v2407_v47 = vsel %vm6648_vm10, %v6493_v56, %v2403_v25  ;;  %v6685_v14 = vpop.f32.mrf.mxu0 }
 0x133   : > { %v6669_v57 = vpop.eup %4683  ;;  %vm1615_vm12 = vweird.f32 %v6525_v7  ;;  %v2029_v36 = vmul.f32 %v6660_v62, %v6580_v11  ;;  %v2807_v45 = vmul.f32 %v4924_v28, %v2407_v47  ;;  %4685 = vrsqrt.f32 %v6622_v5 }
 0x134   : > { %v1612_v60 = vsub.f32 1.5, %v6638_v55  ;;  %v2022_v1 = vsub.f32 1.5, %v6641_v46  ;;  %v1230_v56 = vmul.f32 %v6608_v35, %v1229_v6  ;;  %v1619_v15 = vmul.f32 %v6669_v57, %v6589_v26  ;;  %4312 = vmatmul.msk.f32.gmra.mxu0 %vm479_vm0, %v2689_v51  ;;  %4391 = vmatmul.msk.f32.gmra.mxu2 %vm479_vm0, %v2768_v8  ;;  %vm6729_vm2 = vmor %vm1614_vm9, %vm1615_vm12  ;;  %v4925_v51 = vld [vmem:[%s5174_s23 + $0x190] sm:$0xff]  ;;  %v4926_v8 = vld [vmem:[%s5174_s23 + $0x2d8] sm:$0xff] }
 0x135   : > { %v2030_v50 = vmul.f32 %v6660_v62, %v2029_v36  ;;  %4430 = vmatmul.msk.f32.gmra.mxu3 %vm479_vm0, %v2807_v45  ;;  %v6690_v9 = vmax.f32 %v6436_v33, 1e-24  ;;  %v6693_v20 = vmax.f32 %v6443_v30, 1e-24  ;;  %vm3798_vm13 = vcmask 523264   ;;  %v4927_v36 = vld [vmem:[%s5174_s23 + $0x410] sm:$0xff] }
 0x136   : > { %v2412_v23 = vsub.f32 1.5, %v6662_v63  ;;  %v1620_v24 = vmul.f32 %v6669_v57, %v1619_v15  ;;  %3838 = vst.msk [vmem:[%s6698_s6 + $0x138] sm:$0xff] %vm3798_vm13, %v3444_v58  ;;  %v346_v10 = vmul.f32 %v189_v3, %v189_v3  ;;  %v426_v48 = vmul.f32 %v269_v54, %v269_v54  ;;  %v308_v58 = vld [vmem:[%s5174_s23 + $0x478] sm:$0xff] }
 0x137   : > { %vm2415_vm14 = vweird.f32 %v6568_v61  ;;  %vm2024_vm15 = vweird.f32 %v6510_v29  ;;  %vm2025_vm1 = vweird.f32 %v6574_v59  ;;  %4687 = vrsqrt.f32 %v6690_v9  ;;  %3877 = vst.msk [vmem:[%s6698_s6 + $0x270] sm:$0xff] %vm3798_vm13, %v6547_v40  ;;  %v6710_v33 = vpop.xlane.xlu0 %526  ;;  %v6719_v0 = vpop.xlane.xlu2 %766 }
 0x138   : > { %v6712_v30 = vmul.f32 0.5, %v1230_v56  ;;  %4689 = vrsqrt.f32 %v6693_v20  ;;  %v552_v27 = vsel %vm479_vm0, %v346_v10, 0.0  ;;  %v792_v49 = vsel %vm479_vm0, %v426_v48, 0.0  ;;  %3917 = vst.msk [vmem:[%s6698_s6 + $0x3b0] sm:$0xff] %vm3798_vm13, %v3681_v32  ;;  %v6721_v53 = vpop.xlane.xlu1 %643  ;;  %v3567_v21 = vpop.f32.mrf.mxu2  ;;  %vm6741_vm3 = vmor %vm2024_vm15, %vm2025_vm1 }
 0x139   : > { %v6723_v25 = vpop.eup %4685  ;;  %v6733_v16 = vmul.f32 0.5, %v2030_v50  ;;  %553 = vadd.xlane.f32.xlu0 %v552_v27  ;;  %793 = vadd.xlane.f32.xlu2 %v792_v49  ;;  %v385_v55 = vmul.f32 %v228_v12, %v228_v12  ;;  %v1613_v46 = vmul.f32 %v6525_v7, %v1612_v60  ;;  %v2023_v6 = vmul.f32 %v6574_v59, %v2022_v1  ;;  %v3684_v19 = vpop.f32.mrf.mxu3  ;;  %vm6756_vm5 = vmor %vm2414_vm11, %vm2415_vm14  ;;  %v229_v60 = vld [vmem:[%s5174_s23 + $0x200] sm:$0xff]  ;;  %v190_v1 = vld [vmem:[%s5174_s23 + $0xc8] sm:$0xff] }
 0x13a   : > { %vm1234_vm4 = vweird.f32 %v6558_v13  ;;  %v1621_v43 = vmul.f32 0.5, %v1620_v24  ;;  %v2419_v41 = vmul.f32 %v6723_v25, %v6622_v5  ;;  %v2413_v44 = vmul.f32 %v6568_v61, %v2412_v23  ;;  %3799 = vst.msk [vmem:[%s6698_s6] sm:$0xff] %vm3798_vm13, %v6582_v52 }
 0x13b   : > { %v669_v32 = vsel %vm479_vm0, %v385_v55, 0.0  ;;  %v1617_v63 = vsel %vm6729_vm2, %v6525_v7, %v1613_v46  ;;  %v2027_v17 = vsel %vm6741_vm3, %v6574_v59, %v2023_v6  ;;  %v6768_v52 = vmax.f32 %v6517_v42, 1e-24  ;;  %3878 = vst.msk [vmem:[%s6698_s6 + $0x278] sm:$0xff] %vm3798_vm13, %v6628_v38  ;;  %v3333_v56 = vpop.f32.mrf.mxu0 }
 0x13c   : > { %vm2034_vm6 = vweird.f32 %v6580_v11  ;;  %670 = vadd.xlane.f32.xlu1 %v669_v32  ;;  %v2728_v18 = vmul.f32 %v4925_v51, %v1617_v63  ;;  %v2769_v7 = vmul.f32 %v4926_v8, %v2027_v17  ;;  %v2417_v59 = vsel %vm6756_vm5, %v6568_v61, %v2413_v44  ;;  %3800 = vst.msk [vmem:[%s6698_s6 + $0x8] sm:$0xff] %vm3798_vm13, %v6685_v14  ;;  %v4928_v32 = vld [vmem:[%s5174_s23 + $0x60] sm:$0xff] }
 0x13d   : > { %v6779_v42 = vpop.eup %4687  ;;  %v1232_v47 = vsub.f32 1.5, %v6712_v30  ;;  %v2032_v38 = vsub.f32 1.5, %v6733_v16  ;;  %v2808_v28 = vmul.f32 %v4927_v36, %v2417_v59  ;;  %v6785_v45 = vmax.f32 %v6523_v2, 1e-24  ;;  %3839 = vst.msk [vmem:[%s6698_s6 + $0x140] sm:$0xff] %vm3798_vm13, %v3447_v22 }
 0x13e   : > { %v6791_v3 = vpop.eup %4689  ;;  %v1622_v61 = vsub.f32 1.5, %v1621_v43  ;;  %v1629_v54 = vmul.f32 %v6779_v42, %v6690_v9  ;;  %4351 = vmatmul.msk.f32.gmra.mxu1 %vm479_vm0, %v2728_v18  ;;  %4392 = vmatmul.msk.f32.gmra.mxu2 %vm479_vm0, %v2769_v7  ;;  %4691 = vrsqrt.f32 %v6768_v52  ;;  %v6799_v2 = vmax.f32 %v6536_v34, 1e-24  ;;  %3879 = vst.msk [vmem:[%s6698_s6 + $0x280] sm:$0xff] %vm3798_vm13, %v3567_v21  ;;  %v4929_v18 = vld [vmem:[%s5174_s23 + $0x198] sm:$0xff]  ;;  %v270_v7 = vld [vmem:[%s5174_s23 + $0x348] sm:$0xff] }
 0x13f   : > { %vm1235_vm7 = vweird.f32 %v6608_v35  ;;  %v2420_v15 = vmul.f32 %v6723_v25, %v2419_v41  ;;  %v1239_v14 = vmul.f32 %v6791_v3, %v6693_v20  ;;  %4431 = vmatmul.msk.f32.gmra.mxu3 %vm479_vm0, %v2808_v28  ;;  %4693 = vrsqrt.f32 %v6785_v45  ;;  %3918 = vst.msk [vmem:[%s6698_s6 + $0x3b8] sm:$0xff] %vm3798_vm13, %v3684_v19 }
 0x140   : > { %vm2035_vm8 = vweird.f32 %v6660_v62  ;;  %vm1625_vm9 = vweird.f32 %v6669_v57  ;;  %v1630_v34 = vmul.f32 %v6779_v42, %v1629_v54  ;;  %4695 = vrsqrt.f32 %v6799_v2  ;;  %3801 = vst.msk [vmem:[%s6698_s6 + $0x10] sm:$0xff] %vm3798_vm13, %v3333_v56  ;;  %vm6828_vm10 = vmor %vm1234_vm4, %vm1235_vm7  ;;  %v191_v56 = vld [vmem:[%s5174_s23 + $0xd0] sm:$0xff] }
 0x141   : > { %v1240_v50 = vmul.f32 %v6791_v3, %v1239_v14  ;;  %v465_v23 = vmul.f32 %v308_v58, %v308_v58  ;;  %v386_v24 = vmul.f32 %v229_v60, %v229_v60  ;;  %v347_v10 = vmul.f32 %v190_v1, %v190_v1  ;;  %v6822_v48 = vpop.xlane.xlu0 %883  ;;  %vm6844_vm12 = vmor %vm2034_vm6, %vm2035_vm8 }
 0x142   : > { %vm1624_vm11 = vweird.f32 %v6589_v26  ;;  %v1233_v30 = vmul.f32 %v6608_v35, %v1232_v47  ;;  %v1623_v27 = vmul.f32 %v6669_v57, %v1622_v61  ;;  %v2033_v49 = vmul.f32 %v6660_v62, %v2032_v38  ;;  %v6836_v40 = vpop.xlane.xlu2 %646  ;;  %v6838_v16 = vpop.xlane.xlu1 %529  ;;  %v4930_v47 = vld [vmem:[%s5174_s23 + $0x2e0] sm:$0xff] }
 0x143   : > { %v6848_v26 = vmul.f32 0.5, %v2420_v15  ;;  %v909_v55 = vsel %vm479_vm0, %v465_v23, 0.0  ;;  %v672_v46 = vsel %vm479_vm0, %v386_v24, 0.0  ;;  %v555_v6 = vsel %vm479_vm0, %v347_v10, 0.0  ;;  %v3570_v21 = vpop.f32.mrf.mxu2  ;;  %v3687_v19 = vpop.f32.mrf.mxu3  ;;  %vm6857_vm14 = vmor %vm1624_vm11, %vm1625_vm9  ;;  %v309_v15 = vld [vmem:[%s5174_s23 + $0x480] sm:$0xff] }
 0x144   : > { %v6853_v31 = vpop.eup %4691  ;;  %v1241_v43 = vmul.f32 0.5, %v1240_v50  ;;  %910 = vadd.xlane.f32.xlu0 %v909_v55  ;;  %673 = vadd.xlane.f32.xlu2 %v672_v46  ;;  %v1237_v41 = vsel %vm6828_vm10, %v6608_v35, %v1233_v30  ;;  %3880 = vst.msk [vmem:[%s6698_s6 + $0x288] sm:$0xff] %vm3798_vm13, %v3570_v21  ;;  %v1631_v29 = vmul.f32 0.5, %v1630_v34  ;;  %v1627_v17 = vsel %vm6857_vm14, %v6669_v57, %v1623_v27 }
 0x145   : > { %v6866_v44 = vpop.eup %4693  ;;  %556 = vadd.xlane.f32.xlu1 %v555_v6  ;;  %v2690_v63 = vmul.f32 %v4928_v32, %v1237_v41  ;;  %v2037_v22 = vsel %vm6844_vm12, %v6660_v62, %v2033_v49  ;;  %3919 = vst.msk [vmem:[%s6698_s6 + $0x3c0] sm:$0xff] %vm3798_vm13, %v3687_v19  ;;  %vm2424_vm15 = vweird.f32 %v6622_v5  ;;  %vm2425_vm1 = vweird.f32 %v6723_v25  ;;  %v4931_v19 = vld [vmem:[%s5174_s23 + $0x68] sm:$0xff] }
 0x146   : > { %v6877_v35 = vpop.eup %4695  ;;  %v1249_v51 = vmul.f32 %v6866_v44, %v6785_v45  ;;  %v2729_v8 = vmul.f32 %v4929_v18, %v1627_v17  ;;  %v3450_v57 = vpop.f32.mrf.mxu1  ;;  %v2422_v59 = vsub.f32 1.5, %v6848_v26  ;;  %v2039_v62 = vmul.f32 %v6853_v31, %v6768_v52  ;;  %vm6923_vm6 = vmor %vm2424_vm15, %vm2425_vm1  ;;  %v4932_v17 = vld [vmem:[%s5174_s23 + $0x1a0] sm:$0xff]  ;;  %v230_v18 = vld [vmem:[%s5174_s23 + $0x208] sm:$0xff] }
 0x147   : > { %4313 = vmatmul.msk.f32.gmra.mxu0 %vm479_vm0, %v2690_v63  ;;  %v2770_v38 = vmul.f32 %v4930_v47, %v2037_v22  ;;  %v6891_v36 = vmax.f32 %v6602_v4, 1e-24  ;;  %3840 = vst.msk [vmem:[%s6698_s6 + $0x148] sm:$0xff] %vm3798_vm13, %v3450_v57  ;;  %v1242_v28 = vsub.f32 1.5, %v1241_v43  ;;  %v6898_v61 = vmax.f32 %v6606_v39, 1e-24 }
 0x148   : > { %v1250_v58 = vmul.f32 %v6866_v44, %v1249_v51  ;;  %4352 = vmatmul.msk.f32.gmra.mxu1 %vm479_vm0, %v2729_v8  ;;  %v6901_v54 = vmax.f32 %v6626_v37, 1e-24  ;;  %v1632_v60 = vsub.f32 1.5, %v1631_v29  ;;  %v2429_v1 = vmul.f32 %v6877_v35, %v6799_v2  ;;  %v4933_v51 = vld [vmem:[%s5174_s23 + $0x418] sm:$0xff]  ;;  %v310_v8 = vld [vmem:[%s5174_s23 + $0x488] sm:$0xff]  ;;  %v271_v47 = vld [vmem:[%s5174_s23 + $0x350] sm:$0xff] }
 0x149   : > { %4393 = vmatmul.msk.f32.gmra.mxu2 %vm479_vm0, %v2770_v38  ;;  %4697 = vrsqrt.f32 %v6891_v36  ;;  %v427_v4 = vmul.f32 %v270_v7, %v270_v7  ;;  %vm1634_vm2 = vweird.f32 %v6690_v9  ;;  %vm1244_vm3 = vweird.f32 %v6693_v20 }
 0x14a   : > { %vm1245_vm4 = vweird.f32 %v6791_v3  ;;  %4699 = vrsqrt.f32 %v6898_v61  ;;  %vm1635_vm5 = vweird.f32 %v6779_v42  ;;  %v2040_v39 = vmul.f32 %v6853_v31, %v2039_v62  ;;  %v6917_v14 = vpop.xlane.xlu0 %769 }
 0x14b   : > { %4701 = vrsqrt.f32 %v6901_v54  ;;  %v795_v37 = vsel %vm479_vm0, %v427_v4, 0.0  ;;  %v1251_v50 = vmul.f32 0.5, %v1250_v58  ;;  %v348_v23 = vmul.f32 %v191_v56, %v191_v56  ;;  %v6928_v12 = vpop.xlane.xlu2 %532  ;;  %vm6936_vm7 = vmor %vm1244_vm3, %vm1245_vm4 }
 0x14c   : > { %796 = vadd.xlane.f32.xlu0 %v795_v37  ;;  %v466_v24 = vmul.f32 %v309_v15, %v309_v15  ;;  %v1243_v10 = vmul.f32 %v6791_v3, %v1242_v28  ;;  %v6930_v30 = vpop.xlane.xlu1 %886  ;;  %v2430_v27 = vmul.f32 %v6877_v35, %v2429_v1  ;;  %v1633_v49 = vmul.f32 %v6779_v42, %v1632_v60  ;;  %vm6950_vm8 = vmor %vm1634_vm2, %vm1635_vm5 }
 0x14d   : > { %v2423_v13 = vmul.f32 %v6723_v25, %v2422_v59  ;;  %v6944_v26 = vmax.f32 %v6710_v33, 1e-24  ;;  %v3573_v55 = vpop.f32.mrf.mxu2  ;;  %v558_v46 = vsel %vm479_vm0, %v348_v23, 0.0  ;;  %v6960_v33 = vmax.f32 %v6719_v0, 1e-24 }
 0x14e   : > { %v912_v6 = vsel %vm479_vm0, %v466_v24, 0.0  ;;  %v1247_v21 = vsel %vm6936_vm7, %v6791_v3, %v1243_v10  ;;  %3881 = vst.msk [vmem:[%s6698_s6 + $0x290] sm:$0xff] %vm3798_vm13, %v3573_v55  ;;  %559 = vadd.xlane.f32.xlu2 %v558_v46  ;;  %v1637_v3 = vsel %vm6950_vm8, %v6779_v42, %v1633_v49  ;;  %v1252_v32 = vsub.f32 1.5, %v1251_v50 }
 0x14f   : > { %v6964_v9 = vpop.eup %4697  ;;  %913 = vadd.xlane.f32.xlu1 %v912_v6  ;;  %v2691_v11 = vmul.f32 %v4931_v19, %v1247_v21  ;;  %v2427_v0 = vsel %vm6923_vm6, %v6723_v25, %v2423_v13  ;;  %4703 = vrsqrt.f32 %v6944_v26  ;;  %v3690_v43 = vpop.f32.mrf.mxu3  ;;  %v2730_v22 = vmul.f32 %v4932_v17, %v1637_v3 }
 0x150   : > { %v3336_v41 = vpop.f32.mrf.mxu0  ;;  %v6974_v29 = vpop.eup %4699  ;;  %v1639_v63 = vmul.f32 %v6964_v9, %v6891_v36  ;;  %v2809_v42 = vmul.f32 %v4933_v51, %v2427_v0  ;;  %3920 = vst.msk [vmem:[%s6698_s6 + $0x3c8] sm:$0xff] %vm3798_vm13, %v3690_v43  ;;  %v2041_v57 = vmul.f32 0.5, %v2040_v39  ;;  %v2431_v59 = vmul.f32 0.5, %v2430_v27 }
 0x151   : > { %v3453_v25 = vpop.f32.mrf.mxu1  ;;  %v6984_v7 = vpop.eup %4701  ;;  %v2439_v62 = vmul.f32 %v6974_v29, %v6898_v61  ;;  %4314 = vmatmul.msk.f32.gmra.mxu0 %vm479_vm0, %v2691_v11  ;;  %4705 = vrsqrt.f32 %v6960_v33  ;;  %3802 = vst.msk [vmem:[%s6698_s6 + $0x18] sm:$0xff] %vm3798_vm13, %v3336_v41  ;;  %vm1254_vm9 = vweird.f32 %v6785_v45  ;;  %vm1255_vm10 = vweird.f32 %v6866_v44  ;;  %4353 = vmatmul.msk.f32.gmra.mxu1 %vm479_vm0, %v2730_v22 }
 0x152   : > { %v2049_v38 = vmul.f32 %v6984_v7, %v6901_v54  ;;  %4432 = vmatmul.msk.f32.gmra.mxu3 %vm479_vm0, %v2809_v42  ;;  %3841 = vst.msk [vmem:[%s6698_s6 + $0x150] sm:$0xff] %vm3798_vm13, %v3453_v25  ;;  %v1640_v28 = vmul.f32 %v6964_v9, %v1639_v63  ;;  %v7003_v58 = vmax.f32 %v6721_v53, 1e-24  ;;  %v387_v60 = vmul.f32 %v230_v18, %v230_v18  ;;  %vm7020_vm14 = vmor %vm1254_vm9, %vm1255_vm10  ;;  %v192_v25 = vld [vmem:[%s5174_s23 + $0xd8] sm:$0xff] }
 0x153   : > { %v467_v1 = vmul.f32 %v310_v8, %v310_v8  ;;  %v2440_v4 = vmul.f32 %v6974_v29, %v2439_v62  ;;  %v428_v15 = vmul.f32 %v271_v47, %v271_v47  ;;  %v1253_v39 = vmul.f32 %v6866_v44, %v1252_v32  ;;  %v4936_v47 = vld [vmem:[%s5174_s23 + $0x420] sm:$0xff] }
 0x154   : > { %v2050_v56 = vmul.f32 %v6984_v7, %v2049_v38  ;;  %v2042_v34 = vsub.f32 1.5, %v2041_v57  ;;  %v2432_v50 = vsub.f32 1.5, %v2431_v59  ;;  %4707 = vrsqrt.f32 %v7003_v58  ;;  %v7012_v24 = vpop.xlane.xlu0 %649  ;;  %v272_v57 = vld [vmem:[%s5174_s23 + $0x358] sm:$0xff]  ;;  %v231_v59 = vld [vmem:[%s5174_s23 + $0x210] sm:$0xff] }
 0x155   : > { %v7008_v37 = vpop.eup %4703  ;;  %v675_v23 = vsel %vm479_vm0, %v387_v60, 0.0  ;;  %vm2044_vm11 = vweird.f32 %v6768_v52  ;;  %vm2045_vm12 = vweird.f32 %v6853_v31  ;;  %vm2434_vm15 = vweird.f32 %v6799_v2  ;;  %v7026_v10 = vpop.xlane.xlu2 %889  ;;  %v311_v52 = vld [vmem:[%s5174_s23 + $0x490] sm:$0xff] }
 0x156   : > { %vm2435_vm1 = vweird.f32 %v6877_v35  ;;  %676 = vadd.xlane.f32.xlu0 %v675_v23  ;;  %v7028_v5 = vpop.xlane.xlu1 %772  ;;  %v1641_v49 = vmul.f32 0.5, %v1640_v28  ;;  %vm1644_vm2 = vweird.f32 %v6891_v36  ;;  %v915_v45 = vsel %vm479_vm0, %v467_v1, 0.0  ;;  %vm7047_vm4 = vmor %vm2044_vm11, %vm2045_vm12 }
 0x157   : > { %v7030_v27 = vpop.eup %4705  ;;  %v798_v13 = vsel %vm479_vm0, %v428_v15, 0.0  ;;  %v1257_v55 = vsel %vm7020_vm14, %v6866_v44, %v1253_v39  ;;  %v3576_v20 = vpop.f32.mrf.mxu2  ;;  %v2441_v46 = vmul.f32 0.5, %v2440_v4  ;;  %vm2444_vm3 = vweird.f32 %v6898_v61  ;;  %916 = vadd.xlane.f32.xlu2 %v915_v45  ;;  %v4934_v44 = vld [vmem:[%s5174_s23 + $0x70] sm:$0xff]  ;;  %vm7061_vm5 = vmor %vm2434_vm15, %vm2435_vm1 }
 0x158   : > { %v2051_v6 = vmul.f32 0.5, %v2050_v56  ;;  %v1259_v21 = vmul.f32 %v7008_v37, %v6944_v26  ;;  %799 = vadd.xlane.f32.xlu1 %v798_v13  ;;  %3882 = vst.msk [vmem:[%s6698_s6 + $0x298] sm:$0xff] %vm3798_vm13, %v3576_v20  ;;  %v2692_v11 = vmul.f32 %v4934_v44, %v1257_v55  ;;  %v2043_v3 = vmul.f32 %v6853_v31, %v2042_v34 }
 0x159   : > { %v2433_v0 = vmul.f32 %v6877_v35, %v2432_v50  ;;  %v7055_v43 = vmax.f32 %v6822_v48, 1e-24  ;;  %v3339_v41 = vpop.f32.mrf.mxu0  ;;  %vm2054_vm6 = vweird.f32 %v6901_v54  ;;  %v2059_v32 = vmul.f32 %v7030_v27, %v6960_v33 }
 0x15a   : > { %v7069_v63 = vmax.f32 %v6836_v40, 1e-24  ;;  %v7072_v48 = vmax.f32 %v6838_v16, 1e-24  ;;  %3803 = vst.msk [vmem:[%s6698_s6 + $0x20] sm:$0xff] %vm3798_vm13, %v3339_v41  ;;  %v3456_v2 = vpop.f32.mrf.mxu1  ;;  %v7076_v17 = vpop.eup %4707  ;;  %v1642_v22 = vsub.f32 1.5, %v1641_v49  ;;  %4315 = vmatmul.msk.f32.gmra.mxu0 %vm479_vm0, %v2692_v11  ;;  %v2047_v40 = vsel %vm7047_vm4, %v6853_v31, %v2043_v3 }
 0x15b   : > { %v2437_v16 = vsel %vm7061_vm5, %v6877_v35, %v2433_v0  ;;  %4709 = vrsqrt.f32 %v7055_v43  ;;  %3842 = vst.msk [vmem:[%s6698_s6 + $0x158] sm:$0xff] %vm3798_vm13, %v3456_v2  ;;  %v2442_v51 = vsub.f32 1.5, %v2441_v46  ;;  %v2052_v42 = vsub.f32 1.5, %v2051_v6  ;;  %v4935_v31 = vld [vmem:[%s5174_s23 + $0x2e8] sm:$0xff] }
 0x15c   : > { %v1260_v18 = vmul.f32 %v7008_v37, %v1259_v21  ;;  %v1649_v8 = vmul.f32 %v7076_v17, %v7003_v58  ;;  %vm1645_vm7 = vweird.f32 %v6964_v9  ;;  %v2771_v62 = vmul.f32 %v4935_v31, %v2047_v40  ;;  %v4937_v3 = vld [vmem:[%s5174_s23 + $0x1a8] sm:$0xff] }
 0x15d   : > { %v2810_v35 = vmul.f32 %v4936_v47, %v2437_v16  ;;  %4711 = vrsqrt.f32 %v7069_v63  ;;  %vm2445_vm8 = vweird.f32 %v6974_v29  ;;  %v2060_v38 = vmul.f32 %v7030_v27, %v2059_v32  ;;  %vm7113_vm10 = vmor %vm1644_vm2, %vm1645_vm7  ;;  %v4938_v16 = vld [vmem:[%s5174_s23 + $0x2f0] sm:$0xff] }
 0x15e   : > { %v1650_v28 = vmul.f32 %v7076_v17, %v1649_v8  ;;  %4713 = vrsqrt.f32 %v7072_v48  ;;  %vm2055_vm9 = vweird.f32 %v6984_v7  ;;  %4394 = vmatmul.msk.f32.gmra.mxu2 %vm479_vm0, %v2771_v62  ;;  %v349_v60 = vmul.f32 %v192_v25, %v192_v25  ;;  %vm7130_vm11 = vmor %vm2444_vm3, %vm2445_vm8 }
 0x15f   : > { %4433 = vmatmul.msk.f32.gmra.mxu3 %vm479_vm0, %v2810_v35  ;;  %v429_v1 = vmul.f32 %v272_v57, %v272_v57  ;;  %v388_v4 = vmul.f32 %v231_v59, %v231_v59  ;;  %v7105_v56 = vpop.xlane.xlu0 %535  ;;  %v7107_v15 = vpop.xlane.xlu2 %775  ;;  %v7117_v34 = vmul.f32 0.5, %v1260_v18  ;;  %v1643_v50 = vmul.f32 %v6964_v9, %v1642_v22  ;;  %vm7145_vm14 = vmor %vm2054_vm6, %vm2055_vm9 }
 0x160   : > { %v2053_v23 = vmul.f32 %v6984_v7, %v2052_v42  ;;  %v2443_v53 = vmul.f32 %v6974_v29, %v2442_v51  ;;  %v7122_v49 = vpop.xlane.xlu1 %652  ;;  %vm1264_vm12 = vweird.f32 %v6944_v26  ;;  %v561_v13 = vsel %vm479_vm0, %v349_v60, 0.0  ;;  %v232_v42 = vld [vmem:[%s5174_s23 + $0x218] sm:$0xff] }
 0x161   : > { %v7124_v45 = vpop.eup %4709  ;;  %v801_v55 = vsel %vm479_vm0, %v429_v1, 0.0  ;;  %v678_v20 = vsel %vm479_vm0, %v388_v4, 0.0  ;;  %v7139_v46 = vmax.f32 %v6917_v14, 1e-24  ;;  %v3693_v6 = vpop.f32.mrf.mxu3  ;;  %vm1265_vm15 = vweird.f32 %v7008_v37  ;;  %562 = vadd.xlane.f32.xlu0 %v561_v13 }
 0x162   : > { %v7150_v21 = vmul.f32 0.5, %v2060_v38  ;;  %v2449_v19 = vmul.f32 %v7124_v45, %v7055_v43  ;;  %802 = vadd.xlane.f32.xlu2 %v801_v55  ;;  %v1647_v14 = vsel %vm7113_vm10, %v6964_v9, %v1643_v50  ;;  %3921 = vst.msk [vmem:[%s6698_s6 + $0x3d0] sm:$0xff] %vm3798_vm13, %v3693_v6  ;;  %v3342_v54 = vpop.f32.mrf.mxu0  ;;  %v1651_v11 = vmul.f32 0.5, %v1650_v28  ;;  %679 = vadd.xlane.f32.xlu1 %v678_v20  ;;  %vm7215_vm7 = vmor %vm1264_vm12, %vm1265_vm15 }
 0x163   : > { %v7159_v44 = vpop.eup %4711  ;;  %v2731_v0 = vmul.f32 %v4937_v3, %v1647_v14  ;;  %v2057_v41 = vsel %vm7145_vm14, %v6984_v7, %v2053_v23  ;;  %v2447_v9 = vsel %vm7130_vm11, %v6974_v29, %v2443_v53  ;;  %3804 = vst.msk [vmem:[%s6698_s6 + $0x28] sm:$0xff] %vm3798_vm13, %v3342_v54  ;;  %v1262_v2 = vsub.f32 1.5, %v7117_v34  ;;  %v4939_v29 = vld [vmem:[%s5174_s23 + $0x428] sm:$0xff] }
 0x164   : > { %v7171_v32 = vpop.eup %4713  ;;  %v2450_v22 = vmul.f32 %v7124_v45, %v2449_v19  ;;  %v1659_v40 = vmul.f32 %v7159_v44, %v7069_v63  ;;  %v2772_v51 = vmul.f32 %v4938_v16, %v2057_v41  ;;  %v2811_v18 = vmul.f32 %v4939_v29, %v2447_v9 }
 0x165   : > { %v1269_v7 = vmul.f32 %v7171_v32, %v7072_v48  ;;  %4354 = vmatmul.msk.f32.gmra.mxu1 %vm479_vm0, %v2731_v0  ;;  %4715 = vrsqrt.f32 %v7139_v46  ;;  %v7185_v8 = vmax.f32 %v6928_v12, 1e-24  ;;  %v2062_v25 = vsub.f32 1.5, %v7150_v21  ;;  %v193_v12 = vld [vmem:[%s5174_s23 + $0xe0] sm:$0xff] }
 0x166   : > { %v1660_v57 = vmul.f32 %v7159_v44, %v1659_v40  ;;  %v7190_v59 = vmax.f32 %v6930_v30, 1e-24  ;;  %v468_v31 = vmul.f32 %v311_v52, %v311_v52  ;;  %v1652_v62 = vsub.f32 1.5, %v1651_v11  ;;  %4395 = vmatmul.msk.f32.gmra.mxu2 %vm479_vm0, %v2772_v51  ;;  %v273_v52 = vld [vmem:[%s5174_s23 + $0x360] sm:$0xff]  ;;  %v4942_v40 = vld [vmem:[%s5174_s23 + $0x2f8] sm:$0xff]  ;;  %v194_v51 = vld [vmem:[%s5174_s23 + $0xe8] sm:$0xff] }
 0x167   : > { %v1270_v47 = vmul.f32 %v7171_v32, %v1269_v7  ;;  %4434 = vmatmul.msk.f32.gmra.mxu3 %vm479_vm0, %v2811_v18  ;;  %4717 = vrsqrt.f32 %v7185_v8  ;;  %v389_v35 = vmul.f32 %v232_v42, %v232_v42  ;;  %vm2064_vm1 = vweird.f32 %v6960_v33  ;;  %v312_v42 = vld [vmem:[%s5174_s23 + $0x498] sm:$0xff] }
 0x168   : > { %vm2065_vm2 = vweird.f32 %v7030_v27  ;;  %vm1654_vm3 = vweird.f32 %v7003_v58  ;;  %v7200_v30 = vmul.f32 0.5, %v2450_v22  ;;  %v7202_v38 = vpop.xlane.xlu0 %892  ;;  %vm1655_vm4 = vweird.f32 %v7076_v17 }
 0x169   : > { %vm2454_vm5 = vweird.f32 %v7055_v43  ;;  %vm1664_vm6 = vweird.f32 %v7069_v63  ;;  %4719 = vrsqrt.f32 %v7190_v59  ;;  %v918_v28 = vsel %vm479_vm0, %v468_v31, 0.0  ;;  %v7209_v60 = vpop.xlane.xlu2 %655  ;;  %v7223_v50 = vpop.xlane.xlu1 %538  ;;  %vm7231_vm9 = vmor %vm2064_vm1, %vm2065_vm2 }
 0x16a   : > { %vm2455_vm8 = vweird.f32 %v7124_v45  ;;  %v7220_v4 = vmul.f32 0.5, %v1660_v57  ;;  %919 = vadd.xlane.f32.xlu0 %v918_v28  ;;  %v681_v39 = vsel %vm479_vm0, %v389_v35, 0.0  ;;  %v350_v34 = vmul.f32 %v193_v12, %v193_v12  ;;  %v3579_v23 = vpop.f32.mrf.mxu2  ;;  %vm7244_vm10 = vmor %vm1654_vm3, %vm1655_vm4 }
 0x16b   : > { %v7225_v53 = vpop.eup %4715  ;;  %v1271_v36 = vmul.f32 0.5, %v1270_v47  ;;  %682 = vadd.xlane.f32.xlu2 %v681_v39  ;;  %v1263_v13 = vmul.f32 %v7008_v37, %v1262_v2  ;;  %v1653_v55 = vmul.f32 %v7076_v17, %v1652_v62  ;;  %v2063_v20 = vmul.f32 %v7030_v27, %v2062_v25  ;;  %3883 = vst.msk [vmem:[%s6698_s6 + $0x2a0] sm:$0xff] %vm3798_vm13, %v3579_v23  ;;  %v4941_v2 = vld [vmem:[%s5174_s23 + $0x1b0] sm:$0xff]  ;;  %vm7305_vm15 = vmor %vm2454_vm5, %vm2455_vm8 }
 0x16c   : > { %v2452_v6 = vsub.f32 1.5, %v7200_v30  ;;  %v564_v61 = vsel %vm479_vm0, %v350_v34, 0.0  ;;  %v7251_v21 = vmax.f32 %v7012_v24, 1e-24  ;;  %v7254_v19 = vmax.f32 %v7026_v10, 1e-24  ;;  %v3696_v14 = vpop.f32.mrf.mxu3  ;;  %v3459_v54 = vpop.f32.mrf.mxu1 }
 0x16d   : > { %v7256_v58 = vpop.eup %4717  ;;  %565 = vadd.xlane.f32.xlu1 %v564_v61  ;;  %v1267_v11 = vsel %vm7215_vm7, %v7008_v37, %v1263_v13  ;;  %v1657_v24 = vsel %vm7244_vm10, %v7076_v17, %v1653_v55  ;;  %v2067_v10 = vsel %vm7231_vm9, %v7030_v27, %v2063_v20  ;;  %v7268_v3 = vmax.f32 %v7028_v5, 1e-24  ;;  %3922 = vst.msk [vmem:[%s6698_s6 + $0x3d8] sm:$0xff] %vm3798_vm13, %v3696_v14  ;;  %v4940_v17 = vld [vmem:[%s5174_s23 + $0x78] sm:$0xff] }
 0x16e   : > { %v1662_v0 = vsub.f32 1.5, %v7220_v4  ;;  %v2069_v37 = vmul.f32 %v7225_v53, %v7139_v46  ;;  %v1279_v41 = vmul.f32 %v7256_v58, %v7185_v8  ;;  %v2693_v9 = vmul.f32 %v4940_v17, %v1267_v11  ;;  %3843 = vst.msk [vmem:[%s6698_s6 + $0x160] sm:$0xff] %vm3798_vm13, %v3459_v54  ;;  %v4943_v11 = vld [vmem:[%s5174_s23 + $0x80] sm:$0xff] }
 0x16f   : > { %v7281_v27 = vpop.eup %4719  ;;  %v1272_v5 = vsub.f32 1.5, %v1271_v36  ;;  %v2732_v22 = vmul.f32 %v4941_v2, %v1657_v24  ;;  %v2773_v16 = vmul.f32 %v4942_v40, %v2067_v10  ;;  %4721 = vrsqrt.f32 %v7251_v21  ;;  %v233_v17 = vld [vmem:[%s5174_s23 + $0x220] sm:$0xff] }
 0x170   : > { %vm1665_vm11 = vweird.f32 %v7159_v44  ;;  %v1280_v7 = vmul.f32 %v7256_v58, %v1279_v41  ;;  %v2459_v29 = vmul.f32 %v7281_v27, %v7190_v59  ;;  %4316 = vmatmul.msk.f32.gmra.mxu0 %vm479_vm0, %v2693_v9  ;;  %4723 = vrsqrt.f32 %v7254_v19  ;;  %v313_v9 = vld [vmem:[%s5174_s23 + $0x4a0] sm:$0xff] }
 0x171   : > { %vm1274_vm12 = vweird.f32 %v7072_v48  ;;  %vm1275_vm14 = vweird.f32 %v7171_v32  ;;  %4355 = vmatmul.msk.f32.gmra.mxu1 %vm479_vm0, %v2732_v22  ;;  %4396 = vmatmul.msk.f32.gmra.mxu2 %vm479_vm0, %v2773_v16  ;;  %4725 = vrsqrt.f32 %v7268_v3  ;;  %v430_v18 = vmul.f32 %v273_v52, %v273_v52  ;;  %v7299_v25 = vpop.xlane.xlu0 %778  ;;  %v7311_v12 = vpop.xlane.xlu2 %541  ;;  %vm7317_vm1 = vmor %vm1664_vm6, %vm1665_vm11 }
 0x172   : > { %v2070_v31 = vmul.f32 %v7225_v53, %v2069_v37  ;;  %v2460_v62 = vmul.f32 %v7281_v27, %v2459_v29  ;;  %v351_v47 = vmul.f32 %v194_v51, %v194_v51  ;;  %v469_v35 = vmul.f32 %v312_v42, %v312_v42  ;;  %v3582_v30 = vpop.f32.mrf.mxu2  ;;  %vm7331_vm2 = vmor %vm1274_vm12, %vm1275_vm14  ;;  %v4945_v37 = vld [vmem:[%s5174_s23 + $0x430] sm:$0xff] }
 0x173   : > { %v804_v43 = vsel %vm479_vm0, %v430_v18, 0.0  ;;  %v1273_v1 = vmul.f32 %v7171_v32, %v1272_v5  ;;  %v1663_v4 = vmul.f32 %v7159_v44, %v1662_v0  ;;  %v2453_v39 = vmul.f32 %v7124_v45, %v2452_v6  ;;  %3884 = vst.msk [vmem:[%s6698_s6 + $0x2a8] sm:$0xff] %vm3798_vm13, %v3582_v30  ;;  %v274_v18 = vld [vmem:[%s5174_s23 + $0x368] sm:$0xff] }
 0x174   : > { %v7335_v34 = vmul.f32 0.5, %v1280_v7  ;;  %805 = vadd.xlane.f32.xlu0 %v804_v43  ;;  %v567_v23 = vsel %vm479_vm0, %v351_v47, 0.0  ;;  %v921_v26 = vsel %vm479_vm0, %v469_v35, 0.0  ;;  %v7339_v36 = vpop.xlane.xlu1 %895  ;;  %v3699_v13 = vpop.f32.mrf.mxu3  ;;  %v7353_v6 = vmax.f32 %v7105_v56, 1e-24  ;;  %v4944_v56 = vld [vmem:[%s5174_s23 + $0x1b8] sm:$0xff] }
 0x175   : > { %v7341_v55 = vpop.eup %4721  ;;  %568 = vadd.xlane.f32.xlu2 %v567_v23  ;;  %922 = vadd.xlane.f32.xlu1 %v921_v26  ;;  %v1277_v48 = vsel %vm7331_vm2, %v7171_v32, %v1273_v1  ;;  %v1667_v20 = vsel %vm7317_vm1, %v7159_v44, %v1663_v4  ;;  %v2457_v33 = vsel %vm7305_vm15, %v7124_v45, %v2453_v39  ;;  %v2071_v14 = vmul.f32 0.5, %v2070_v31 }
 0x176   : > { %v7355_v61 = vpop.eup %4723  ;;  %v2461_v54 = vmul.f32 0.5, %v2460_v62  ;;  %v1669_v32 = vmul.f32 %v7341_v55, %v7251_v21  ;;  %v2694_v44 = vmul.f32 %v4943_v11, %v1277_v48  ;;  %3923 = vst.msk [vmem:[%s6698_s6 + $0x3e0] sm:$0xff] %vm3798_vm13, %v3699_v13  ;;  %v3345_v24 = vpop.f32.mrf.mxu0  ;;  %vm2074_vm3 = vweird.f32 %v7139_v46 }
 0x177   : > { %v3462_v45 = vpop.f32.mrf.mxu1  ;;  %v7362_v10 = vpop.eup %4725  ;;  %vm1284_vm4 = vweird.f32 %v7185_v8  ;;  %v2733_v0 = vmul.f32 %v4944_v56, %v1667_v20  ;;  %v2812_v41 = vmul.f32 %v4945_v37, %v2457_v33  ;;  %3805 = vst.msk [vmem:[%s6698_s6 + $0x30] sm:$0xff] %vm3798_vm13, %v3345_v24  ;;  %vm2075_vm5 = vweird.f32 %v7225_v53  ;;  %v4947_v24 = vld [vmem:[%s5174_s23 + $0x300] sm:$0xff]  ;;  %v4948_v56 = vld [vmem:[%s5174_s23 + $0x438] sm:$0xff] }
 0x178   : > { %v2469_v52 = vmul.f32 %v7355_v61, %v7254_v19  ;;  %v2079_v5 = vmul.f32 %v7362_v10, %v7268_v3  ;;  %4317 = vmatmul.msk.f32.gmra.mxu0 %vm479_vm0, %v2694_v44  ;;  %4727 = vrsqrt.f32 %v7353_v6  ;;  %3844 = vst.msk [vmem:[%s6698_s6 + $0x168] sm:$0xff] %vm3798_vm13, %v3462_v45  ;;  %v1282_v2 = vsub.f32 1.5, %v7335_v34  ;;  %vm7408_vm9 = vmor %vm2074_vm3, %vm2075_vm5 }
 0x179   : > { %v1670_v22 = vmul.f32 %v7341_v55, %v1669_v32  ;;  %4356 = vmatmul.msk.f32.gmra.mxu1 %vm479_vm0, %v2733_v0  ;;  %4435 = vmatmul.msk.f32.gmra.mxu3 %vm479_vm0, %v2812_v41  ;;  %v7386_v40 = vmax.f32 %v7107_v15, 1e-24  ;;  %v7389_v16 = vmax.f32 %v7122_v49, 1e-24  ;;  %v2072_v51 = vsub.f32 1.5, %v2071_v14 }
 0x17a   : > { %v2462_v42 = vsub.f32 1.5, %v2461_v54  ;;  %v390_v7 = vmul.f32 %v233_v17, %v233_v17  ;;  %v470_v29 = vmul.f32 %v313_v9, %v313_v9  ;;  %vm1285_vm6 = vweird.f32 %v7256_v58  ;;  %v195_v54 = vld [vmem:[%s5174_s23 + $0xf0] sm:$0xff] }
 0x17b   : > { %vm2464_vm7 = vweird.f32 %v7190_v59  ;;  %v2080_v57 = vmul.f32 %v7362_v10, %v2079_v5  ;;  %4729 = vrsqrt.f32 %v7386_v40  ;;  %v7396_v31 = vpop.xlane.xlu0 %658  ;;  %vm2465_vm8 = vweird.f32 %v7281_v27  ;;  %vm7424_vm10 = vmor %vm1284_vm4, %vm1285_vm6  ;;  %v4946_v59 = vld [vmem:[%s5174_s23 + $0x88] sm:$0xff] }
 0x17c   : > { %v2470_v15 = vmul.f32 %v7355_v61, %v2469_v52  ;;  %4731 = vrsqrt.f32 %v7389_v16  ;;  %v684_v49 = vsel %vm479_vm0, %v390_v7, 0.0  ;;  %v7402_v62 = vpop.xlane.xlu2 %898  ;;  %v7412_v35 = vmul.f32 0.5, %v1670_v22  ;;  %v7416_v1 = vpop.xlane.xlu1 %781  ;;  %vm7438_vm12 = vmor %vm2464_vm7, %vm2465_vm8  ;;  %v275_v22 = vld [vmem:[%s5174_s23 + $0x370] sm:$0xff] }
 0x17d   : > { %685 = vadd.xlane.f32.xlu0 %v684_v49  ;;  %v924_v30 = vsel %vm479_vm0, %v470_v29, 0.0  ;;  %v431_v28 = vmul.f32 %v274_v18, %v274_v18  ;;  %v1283_v43 = vmul.f32 %v7256_v58, %v1282_v2  ;;  %vm1674_vm11 = vweird.f32 %v7251_v21 }
 0x17e   : > { %v7418_v4 = vpop.eup %4727  ;;  %925 = vadd.xlane.f32.xlu2 %v924_v30  ;;  %v2073_v39 = vmul.f32 %v7225_v53, %v2072_v51  ;;  %v2463_v63 = vmul.f32 %v7281_v27, %v2462_v42  ;;  %v7432_v34 = vmax.f32 %v7202_v38, 1e-24  ;;  %v3585_v23 = vpop.f32.mrf.mxu2  ;;  %v2081_v26 = vmul.f32 0.5, %v2080_v57  ;;  %v234_v51 = vld [vmem:[%s5174_s23 + $0x228] sm:$0xff] }
 0x17f   : > { %v1289_v13 = vmul.f32 %v7418_v4, %v7353_v6  ;;  %v807_v48 = vsel %vm479_vm0, %v431_v28, 0.0  ;;  %v1287_v38 = vsel %vm7424_vm10, %v7256_v58, %v1283_v43  ;;  %3885 = vst.msk [vmem:[%s6698_s6 + $0x2b0] sm:$0xff] %vm3798_vm13, %v3585_v23  ;;  %vm2474_vm14 = vweird.f32 %v7254_v19 }
 0x180   : > { %808 = vadd.xlane.f32.xlu1 %v807_v48  ;;  %v2695_v20 = vmul.f32 %v4946_v59, %v1287_v38  ;;  %v2077_v33 = vsel %vm7408_vm9, %v7225_v53, %v2073_v39  ;;  %v2467_v14 = vsel %vm7438_vm12, %v7281_v27, %v2463_v63  ;;  %v3348_v32 = vpop.f32.mrf.mxu0  ;;  %v1672_v11 = vsub.f32 1.5, %v7412_v35 }
 0x181   : > { %v7459_v58 = vpop.eup %4729  ;;  %v2471_v44 = vmul.f32 0.5, %v2470_v15  ;;  %v2774_v45 = vmul.f32 %v4947_v24, %v2077_v33  ;;  %v2813_v0 = vmul.f32 %v4948_v56, %v2467_v14  ;;  %3806 = vst.msk [vmem:[%s6698_s6 + $0x38] sm:$0xff] %vm3798_vm13, %v3348_v32  ;;  %v3465_v53 = vpop.f32.mrf.mxu1  ;;  %4733 = vrsqrt.f32 %v7432_v34  ;;  %v314_v56 = vld [vmem:[%s5174_s23 + $0x4a8] sm:$0xff] }
 0x182   : > { %v7466_v37 = vpop.eup %4731  ;;  %v2089_v27 = vmul.f32 %v7459_v58, %v7386_v40  ;;  %4318 = vmatmul.msk.f32.gmra.mxu0 %vm479_vm0, %v2695_v20  ;;  %v7473_v41 = vmax.f32 %v7209_v60, 1e-24  ;;  %v7476_v17 = vmax.f32 %v7223_v50, 1e-24  ;;  %3845 = vst.msk [vmem:[%s6698_s6 + $0x170] sm:$0xff] %vm3798_vm13, %v3465_v53  ;;  %v2082_v9 = vsub.f32 1.5, %v2081_v26 }
 0x183   : > { %v1290_v52 = vmul.f32 %v7418_v4, %v1289_v13  ;;  %v1679_v5 = vmul.f32 %v7466_v37, %v7389_v16  ;;  %4397 = vmatmul.msk.f32.gmra.mxu2 %vm479_vm0, %v2774_v45  ;;  %4436 = vmatmul.msk.f32.gmra.mxu3 %vm479_vm0, %v2813_v0  ;;  %v352_v2 = vmul.f32 %v195_v54, %v195_v54  ;;  %vm1675_vm15 = vweird.f32 %v7341_v55  ;;  %v4950_v20 = vld [vmem:[%s5174_s23 + $0x308] sm:$0xff]  ;;  %v235_v0 = vld [vmem:[%s5174_s23 + $0x230] sm:$0xff] }
 0x184   : > { %vm2084_vm1 = vweird.f32 %v7268_v3  ;;  %vm2085_vm2 = vweird.f32 %v7362_v10  ;;  %4735 = vrsqrt.f32 %v7473_v41  ;;  %v2090_v60 = vmul.f32 %v7459_v58, %v2089_v27  ;;  %vm7504_vm3 = vmor %vm1674_vm11, %vm1675_vm15  ;;  %v4949_v3 = vld [vmem:[%s5174_s23 + $0x1c0] sm:$0xff] }
 0x185   : > { %v1680_v50 = vmul.f32 %v7466_v37, %v1679_v5  ;;  %4737 = vrsqrt.f32 %v7476_v17  ;;  %v570_v42 = vsel %vm479_vm0, %v352_v2, 0.0  ;;  %v7495_v7 = vpop.xlane.xlu0 %544  ;;  %v2472_v29 = vsub.f32 1.5, %v2471_v44  ;;  %vm7519_vm6 = vmor %vm2084_vm1, %vm2085_vm2  ;;  %v4951_v27 = vld [vmem:[%s5174_s23 + $0x440] sm:$0xff] }
 0x186   : > { %571 = vadd.xlane.f32.xlu0 %v570_v42  ;;  %v432_v18 = vmul.f32 %v275_v22, %v275_v22  ;;  %v391_v57 = vmul.f32 %v234_v51, %v234_v51  ;;  %v1673_v15 = vmul.f32 %v7341_v55, %v1672_v11  ;;  %v7498_v49 = vpop.xlane.xlu2 %784  ;;  %vm2475_vm4 = vweird.f32 %v7355_v61  ;;  %v7511_v28 = vpop.xlane.xlu1 %661 }
 0x187   : > { %v1291_v35 = vmul.f32 0.5, %v1290_v52  ;;  %vm1294_vm5 = vweird.f32 %v7353_v6  ;;  %v2083_v30 = vmul.f32 %v7362_v10, %v2082_v9  ;;  %v7513_v43 = vpop.eup %4733  ;;  %v1681_v46 = vmul.f32 0.5, %v1680_v50  ;;  %vm7551_vm8 = vmor %vm2474_vm14, %vm2475_vm4  ;;  %v196_v52 = vld [vmem:[%s5174_s23 + $0xf8] sm:$0xff] }
 0x188   : > { %v810_v39 = vsel %vm479_vm0, %v432_v18, 0.0  ;;  %v687_v63 = vsel %vm479_vm0, %v391_v57, 0.0  ;;  %v1677_v23 = vsel %vm7504_vm3, %v7341_v55, %v1673_v15  ;;  %v3702_v8 = vpop.f32.mrf.mxu3  ;;  %v3351_v26 = vpop.f32.mrf.mxu0  ;;  %v2091_v13 = vmul.f32 0.5, %v2090_v60 }
 0x189   : > { %vm2094_vm7 = vweird.f32 %v7386_v40  ;;  %811 = vadd.xlane.f32.xlu2 %v810_v39  ;;  %688 = vadd.xlane.f32.xlu1 %v687_v63  ;;  %v2734_v48 = vmul.f32 %v4949_v3, %v1677_v23  ;;  %v2087_v38 = vsel %vm7519_vm6, %v7362_v10, %v2083_v30  ;;  %v2473_v55 = vmul.f32 %v7355_v61, %v2472_v29  ;;  %v4952_v3 = vld [vmem:[%s5174_s23 + $0x90] sm:$0xff] }
 0x18a   : > { %v7533_v59 = vpop.eup %4735  ;;  %v2775_v33 = vmul.f32 %v4950_v20, %v2087_v38  ;;  %v7538_v14 = vmax.f32 %v7299_v25, 1e-24  ;;  %v7541_v54 = vmax.f32 %v7311_v12, 1e-24  ;;  %3924 = vst.msk [vmem:[%s6698_s6 + $0x3e8] sm:$0xff] %vm3798_vm13, %v3702_v8  ;;  %v1292_v11 = vsub.f32 1.5, %v1291_v35 }
 0x18b   : > { %v7545_v32 = vpop.eup %4737  ;;  %v2479_v25 = vmul.f32 %v7513_v43, %v7432_v34  ;;  %v1689_v12 = vmul.f32 %v7533_v59, %v7473_v41  ;;  %4357 = vmatmul.msk.f32.gmra.mxu1 %vm479_vm0, %v2734_v48  ;;  %v7561_v44 = vmax.f32 %v7339_v36, 1e-24  ;;  %3807 = vst.msk [vmem:[%s6698_s6 + $0x40] sm:$0xff] %vm3798_vm13, %v3351_v26  ;;  %v1682_v19 = vsub.f32 1.5, %v1681_v46 }
 0x18c   : > { %v1299_v24 = vmul.f32 %v7545_v32, %v7476_v17  ;;  %4398 = vmatmul.msk.f32.gmra.mxu2 %vm479_vm0, %v2775_v33  ;;  %v2477_v45 = vsel %vm7551_vm8, %v7355_v61, %v2473_v55  ;;  %4739 = vrsqrt.f32 %v7538_v14  ;;  %vm1295_vm9 = vweird.f32 %v7418_v4 }
 0x18d   : > { %v2092_v36 = vsub.f32 1.5, %v2091_v13  ;;  %v1690_v53 = vmul.f32 %v7533_v59, %v1689_v12  ;;  %v2814_v9 = vmul.f32 %v4951_v27, %v2477_v45  ;;  %vm1684_vm10 = vweird.f32 %v7389_v16  ;;  %vm7591_vm12 = vmor %vm1294_vm5, %vm1295_vm9  ;;  %v197_v45 = vld [vmem:[%s5174_s23 + $0x100] sm:$0xff] }
 0x18e   : > { %vm1685_vm11 = vweird.f32 %v7466_v37  ;;  %v1300_v5 = vmul.f32 %v7545_v32, %v1299_v24  ;;  %4741 = vrsqrt.f32 %v7541_v54  ;;  %v2480_v61 = vmul.f32 %v7513_v43, %v2479_v25  ;;  %v276_v25 = vld [vmem:[%s5174_s23 + $0x378] sm:$0xff] }
 0x18f   : > { %4437 = vmatmul.msk.f32.gmra.mxu3 %vm479_vm0, %v2814_v9  ;;  %4743 = vrsqrt.f32 %v7561_v44  ;;  %v471_v2 = vmul.f32 %v314_v56, %v314_v56  ;;  %v392_v22 = vmul.f32 %v235_v0, %v235_v0  ;;  %v7585_v51 = vpop.xlane.xlu0 %901  ;;  %vm2095_vm14 = vweird.f32 %v7459_v58  ;;  %v7598_v18 = vpop.xlane.xlu2 %664  ;;  %vm7604_vm15 = vmor %vm1684_vm10, %vm1685_vm11  ;;  %v315_v56 = vld [vmem:[%s5174_s23 + $0x4b0] sm:$0xff] }
 0x190   : > { %v353_v50 = vmul.f32 %v196_v52, %v196_v52  ;;  %v1293_v42 = vmul.f32 %v7418_v4, %v1292_v11  ;;  %v1683_v29 = vmul.f32 %v7466_v37, %v1682_v19  ;;  %v7608_v6 = vmul.f32 0.5, %v1690_v53  ;;  %v7613_v30 = vpop.xlane.xlu1 %547  ;;  %vm7628_vm1 = vmor %vm2094_vm7, %vm2095_vm14 }
 0x191   : > { %v927_v15 = vsel %vm479_vm0, %v471_v2, 0.0  ;;  %v690_v47 = vsel %vm479_vm0, %v392_v22, 0.0  ;;  %v2093_v35 = vmul.f32 %v7459_v58, %v2092_v36  ;;  %v1301_v16 = vmul.f32 0.5, %v1300_v5 }
 0x192   : > { %v7615_v21 = vpop.eup %4739  ;;  %928 = vadd.xlane.f32.xlu0 %v927_v15  ;;  %691 = vadd.xlane.f32.xlu2 %v690_v47  ;;  %v573_v46 = vsel %vm479_vm0, %v353_v50, 0.0  ;;  %v1297_v39 = vsel %vm7591_vm12, %v7418_v4, %v1293_v42  ;;  %v1687_v63 = vsel %vm7604_vm15, %v7466_v37, %v1683_v29  ;;  %v3588_v23 = vpop.f32.mrf.mxu2  ;;  %v2481_v13 = vmul.f32 0.5, %v2480_v61  ;;  %v4953_v4 = vld [vmem:[%s5174_s23 + $0x1c8] sm:$0xff] }
 0x193   : > { %v3705_v8 = vpop.f32.mrf.mxu3  ;;  %574 = vadd.xlane.f32.xlu1 %v573_v46  ;;  %v2696_v48 = vmul.f32 %v4952_v3, %v1297_v39  ;;  %v2735_v38 = vmul.f32 %v4953_v4, %v1687_v63  ;;  %3886 = vst.msk [vmem:[%s6698_s6 + $0x2b8] sm:$0xff] %vm3798_vm13, %v3588_v23  ;;  %v2097_v40 = vsel %vm7628_vm1, %v7459_v58, %v2093_v35  ;;  %v7642_v20 = vmax.f32 %v7396_v31, 1e-24  ;;  %v3468_v10 = vpop.f32.mrf.mxu1 }
 0x194   : > { %v7636_v37 = vpop.eup %4741  ;;  %v7645_v33 = vmax.f32 %v7402_v62, 1e-24  ;;  %v7648_v55 = vmax.f32 %v7416_v1, 1e-24  ;;  %vm1694_vm2 = vweird.f32 %v7473_v41  ;;  %v2099_v58 = vmul.f32 %v7615_v21, %v7538_v14  ;;  %v4954_v62 = vld [vmem:[%s5174_s23 + $0x310] sm:$0xff]  ;;  %3925 = vst.msk [vmem:[%s6698_s6 + $0x3f0] sm:$0xff] %vm3798_vm13, %v3705_v8 }
 0x195   : > { %v7650_v11 = vpop.eup %4743  ;;  %v1309_v31 = vmul.f32 %v7636_v37, %v7541_v54  ;;  %4319 = vmatmul.msk.f32.gmra.mxu0 %vm479_vm0, %v2696_v48  ;;  %4358 = vmatmul.msk.f32.gmra.mxu1 %vm479_vm0, %v2735_v38  ;;  %v2776_v1 = vmul.f32 %v4954_v62, %v2097_v40  ;;  %v1692_v12 = vsub.f32 1.5, %v7608_v6  ;;  %v1302_v19 = vsub.f32 1.5, %v1301_v16  ;;  %3846 = vst.msk [vmem:[%s6698_s6 + $0x178] sm:$0xff] %vm3798_vm13, %v3468_v10  ;;  %v236_v10 = vld [vmem:[%s5174_s23 + $0x238] sm:$0xff] }
 0x196   : > { %v2489_v24 = vmul.f32 %v7650_v11, %v7561_v44  ;;  %4745 = vrsqrt.f32 %v7642_v20  ;;  %v2482_v0 = vsub.f32 1.5, %v2481_v13  ;;  %vm1695_vm3 = vweird.f32 %v7533_v59  ;;  %v4956_v13 = vld [vmem:[%s5174_s23 + $0x1d0] sm:$0xff] }
 0x197   : > { %vm1304_vm4 = vweird.f32 %v7476_v17  ;;  %4399 = vmatmul.msk.f32.gmra.mxu2 %vm479_vm0, %v2776_v1  ;;  %4747 = vrsqrt.f32 %v7645_v33  ;;  %vm1305_vm5 = vweird.f32 %v7545_v32  ;;  %v1310_v36 = vmul.f32 %v7636_v37, %v1309_v31  ;;  %vm7684_vm7 = vmor %vm1694_vm2, %vm1695_vm3 }
 0x198   : > { %4749 = vrsqrt.f32 %v7648_v55  ;;  %v433_v53 = vmul.f32 %v276_v25, %v276_v25  ;;  %vm2485_vm6 = vweird.f32 %v7513_v43  ;;  %v2100_v27 = vmul.f32 %v7615_v21, %v2099_v58  ;;  %v7680_v5 = vpop.xlane.xlu0 %787  ;;  %v7692_v42 = vpop.xlane.xlu2 %550  ;;  %vm7699_vm9 = vmor %vm1304_vm4, %vm1305_vm5  ;;  %v316_v58 = vld [vmem:[%s5174_s23 + $0x4b8] sm:$0xff] }
 0x199   : > { %v354_v9 = vmul.f32 %v197_v45, %v197_v45  ;;  %v472_v52 = vmul.f32 %v315_v56, %v315_v56  ;;  %v2490_v2 = vmul.f32 %v7650_v11, %v2489_v24  ;;  %v1303_v60 = vmul.f32 %v7545_v32, %v1302_v19 }
 0x19a   : > { %v813_v22 = vsel %vm479_vm0, %v433_v53, 0.0  ;;  %v1693_v50 = vmul.f32 %v7533_v59, %v1692_v12  ;;  %vm2484_vm8 = vweird.f32 %v7432_v34  ;;  %v2483_v6 = vmul.f32 %v7513_v43, %v2482_v0  ;;  %v277_v53 = vld [vmem:[%s5174_s23 + $0x380] sm:$0xff] }
 0x19b   : > { %814 = vadd.xlane.f32.xlu0 %v813_v22  ;;  %v576_v29 = vsel %vm479_vm0, %v354_v9, 0.0  ;;  %v930_v57 = vsel %vm479_vm0, %v472_v52, 0.0  ;;  %v7706_v15 = vpop.xlane.xlu1 %904  ;;  %v3591_v47 = vpop.f32.mrf.mxu2  ;;  %v1311_v16 = vmul.f32 0.5, %v1310_v36  ;;  %v1307_v17 = vsel %vm7699_vm9, %v7545_v32, %v1303_v60  ;;  %vm7727_vm10 = vmor %vm2484_vm8, %vm2485_vm6 }
 0x19c   : > { %v7708_v35 = vpop.eup %4745  ;;  %577 = vadd.xlane.f32.xlu2 %v576_v29  ;;  %931 = vadd.xlane.f32.xlu1 %v930_v57  ;;  %v1697_v46 = vsel %vm7684_vm7, %v7533_v59, %v1693_v50  ;;  %v7717_v39 = vmax.f32 %v7495_v7, 1e-24  ;;  %3887 = vst.msk [vmem:[%s6698_s6 + $0x2c0] sm:$0xff] %vm3798_vm13, %v3591_v47  ;;  %v3708_v63 = vpop.f32.mrf.mxu3  ;;  %v2101_v32 = vmul.f32 0.5, %v2100_v27  ;;  %vm2104_vm11 = vweird.f32 %v7538_v14  ;;  %v4955_v59 = vld [vmem:[%s5174_s23 + $0x98] sm:$0xff] }
 0x19d   : > { %v7721_v23 = vpop.eup %4747  ;;  %v1699_v7 = vmul.f32 %v7708_v35, %v7642_v20  ;;  %v2697_v26 = vmul.f32 %v4955_v59, %v1307_v17  ;;  %v2736_v3 = vmul.f32 %v4956_v13, %v1697_v46  ;;  %3926 = vst.msk [vmem:[%s6698_s6 + $0x3f8] sm:$0xff] %vm3798_vm13, %v3708_v63  ;;  %v3354_v34 = vpop.f32.mrf.mxu0  ;;  %v2491_v4 = vmul.f32 0.5, %v2490_v2 }
 0x19e   : > { %v7738_v48 = vpop.eup %4749  ;;  %v2499_v38 = vmul.f32 %v7721_v23, %v7645_v33  ;;  %v2487_v40 = vsel %vm7727_vm10, %v7513_v43, %v2483_v6  ;;  %4751 = vrsqrt.f32 %v7717_v39  ;;  %3808 = vst.msk [vmem:[%s6698_s6 + $0x48] sm:$0xff] %vm3798_vm13, %v3354_v34  ;;  %vm1314_vm12 = vweird.f32 %v7541_v54  ;;  %v4957_v43 = vld [vmem:[%s5174_s23 + $0x448] sm:$0xff] }
 0x19f   : > { %vm2494_vm14 = vweird.f32 %v7561_v44  ;;  %v2109_v31 = vmul.f32 %v7738_v48, %v7648_v55  ;;  %4320 = vmatmul.msk.f32.gmra.mxu0 %vm479_vm0, %v2697_v26  ;;  %4359 = vmatmul.msk.f32.gmra.mxu1 %vm479_vm0, %v2736_v3  ;;  %v2815_v62 = vmul.f32 %v4957_v43, %v2487_v40  ;;  %v3471_v1 = vpop.f32.mrf.mxu1  ;;  %v1312_v25 = vsub.f32 1.5, %v1311_v16  ;;  %v4959_v3 = vld [vmem:[%s5174_s23 + $0x318] sm:$0xff]  ;;  %v237_v43 = vld [vmem:[%s5174_s23 + $0x240] sm:$0xff] }
 0x1a0   : > { %v1700_v12 = vmul.f32 %v7708_v35, %v1699_v7  ;;  %v7759_v19 = vmax.f32 %v7498_v49, 1e-24  ;;  %v7762_v24 = vmax.f32 %v7511_v28, 1e-24  ;;  %3847 = vst.msk [vmem:[%s6698_s6 + $0x180] sm:$0xff] %vm3798_vm13, %v3471_v1  ;;  %v2102_v45 = vsub.f32 1.5, %v2101_v32 }
 0x1a1   : > { %v2500_v56 = vmul.f32 %v7721_v23, %v2499_v38  ;;  %4438 = vmatmul.msk.f32.gmra.mxu3 %vm479_vm0, %v2815_v62  ;;  %v393_v0 = vmul.f32 %v236_v10, %v236_v10  ;;  %v473_v36 = vmul.f32 %v316_v58, %v316_v58  ;;  %vm2105_vm15 = vweird.f32 %v7615_v21  ;;  %v7776_v9 = vpop.xlane.xlu0 %667  ;;  %v4960_v10 = vld [vmem:[%s5174_s23 + $0x450] sm:$0xff] }
 0x1a2   : > { %vm1315_vm1 = vweird.f32 %v7636_v37  ;;  %v2492_v27 = vsub.f32 1.5, %v2491_v4  ;;  %4753 = vrsqrt.f32 %v7759_v19  ;;  %vm2495_vm2 = vweird.f32 %v7650_v11  ;;  %vm7804_vm5 = vmor %vm2104_vm11, %vm2105_vm15 }
 0x1a3   : > { %v2110_v49 = vmul.f32 %v7738_v48, %v2109_v31  ;;  %4755 = vrsqrt.f32 %v7762_v24  ;;  %v693_v28 = vsel %vm479_vm0, %v393_v0, 0.0  ;;  %v1701_v61 = vmul.f32 0.5, %v1700_v12  ;;  %vm7788_vm3 = vmor %vm1314_vm12, %vm1315_vm1  ;;  %v278_v31 = vld [vmem:[%s5174_s23 + $0x388] sm:$0xff] }
 0x1a4   : > { %v7778_v52 = vpop.eup %4751  ;;  %694 = vadd.xlane.f32.xlu0 %v693_v28  ;;  %v933_v2 = vsel %vm479_vm0, %v473_v36, 0.0  ;;  %v434_v22 = vmul.f32 %v277_v53, %v277_v53  ;;  %v1313_v60 = vmul.f32 %v7636_v37, %v1312_v25  ;;  %v7782_v50 = vpop.xlane.xlu2 %907  ;;  %vm1704_vm4 = vweird.f32 %v7642_v20  ;;  %vm7822_vm6 = vmor %vm2494_vm14, %vm2495_vm2 }
 0x1a5   : > { %v7793_v29 = vmul.f32 0.5, %v2500_v56  ;;  %v1319_v57 = vmul.f32 %v7778_v52, %v7717_v39  ;;  %934 = vadd.xlane.f32.xlu2 %v933_v2  ;;  %v2103_v6 = vmul.f32 %v7615_v21, %v2102_v45  ;;  %v7798_v47 = vpop.xlane.xlu1 %790  ;;  %v3594_v16 = vpop.f32.mrf.mxu2  ;;  %v2493_v63 = vmul.f32 %v7650_v11, %v2492_v27 }
 0x1a6   : > { %v816_v17 = vsel %vm479_vm0, %v434_v22, 0.0  ;;  %v1317_v46 = vsel %vm7788_vm3, %v7636_v37, %v1313_v60  ;;  %v7814_v8 = vmax.f32 %v7585_v51, 1e-24  ;;  %3888 = vst.msk [vmem:[%s6698_s6 + $0x2c8] sm:$0xff] %vm3798_vm13, %v3594_v16  ;;  %v7826_v32 = vmul.f32 0.5, %v2110_v49  ;;  %v4958_v37 = vld [vmem:[%s5174_s23 + $0xa0] sm:$0xff] }
 0x1a7   : > { %817 = vadd.xlane.f32.xlu1 %v816_v17  ;;  %v2698_v7 = vmul.f32 %v4958_v37, %v1317_v46  ;;  %v2107_v51 = vsel %vm7804_vm5, %v7615_v21, %v2103_v6  ;;  %v7833_v59 = vmax.f32 %v7598_v18, 1e-24  ;;  %v3357_v26 = vpop.f32.mrf.mxu0  ;;  %v1702_v13 = vsub.f32 1.5, %v1701_v61  ;;  %v198_v21 = vld [vmem:[%s5174_s23 + $0x108] sm:$0xff] }
 0x1a8   : > { %v7835_v44 = vpop.eup %4753  ;;  %vm2504_vm7 = vweird.f32 %v7645_v33  ;;  %v2777_v34 = vmul.f32 %v4959_v3, %v2107_v51  ;;  %v2497_v4 = vsel %vm7822_vm6, %v7650_v11, %v2493_v63  ;;  %3809 = vst.msk [vmem:[%s6698_s6 + $0x50] sm:$0xff] %vm3798_vm13, %v3357_v26  ;;  %v3474_v18 = vpop.f32.mrf.mxu1  ;;  %vm1705_vm8 = vweird.f32 %v7708_v35 }
 0x1a9   : > { %v7845_v38 = vpop.eup %4755  ;;  %v2119_v40 = vmul.f32 %v7835_v44, %v7759_v19  ;;  %4321 = vmatmul.msk.f32.gmra.mxu0 %vm479_vm0, %v2698_v7  ;;  %v2816_v58 = vmul.f32 %v4960_v10, %v2497_v4  ;;  %4757 = vrsqrt.f32 %v7814_v8  ;;  %3848 = vst.msk [vmem:[%s6698_s6 + $0x188] sm:$0xff] %vm3798_vm13, %v3474_v18  ;;  %vm2505_vm9 = vweird.f32 %v7721_v23  ;;  %vm7875_vm10 = vmor %vm1704_vm4, %vm1705_vm8  ;;  %v238_v18 = vld [vmem:[%s5174_s23 + $0x248] sm:$0xff] }
 0x1aa   : > { %v1320_v11 = vmul.f32 %v7778_v52, %v1319_v57  ;;  %v1709_v62 = vmul.f32 %v7845_v38, %v7762_v24  ;;  %4400 = vmatmul.msk.f32.gmra.mxu2 %vm479_vm0, %v2777_v34  ;;  %4759 = vrsqrt.f32 %v7833_v59  ;;  %v2502_v1 = vsub.f32 1.5, %v7793_v29  ;;  %v4961_v57 = vld [vmem:[%s5174_s23 + $0x1d8] sm:$0xff]  ;;  %vm7907_vm15 = vmor %vm2504_vm7, %vm2505_vm9  ;;  %v4962_v34 = vld [vmem:[%s5174_s23 + $0x320] sm:$0xff] }
 0x1ab   : > { %v2112_v25 = vsub.f32 1.5, %v7826_v32  ;;  %4439 = vmatmul.msk.f32.gmra.mxu3 %vm479_vm0, %v2816_v58  ;;  %v7867_v12 = vmax.f32 %v7613_v30, 1e-24  ;;  %v355_v45 = vmul.f32 %v198_v21, %v198_v21  ;;  %v2120_v56 = vmul.f32 %v7835_v44, %v2119_v40  ;;  %v4963_v21 = vld [vmem:[%s5174_s23 + $0x458] sm:$0xff]  ;;  %v199_v40 = vld [vmem:[%s5174_s23 + $0x110] sm:$0xff] }
 0x1ac   : > { %v435_v0 = vmul.f32 %v278_v31, %v278_v31  ;;  %v394_v36 = vmul.f32 %v237_v43, %v237_v43  ;;  %v1703_v53 = vmul.f32 %v7708_v35, %v1702_v13  ;;  %vm2115_vm11 = vweird.f32 %v7738_v48  ;;  %v7883_v28 = vpop.xlane.xlu0 %553  ;;  %v7885_v61 = vpop.xlane.xlu2 %793  ;;  %v317_v13 = vld [vmem:[%s5174_s23 + $0x4c0] sm:$0xff] }
 0x1ad   : > { %v1710_v30 = vmul.f32 %v7845_v38, %v1709_v62  ;;  %4761 = vrsqrt.f32 %v7867_v12  ;;  %v579_v49 = vsel %vm479_vm0, %v355_v45, 0.0  ;;  %v1321_v2 = vmul.f32 0.5, %v1320_v11 }
 0x1ae   : > { %580 = vadd.xlane.f32.xlu0 %v579_v49  ;;  %v819_v20 = vsel %vm479_vm0, %v435_v0, 0.0  ;;  %v696_v22 = vsel %vm479_vm0, %v394_v36, 0.0  ;;  %v1707_v60 = vsel %vm7875_vm10, %v7708_v35, %v1703_v53  ;;  %v3711_v41 = vpop.f32.mrf.mxu3  ;;  %vm2114_vm12 = vweird.f32 %v7648_v55 }
 0x1af   : > { %v7892_v29 = vpop.eup %4757  ;;  %vm1324_vm14 = vweird.f32 %v7717_v39  ;;  %820 = vadd.xlane.f32.xlu2 %v819_v20  ;;  %697 = vadd.xlane.f32.xlu1 %v696_v22  ;;  %v2737_v6 = vmul.f32 %v4961_v57, %v1707_v60  ;;  %v7897_v16 = vpop.xlane.xlu1 %670  ;;  %3927 = vst.msk [vmem:[%s6698_s6 + $0x400] sm:$0xff] %vm3798_vm13, %v3711_v41  ;;  %v7911_v55 = vmul.f32 0.5, %v2120_v56  ;;  %v2113_v17 = vmul.f32 %v7738_v48, %v2112_v25  ;;  %vm7920_vm1 = vmor %vm2114_vm12, %vm2115_vm11  ;;  %v4964_v41 = vld [vmem:[%s5174_s23 + $0xa8] sm:$0xff] }
 0x1b0   : > { %v7901_v54 = vpop.eup %4759  ;;  %v2503_v46 = vmul.f32 %v7721_v23, %v2502_v1  ;;  %v7916_v63 = vmax.f32 %v7680_v5, 1e-24  ;;  %vm2124_vm2 = vweird.f32 %v7759_v19  ;;  %v1711_v33 = vmul.f32 0.5, %v1710_v30 }
 0x1b1   : > { %v1719_v32 = vmul.f32 %v7901_v54, %v7833_v59  ;;  %4360 = vmatmul.msk.f32.gmra.mxu1 %vm479_vm0, %v2737_v6  ;;  %v7929_v5 = vmax.f32 %v7692_v42, 1e-24  ;;  %v3360_v37 = vpop.f32.mrf.mxu0  ;;  %v1322_v7 = vsub.f32 1.5, %v1321_v2  ;;  %v2117_v51 = vsel %vm7920_vm1, %v7738_v48, %v2113_v17 }
 0x1b2   : > { %v2507_v26 = vsel %vm7907_vm15, %v7721_v23, %v2503_v46  ;;  %4763 = vrsqrt.f32 %v7916_v63  ;;  %3810 = vst.msk [vmem:[%s6698_s6 + $0x58] sm:$0xff] %vm3798_vm13, %v3360_v37  ;;  %vm1714_vm3 = vweird.f32 %v7762_v24  ;;  %v2509_v42 = vmul.f32 %v7892_v29, %v7814_v8 }
 0x1b3   : > { %v7941_v3 = vpop.eup %4761  ;;  %v2778_v4 = vmul.f32 %v4962_v34, %v2117_v51  ;;  %v2817_v48 = vmul.f32 %v4963_v21, %v2507_v26  ;;  %vm1325_vm4 = vweird.f32 %v7778_v52  ;;  %v2122_v23 = vsub.f32 1.5, %v7911_v55 }
 0x1b4   : > { %v1329_v10 = vmul.f32 %v7941_v3, %v7867_v12  ;;  %4765 = vrsqrt.f32 %v7929_v5  ;;  %v1712_v58 = vsub.f32 1.5, %v1711_v33  ;;  %v1720_v31 = vmul.f32 %v7901_v54, %v1719_v32  ;;  %vm7965_vm5 = vmor %vm1324_vm14, %vm1325_vm4 }
 0x1b5   : > { %4401 = vmatmul.msk.f32.gmra.mxu2 %vm479_vm0, %v2778_v4  ;;  %4440 = vmatmul.msk.f32.gmra.mxu3 %vm479_vm0, %v2817_v48  ;;  %v7959_v43 = vmax.f32 %v7706_v15, 1e-24  ;;  %v474_v11 = vmul.f32 %v317_v13, %v317_v13  ;;  %v395_v1 = vmul.f32 %v238_v18, %v238_v18  ;;  %v356_v25 = vmul.f32 %v199_v40, %v199_v40  ;;  %v279_v13 = vld [vmem:[%s5174_s23 + $0x390] sm:$0xff]  ;;  %v4966_v4 = vld [vmem:[%s5174_s23 + $0x328] sm:$0xff] }
 0x1b6   : > { %v1330_v62 = vmul.f32 %v7941_v3, %v1329_v10  ;;  %v1323_v45 = vmul.f32 %v7778_v52, %v1322_v7  ;;  %vm1715_vm6 = vweird.f32 %v7845_v38  ;;  %v2510_v0 = vmul.f32 %v7892_v29, %v2509_v42  ;;  %v4965_v7 = vld [vmem:[%s5174_s23 + $0x1e0] sm:$0xff]  ;;  %v200_v42 = vld [vmem:[%s5174_s23 + $0x118] sm:$0xff]  ;;  %v318_v48 = vld [vmem:[%s5174_s23 + $0x4c8] sm:$0xff] }
 0x1b7   : > { %4767 = vrsqrt.f32 %v7959_v43  ;;  %v936_v15 = vsel %vm479_vm0, %v474_v11, 0.0  ;;  %v7973_v36 = vpop.xlane.xlu0 %910  ;;  %v7975_v53 = vpop.xlane.xlu2 %673  ;;  %vm2125_vm7 = vweird.f32 %v7835_v44  ;;  %v699_v39 = vsel %vm479_vm0, %v395_v1, 0.0  ;;  %vm8001_vm10 = vmor %vm1714_vm3, %vm1715_vm6 }
 0x1b8   : > { %v7977_v27 = vpop.eup %4763  ;;  %937 = vadd.xlane.f32.xlu0 %v936_v15  ;;  %v582_v30 = vsel %vm479_vm0, %v356_v25, 0.0  ;;  %v1327_v49 = vsel %vm7965_vm5, %v7778_v52, %v1323_v45  ;;  %v7985_v2 = vpop.xlane.xlu1 %556  ;;  %vm2514_vm8 = vweird.f32 %v7814_v8  ;;  %v7988_v22 = vmul.f32 0.5, %v1720_v31  ;;  %700 = vadd.xlane.f32.xlu2 %v699_v39  ;;  %vm8019_vm12 = vmor %vm2124_vm2, %vm2125_vm7 }
 0x1b9   : > { %v3597_v20 = vpop.f32.mrf.mxu2  ;;  %vm1724_vm9 = vweird.f32 %v7833_v59  ;;  %v2129_v60 = vmul.f32 %v7977_v27, %v7916_v63  ;;  %583 = vadd.xlane.f32.xlu1 %v582_v30  ;;  %v2699_v57 = vmul.f32 %v4964_v41, %v1327_v49  ;;  %v1713_v6 = vmul.f32 %v7845_v38, %v1712_v58  ;;  %v3714_v52 = vpop.f32.mrf.mxu3 }
 0x1ba   : > { %v7995_v35 = vpop.eup %4765  ;;  %v1331_v17 = vmul.f32 0.5, %v1330_v62  ;;  %vm1334_vm11 = vweird.f32 %v7867_v12  ;;  %v2123_v46 = vmul.f32 %v7835_v44, %v2122_v23  ;;  %v8008_v14 = vmax.f32 %v7776_v9, 1e-24  ;;  %3889 = vst.msk [vmem:[%s6698_s6 + $0x2d0] sm:$0xff] %vm3798_vm13, %v3597_v20 }
 0x1bb   : > { %v8011_v33 = vmax.f32 %v7782_v50, 1e-24  ;;  %v2511_v32 = vmul.f32 0.5, %v2510_v0  ;;  %v2130_v9 = vmul.f32 %v7977_v27, %v2129_v60  ;;  %v1339_v37 = vmul.f32 %v7995_v35, %v7929_v5  ;;  %4322 = vmatmul.msk.f32.gmra.mxu0 %vm479_vm0, %v2699_v57  ;;  %3928 = vst.msk [vmem:[%s6698_s6 + $0x408] sm:$0xff] %vm3798_vm13, %v3714_v52  ;;  %v3477_v19 = vpop.f32.mrf.mxu1 }
 0x1bc   : > { %v1717_v50 = vsel %vm8001_vm10, %v7845_v38, %v1713_v6  ;;  %vm2515_vm14 = vweird.f32 %v7892_v29  ;;  %v2127_v26 = vsel %vm8019_vm12, %v7835_v44, %v2123_v46  ;;  %4769 = vrsqrt.f32 %v8008_v14  ;;  %3849 = vst.msk [vmem:[%s6698_s6 + $0x190] sm:$0xff] %vm3798_vm13, %v3477_v19 }
 0x1bd   : > { %v2738_v51 = vmul.f32 %v4965_v7, %v1717_v50  ;;  %v8042_v34 = vpop.eup %4767  ;;  %vm1335_vm15 = vweird.f32 %v7941_v3  ;;  %v2131_v38 = vmul.f32 0.5, %v2130_v9  ;;  %v2779_v21 = vmul.f32 %v4966_v4, %v2127_v26  ;;  %vm8071_vm3 = vmor %vm2514_vm8, %vm2515_vm14 }
 0x1be   : > { %4771 = vrsqrt.f32 %v8011_v33  ;;  %v1722_v18 = vsub.f32 1.5, %v7988_v22  ;;  %v1332_v40 = vsub.f32 1.5, %v1331_v17  ;;  %v2519_v44 = vmul.f32 %v8042_v34, %v7959_v43  ;;  %vm8091_vm5 = vmor %vm1334_vm11, %vm1335_vm15 }
 0x1bf   : > { %4361 = vmatmul.msk.f32.gmra.mxu1 %vm479_vm0, %v2738_v51  ;;  %v8053_v23 = vmax.f32 %v7798_v47, 1e-24  ;;  %v2512_v10 = vsub.f32 1.5, %v2511_v32  ;;  %v1340_v58 = vmul.f32 %v7995_v35, %v1339_v37  ;;  %4402 = vmatmul.msk.f32.gmra.mxu2 %vm479_vm0, %v2779_v21  ;;  %v436_v31 = vmul.f32 %v279_v13, %v279_v13  ;;  %v8063_v56 = vpop.xlane.xlu0 %796  ;;  %v4967_v37 = vld [vmem:[%s5174_s23 + $0xb0] sm:$0xff]  ;;  %v4968_v13 = vld [vmem:[%s5174_s23 + $0x1e8] sm:$0xff] }
 0x1c0   : > { %v357_v11 = vmul.f32 %v200_v42, %v200_v42  ;;  %v2132_v62 = vsub.f32 1.5, %v2131_v38  ;;  %v2520_v1 = vmul.f32 %v8042_v34, %v2519_v44  ;;  %v475_v25 = vmul.f32 %v318_v48, %v318_v48  ;;  %v4969_v38 = vld [vmem:[%s5174_s23 + $0x460] sm:$0xff] }
 0x1c1   : > { %4773 = vrsqrt.f32 %v8053_v23  ;;  %vm1725_vm1 = vweird.f32 %v7901_v54  ;;  %vm2134_vm2 = vweird.f32 %v7916_v63  ;;  %v822_v47 = vsel %vm479_vm0, %v436_v31, 0.0  ;;  %v3600_v0 = vpop.f32.mrf.mxu2  ;;  %v8079_v22 = vpop.xlane.xlu2 %559 }
 0x1c2   : > { %v585_v45 = vsel %vm479_vm0, %v357_v11, 0.0  ;;  %v8065_v15 = vpop.eup %4769  ;;  %vm1344_vm4 = vweird.f32 %v7929_v5  ;;  %823 = vadd.xlane.f32.xlu0 %v822_v47  ;;  %v939_v30 = vsel %vm479_vm0, %v475_v25, 0.0  ;;  %v1333_v49 = vmul.f32 %v7941_v3, %v1332_v40  ;;  %v8081_v60 = vpop.xlane.xlu1 %913  ;;  %3890 = vst.msk [vmem:[%s6698_s6 + $0x2d8] sm:$0xff] %vm3798_vm13, %v3600_v0  ;;  %vm8103_vm7 = vmor %vm1724_vm9, %vm1725_vm1 }
 0x1c3   : > { %586 = vadd.xlane.f32.xlu2 %v585_v45  ;;  %v1723_v20 = vmul.f32 %v7901_v54, %v1722_v18  ;;  %vm2135_vm6 = vweird.f32 %v7977_v27  ;;  %v1341_v57 = vmul.f32 0.5, %v1340_v58  ;;  %v1729_v6 = vmul.f32 %v8065_v15, %v8008_v14  ;;  %940 = vadd.xlane.f32.xlu1 %v939_v30  ;;  %v3717_v55 = vpop.f32.mrf.mxu3  ;;  %v239_v18 = vld [vmem:[%s5174_s23 + $0x250] sm:$0xff]  ;;  %v280_v58 = vld [vmem:[%s5174_s23 + $0x398] sm:$0xff] }
 0x1c4   : > { %v8085_v8 = vpop.eup %4771  ;;  %v2513_v52 = vmul.f32 %v7892_v29, %v2512_v10  ;;  %v2133_v17 = vmul.f32 %v7977_v27, %v2132_v62  ;;  %v2521_v46 = vmul.f32 0.5, %v2520_v1  ;;  %vm2524_vm8 = vweird.f32 %v7959_v43  ;;  %3929 = vst.msk [vmem:[%s6698_s6 + $0x410] sm:$0xff] %vm3798_vm13, %v3717_v55  ;;  %v3363_v59 = vpop.f32.mrf.mxu0  ;;  %vm8148_vm10 = vmor %vm2134_vm2, %vm2135_vm6  ;;  %v319_v10 = vld [vmem:[%s5174_s23 + $0x4d0] sm:$0xff]  ;;  %v4971_v43 = vld [vmem:[%s5174_s23 + $0xb8] sm:$0xff] }
 0x1c5   : > { %v2529_v24 = vmul.f32 %v8085_v8, %v8011_v33  ;;  %v1337_v32 = vsel %vm8091_vm5, %v7941_v3, %v1333_v49  ;;  %v1730_v9 = vmul.f32 %v8065_v15, %v1729_v6  ;;  %v1727_v19 = vsel %vm8103_vm7, %v7901_v54, %v1723_v20  ;;  %3811 = vst.msk [vmem:[%s6698_s6 + $0x60] sm:$0xff] %vm3798_vm13, %v3363_v59  ;;  %v3480_v3 = vpop.f32.mrf.mxu1  ;;  %v4970_v49 = vld [vmem:[%s5174_s23 + $0x330] sm:$0xff] }
 0x1c6   : > { %v2700_v50 = vmul.f32 %v4967_v37, %v1337_v32  ;;  %v2517_v7 = vsel %vm8071_vm3, %v7892_v29, %v2513_v52  ;;  %v2739_v42 = vmul.f32 %v4968_v13, %v1727_v19  ;;  %v8132_v21 = vmax.f32 %v7883_v28, 1e-24  ;;  %3850 = vst.msk [vmem:[%s6698_s6 + $0x198] sm:$0xff] %vm3798_vm13, %v3480_v3  ;;  %v201_v19 = vld [vmem:[%s5174_s23 + $0x120] sm:$0xff] }
 0x1c7   : > { %v8126_v51 = vpop.eup %4773  ;;  %v2530_v26 = vmul.f32 %v8085_v8, %v2529_v24  ;;  %v2818_v4 = vmul.f32 %v4969_v38, %v2517_v7  ;;  %v1342_v29 = vsub.f32 1.5, %v1341_v57  ;;  %vm1345_vm9 = vweird.f32 %v7995_v35  ;;  %v240_v38 = vld [vmem:[%s5174_s23 + $0x258] sm:$0xff] }
 0x1c8   : > { %v2139_v54 = vmul.f32 %v8126_v51, %v8053_v23  ;;  %4323 = vmatmul.msk.f32.gmra.mxu0 %vm479_vm0, %v2700_v50  ;;  %v8141_v48 = vmax.f32 %v7885_v61, 1e-24  ;;  %v2522_v40 = vsub.f32 1.5, %v2521_v46  ;;  %4362 = vmatmul.msk.f32.gmra.mxu1 %vm479_vm0, %v2739_v42  ;;  %4775 = vrsqrt.f32 %v8132_v21  ;;  %vm8179_vm14 = vmor %vm1344_vm4, %vm1345_vm9  ;;  %v4972_v50 = vld [vmem:[%s5174_s23 + $0x468] sm:$0xff]  ;;  %v281_v42 = vld [vmem:[%s5174_s23 + $0x3a0] sm:$0xff] }
 0x1c9   : > { %v2531_v44 = vmul.f32 0.5, %v2530_v26  ;;  %4441 = vmatmul.msk.f32.gmra.mxu3 %vm479_vm0, %v2818_v4  ;;  %v8156_v61 = vmax.f32 %v7897_v16, 1e-24  ;;  %v2137_v63 = vsel %vm8148_vm10, %v7977_v27, %v2133_v17  ;;  %vm2525_vm11 = vweird.f32 %v8042_v34  ;;  %v8171_v27 = vpop.xlane.xlu0 %676 }
 0x1ca   : > { %v2140_v31 = vmul.f32 %v8126_v51, %v2139_v54  ;;  %4777 = vrsqrt.f32 %v8141_v48  ;;  %v8166_v11 = vmul.f32 0.5, %v1730_v9  ;;  %vm2534_vm12 = vweird.f32 %v8011_v33  ;;  %v8173_v45 = vpop.xlane.xlu2 %916  ;;  %vm8192_vm15 = vmor %vm2524_vm8, %vm2525_vm11 }
 0x1cb   : > { %4779 = vrsqrt.f32 %v8156_v61  ;;  %v396_v16 = vmul.f32 %v239_v18, %v239_v18  ;;  %v476_v1 = vmul.f32 %v319_v10, %v319_v10  ;;  %v437_v25 = vmul.f32 %v280_v58, %v280_v58  ;;  %v8186_v57 = vpop.xlane.xlu1 %799 }
 0x1cc   : > { %v2141_v62 = vmul.f32 0.5, %v2140_v31  ;;  %v1343_v47 = vmul.f32 %v7995_v35, %v1342_v29  ;;  %v2532_v39 = vsub.f32 1.5, %v2531_v44  ;;  %v2780_v20 = vmul.f32 %v4970_v49, %v2137_v63  ;;  %v3603_v6 = vpop.f32.mrf.mxu2 }
 0x1cd   : > { %v702_v30 = vsel %vm479_vm0, %v396_v16, 0.0  ;;  %v2523_v41 = vmul.f32 %v8042_v34, %v2522_v40  ;;  %v942_v55 = vsel %vm479_vm0, %v476_v1, 0.0  ;;  %v825_v12 = vsel %vm479_vm0, %v437_v25, 0.0  ;;  %3891 = vst.msk [vmem:[%s6698_s6 + $0x2e0] sm:$0xff] %vm3798_vm13, %v3603_v6 }
 0x1ce   : > { %v2142_v52 = vsub.f32 1.5, %v2141_v62  ;;  %703 = vadd.xlane.f32.xlu0 %v702_v30  ;;  %v1347_v17 = vsel %vm8179_vm14, %v7995_v35, %v1343_v47  ;;  %v8203_v46 = vpop.eup %4775  ;;  %vm1734_vm1 = vweird.f32 %v8008_v14  ;;  %vm2144_vm2 = vweird.f32 %v8053_v23  ;;  %943 = vadd.xlane.f32.xlu2 %v942_v55  ;;  %v3366_v59 = vpop.f32.mrf.mxu0  ;;  %v4973_v55 = vld [vmem:[%s5174_s23 + $0x338] sm:$0xff] }
 0x1cf   : > { %826 = vadd.xlane.f32.xlu1 %v825_v12  ;;  %v2701_v24 = vmul.f32 %v4971_v43, %v1347_v17  ;;  %v2527_v32 = vsel %vm8192_vm15, %v8042_v34, %v2523_v41  ;;  %v8212_v35 = vmax.f32 %v7973_v36, 1e-24  ;;  %vm2535_vm3 = vweird.f32 %v8085_v8  ;;  %4403 = vmatmul.msk.f32.gmra.mxu2 %vm479_vm0, %v2780_v20  ;;  %3812 = vst.msk [vmem:[%s6698_s6 + $0x68] sm:$0xff] %vm3798_vm13, %v3366_v59  ;;  %v3483_v36 = vpop.f32.mrf.mxu1  ;;  %v4974_v17 = vld [vmem:[%s5174_s23 + $0x470] sm:$0xff]  ;;  %v4978_v41 = vld [vmem:[%s5174_s23 + $0x340] sm:$0xff] }
 0x1d0   : > { %v8214_v9 = vpop.eup %4777  ;;  %vm2145_vm4 = vweird.f32 %v8126_v51  ;;  %v1349_v37 = vmul.f32 %v8203_v46, %v8132_v21  ;;  %v2819_v34 = vmul.f32 %v4972_v50, %v2527_v32  ;;  %v2533_v3 = vmul.f32 %v8085_v8, %v2532_v39  ;;  %3851 = vst.msk [vmem:[%s6698_s6 + $0x1a0] sm:$0xff] %vm3798_vm13, %v3483_v36  ;;  %vm8247_vm6 = vmor %vm2534_vm12, %vm2535_vm3 }
 0x1d1   : > { %v8225_v7 = vpop.eup %4779  ;;  %v2143_v26 = vmul.f32 %v8126_v51, %v2142_v52  ;;  %v2149_v13 = vmul.f32 %v8214_v9, %v8141_v48  ;;  %4324 = vmatmul.msk.f32.gmra.mxu0 %vm479_vm0, %v2701_v24  ;;  %4781 = vrsqrt.f32 %v8212_v35  ;;  %v1732_v4 = vsub.f32 1.5, %v8166_v11  ;;  %vm8264_vm9 = vmor %vm2144_vm2, %vm2145_vm4 }
 0x1d2   : > { %vm1735_vm5 = vweird.f32 %v8065_v15  ;;  %v1350_v29 = vmul.f32 %v8203_v46, %v1349_v37  ;;  %v1739_v54 = vmul.f32 %v8225_v7, %v8156_v61  ;;  %4442 = vmatmul.msk.f32.gmra.mxu3 %vm479_vm0, %v2819_v34  ;;  %vm1354_vm7 = vweird.f32 %v8132_v21  ;;  %v4975_v37 = vld [vmem:[%s5174_s23 + $0x1f0] sm:$0xff] }
 0x1d3   : > { %v2150_v28 = vmul.f32 %v8214_v9, %v2149_v13  ;;  %vm2154_vm8 = vweird.f32 %v8141_v48  ;;  %v8255_v40 = vmax.f32 %v7975_v53, 1e-24  ;;  %v8258_v44 = vmax.f32 %v7985_v2, 1e-24  ;;  %vm8294_vm11 = vmor %vm1734_vm1, %vm1735_vm5  ;;  %v203_v13 = vld [vmem:[%s5174_s23 + $0x130] sm:$0xff] }
 0x1d4   : > { %v358_v10 = vmul.f32 %v201_v19, %v201_v19  ;;  %v1351_v58 = vmul.f32 0.5, %v1350_v29  ;;  %v1740_v63 = vmul.f32 %v8225_v7, %v1739_v54  ;;  %vm1744_vm10 = vweird.f32 %v8156_v61  ;;  %v8279_v25 = vpop.xlane.xlu0 %562  ;;  %v202_v29 = vld [vmem:[%s5174_s23 + $0x128] sm:$0xff] }
 0x1d5   : > { %v438_v31 = vmul.f32 %v281_v42, %v281_v42  ;;  %v397_v53 = vmul.f32 %v240_v38, %v240_v38  ;;  %v2537_v2 = vsel %vm8247_vm6, %v8085_v8, %v2533_v3  ;;  %v2147_v11 = vsel %vm8264_vm9, %v8126_v51, %v2143_v26  ;;  %v8281_v47 = vpop.xlane.xlu2 %802  ;;  %v8288_v49 = vpop.xlane.xlu1 %679 }
 0x1d6   : > { %v2151_v23 = vmul.f32 0.5, %v2150_v28  ;;  %4783 = vrsqrt.f32 %v8255_v40  ;;  %v1352_v16 = vsub.f32 1.5, %v1351_v58  ;;  %v1741_v62 = vmul.f32 0.5, %v1740_v63  ;;  %v3720_v20 = vpop.f32.mrf.mxu3 }
 0x1d7   : > { %4785 = vrsqrt.f32 %v8258_v44  ;;  %v588_v1 = vsel %vm479_vm0, %v358_v10, 0.0  ;;  %v8283_v0 = vpop.eup %4781  ;;  %v828_v51 = vsel %vm479_vm0, %v438_v31, 0.0  ;;  %v705_v39 = vsel %vm479_vm0, %v397_v53, 0.0  ;;  %3930 = vst.msk [vmem:[%s6698_s6 + $0x418] sm:$0xff] %vm3798_vm13, %v3720_v20  ;;  %v3369_v24 = vpop.f32.mrf.mxu0 }
 0x1d8   : > { %v2152_v8 = vsub.f32 1.5, %v2151_v23  ;;  %589 = vadd.xlane.f32.xlu0 %v588_v1  ;;  %v1733_v30 = vmul.f32 %v8065_v15, %v1732_v4  ;;  %vm1355_vm12 = vweird.f32 %v8203_v46  ;;  %vm2155_vm14 = vweird.f32 %v8214_v9  ;;  %829 = vadd.xlane.f32.xlu2 %v828_v51  ;;  %3813 = vst.msk [vmem:[%s6698_s6 + $0x70] sm:$0xff] %vm3798_vm13, %v3369_v24  ;;  %v241_v4 = vld [vmem:[%s5174_s23 + $0x260] sm:$0xff] }
 0x1d9   : > { %v1742_v6 = vsub.f32 1.5, %v1741_v62  ;;  %v2539_v5 = vmul.f32 %v8283_v0, %v8212_v35  ;;  %706 = vadd.xlane.f32.xlu1 %v705_v39  ;;  %v1353_v14 = vmul.f32 %v8203_v46, %v1352_v16  ;;  %v2781_v12 = vmul.f32 %v4973_v55, %v2147_v11  ;;  %vm8336_vm1 = vmor %vm1354_vm7, %vm1355_vm12  ;;  %v4976_v11 = vld [vmem:[%s5174_s23 + $0xc0] sm:$0xff]  ;;  %v4977_v16 = vld [vmem:[%s5174_s23 + $0x1f8] sm:$0xff] }
 0x1da   : > { %v1737_v52 = vsel %vm8294_vm11, %v8065_v15, %v1733_v30  ;;  %v2820_v43 = vmul.f32 %v4974_v17, %v2537_v2  ;;  %vm1745_vm15 = vweird.f32 %v8225_v7  ;;  %v2153_v15 = vmul.f32 %v8214_v9, %v2152_v8  ;;  %vm8367_vm6 = vmor %vm2154_vm8, %vm2155_vm14 }
 0x1db   : > { %v1743_v32 = vmul.f32 %v8225_v7, %v1742_v6  ;;  %v2540_v59 = vmul.f32 %v8283_v0, %v2539_v5  ;;  %v2740_v50 = vmul.f32 %v4975_v37, %v1737_v52  ;;  %4404 = vmatmul.msk.f32.gmra.mxu2 %vm479_vm0, %v2781_v12  ;;  %v8322_v19 = vmax.f32 %v8063_v56, 1e-24  ;;  %vm8353_vm4 = vmor %vm1744_vm10, %vm1745_vm15 }
 0x1dc   : > { %v8316_v34 = vpop.eup %4783  ;;  %4443 = vmatmul.msk.f32.gmra.mxu3 %vm479_vm0, %v2820_v43  ;;  %v8325_v36 = vmax.f32 %v8079_v22, 1e-24  ;;  %v8328_v3 = vmax.f32 %v8081_v60, 1e-24  ;;  %vm2544_vm2 = vweird.f32 %v8212_v35  ;;  %vm1754_vm3 = vweird.f32 %v8255_v40  ;;  %v320_v60 = vld [vmem:[%s5174_s23 + $0x4d8] sm:$0xff] }
 0x1dd   : > { %v8330_v26 = vpop.eup %4785  ;;  %v2541_v56 = vmul.f32 0.5, %v2540_v59  ;;  %v1749_v22 = vmul.f32 %v8316_v34, %v8255_v40  ;;  %4363 = vmatmul.msk.f32.gmra.mxu1 %vm479_vm0, %v2740_v50  ;;  %v1357_v42 = vsel %vm8336_vm1, %v8203_v46, %v1353_v14  ;;  %vm2545_vm5 = vweird.f32 %v8283_v0  ;;  %v8376_v28 = vpop.xlane.xlu0 %919 }
 0x1de   : > { %v1359_v38 = vmul.f32 %v8330_v26, %v8258_v44  ;;  %4787 = vrsqrt.f32 %v8322_v19  ;;  %v1747_v61 = vsel %vm8353_vm4, %v8225_v7, %v1743_v32  ;;  %v2157_v48 = vsel %vm8367_vm6, %v8214_v9, %v2153_v15  ;;  %v8383_v58 = vpop.xlane.xlu2 %682  ;;  %vm8424_vm9 = vmor %vm2544_vm2, %vm2545_vm5  ;;  %v282_v15 = vld [vmem:[%s5174_s23 + $0x3a8] sm:$0xff] }
 0x1df   : > { %v2542_v54 = vsub.f32 1.5, %v2541_v56  ;;  %v1750_v18 = vmul.f32 %v8316_v34, %v1749_v22  ;;  %4789 = vrsqrt.f32 %v8325_v36  ;;  %v477_v33 = vmul.f32 %v320_v60, %v320_v60  ;;  %v321_v60 = vld [vmem:[%s5174_s23 + $0x4e0] sm:$0xff] }
 0x1e0   : > { %v1360_v10 = vmul.f32 %v8330_v26, %v1359_v38  ;;  %4791 = vrsqrt.f32 %v8328_v3  ;;  %vm1365_vm7 = vweird.f32 %v8330_v26  ;;  %v398_v63 = vmul.f32 %v241_v4, %v241_v4  ;;  %v8389_v62 = vpop.xlane.xlu1 %565 }
 0x1e1   : > { %v1751_v7 = vmul.f32 0.5, %v1750_v18  ;;  %v359_v31 = vmul.f32 %v202_v29, %v202_v29  ;;  %v945_v2 = vsel %vm479_vm0, %v477_v33, 0.0  ;;  %v2702_v23 = vmul.f32 %v4976_v11, %v1357_v42  ;;  %v3606_v52 = vpop.f32.mrf.mxu2 }
 0x1e2   : > { %v1361_v53 = vmul.f32 0.5, %v1360_v10  ;;  %v2741_v9 = vmul.f32 %v4977_v16, %v1747_v61  ;;  %v8392_v1 = vmul.f32 %v8283_v0, %v2542_v54  ;;  %946 = vadd.xlane.f32.xlu0 %v945_v2  ;;  %v708_v51 = vsel %vm479_vm0, %v398_v63, 0.0  ;;  %v3723_v55 = vpop.f32.mrf.mxu3  ;;  %3892 = vst.msk [vmem:[%s6698_s6 + $0x2e8] sm:$0xff] %vm3798_vm13, %v3606_v52 }
 0x1e3   : > { %v1752_v8 = vsub.f32 1.5, %v1751_v7  ;;  %v591_v39 = vsel %vm479_vm0, %v359_v31, 0.0  ;;  %709 = vadd.xlane.f32.xlu2 %v708_v51  ;;  %v2782_v6 = vmul.f32 %v4978_v41, %v2157_v48  ;;  %v8400_v5 = vmax.f32 %v8171_v27, 1e-24  ;;  %4325 = vmatmul.msk.f32.gmra.mxu0 %vm479_vm0, %v2702_v23  ;;  %3931 = vst.msk [vmem:[%s6698_s6 + $0x420] sm:$0xff] %vm3798_vm13, %v3723_v55  ;;  %v4979_v48 = vld [vmem:[%s5174_s23 + $0xc8] sm:$0xff] }
 0x1e4   : > { %v8396_v30 = vpop.eup %4787  ;;  %v1362_v20 = vsub.f32 1.5, %v1361_v53  ;;  %592 = vadd.xlane.f32.xlu1 %v591_v39  ;;  %v8403_v14 = vmax.f32 %v8173_v45, 1e-24  ;;  %vm1755_vm8 = vweird.f32 %v8316_v34  ;;  %v8414_v27 = vmax.f32 %v8186_v57, 1e-24  ;;  %v3486_v45 = vpop.f32.mrf.mxu1  ;;  %v4980_v53 = vld [vmem:[%s5174_s23 + $0x200] sm:$0xff] }
 0x1e5   : > { %v8405_v12 = vpop.eup %4789  ;;  %v1753_v17 = vmul.f32 %v8316_v34, %v1752_v8  ;;  %v2159_v43 = vmul.f32 %v8396_v30, %v8322_v19  ;;  %4364 = vmatmul.msk.f32.gmra.mxu1 %vm479_vm0, %v2741_v9  ;;  %vm1364_vm10 = vweird.f32 %v8258_v44  ;;  %4405 = vmatmul.msk.f32.gmra.mxu2 %vm479_vm0, %v2782_v6  ;;  %4793 = vrsqrt.f32 %v8400_v5  ;;  %3852 = vst.msk [vmem:[%s6698_s6 + $0x1a8] sm:$0xff] %vm3798_vm13, %v3486_v45  ;;  %vm8459_vm15 = vmor %vm1754_vm3, %vm1755_vm8 }
 0x1e6   : > { %v8418_v24 = vpop.eup %4791  ;;  %v1363_v59 = vmul.f32 %v8330_v26, %v1362_v20  ;;  %v1369_v57 = vmul.f32 %v8405_v12, %v8325_v36  ;;  %v2547_v35 = vsel %vm8424_vm9, %v8283_v0, %v8392_v1  ;;  %vm8442_vm11 = vmor %vm1364_vm10, %vm1365_vm7  ;;  %vm2164_vm12 = vweird.f32 %v8322_v19  ;;  %v4981_v20 = vld [vmem:[%s5174_s23 + $0x478] sm:$0xff] }
 0x1e7   : > { %v2160_v44 = vmul.f32 %v8396_v30, %v2159_v43  ;;  %vm1374_vm14 = vweird.f32 %v8325_v36  ;;  %v2549_v50 = vmul.f32 %v8418_v24, %v8328_v3  ;;  %vm2165_vm1 = vweird.f32 %v8396_v30 }
 0x1e8   : > { %v1367_v56 = vsel %vm8442_vm11, %v8330_v26, %v1363_v59  ;;  %v1370_v22 = vmul.f32 %v8405_v12, %v1369_v57  ;;  %vm2554_vm2 = vweird.f32 %v8328_v3  ;;  %4795 = vrsqrt.f32 %v8403_v14  ;;  %v8476_v26 = vpop.xlane.xlu0 %805  ;;  %v8479_v46 = vpop.xlane.xlu2 %568  ;;  %vm8528_vm7 = vmor %vm2164_vm12, %vm2165_vm1  ;;  %v242_v57 = vld [vmem:[%s5174_s23 + $0x268] sm:$0xff] }
 0x1e9   : > { %v1757_v40 = vsel %vm8459_vm15, %v8316_v34, %v1753_v17  ;;  %v2161_v42 = vmul.f32 0.5, %v2160_v44  ;;  %v2550_v21 = vmul.f32 %v8418_v24, %v2549_v50  ;;  %4797 = vrsqrt.f32 %v8414_v27  ;;  %v8482_v10 = vpop.xlane.xlu1 %922  ;;  %v3609_v11 = vpop.f32.mrf.mxu2 }
 0x1ea   : > { %v1371_v38 = vmul.f32 0.5, %v1370_v22  ;;  %vm1375_vm3 = vweird.f32 %v8405_v12  ;;  %v439_v4 = vmul.f32 %v282_v15, %v282_v15  ;;  %v360_v29 = vmul.f32 %v203_v13, %v203_v13  ;;  %v3726_v23 = vpop.f32.mrf.mxu3  ;;  %3893 = vst.msk [vmem:[%s6698_s6 + $0x2f0] sm:$0xff] %vm3798_vm13, %v3609_v11  ;;  %v4982_v22 = vld [vmem:[%s5174_s23 + $0xd0] sm:$0xff] }
 0x1eb   : > { %v2162_v61 = vsub.f32 1.5, %v2161_v42  ;;  %v2551_v54 = vmul.f32 0.5, %v2550_v21  ;;  %v478_v18 = vmul.f32 %v321_v60, %v321_v60  ;;  %v2703_v34 = vmul.f32 %v4979_v48, %v1367_v56  ;;  %v8484_v33 = vpop.eup %4793  ;;  %3932 = vst.msk [vmem:[%s6698_s6 + $0x428] sm:$0xff] %vm3798_vm13, %v3726_v23  ;;  %vm8515_vm5 = vmor %vm1374_vm14, %vm1375_vm3 }
 0x1ec   : > { %v1372_v7 = vsub.f32 1.5, %v1371_v38  ;;  %v831_v63 = vsel %vm479_vm0, %v439_v4, 0.0  ;;  %v594_v31 = vsel %vm479_vm0, %v360_v29, 0.0  ;;  %v2742_v2 = vmul.f32 %v4980_v53, %v1757_v40 }
 0x1ed   : > { %v8490_v16 = vmul.f32 %v8396_v30, %v2162_v61  ;;  %v2552_v9 = vsub.f32 1.5, %v2551_v54  ;;  %vm2555_vm4 = vweird.f32 %v8418_v24  ;;  %v1759_v1 = vmul.f32 %v8484_v33, %v8400_v5  ;;  %832 = vadd.xlane.f32.xlu0 %v831_v63  ;;  %595 = vadd.xlane.f32.xlu2 %v594_v31  ;;  %v3372_v45 = vpop.f32.mrf.mxu0  ;;  %v4983_v61 = vld [vmem:[%s5174_s23 + $0x348] sm:$0xff] }
 0x1ee   : > { %v8497_v8 = vpop.eup %4795  ;;  %v1373_v51 = vmul.f32 %v8405_v12, %v1372_v7  ;;  %v948_v39 = vsel %vm479_vm0, %v478_v18, 0.0  ;;  %4326 = vmatmul.msk.f32.gmra.mxu0 %vm479_vm0, %v2703_v34  ;;  %4365 = vmatmul.msk.f32.gmra.mxu1 %vm479_vm0, %v2742_v2  ;;  %v2821_v41 = vmul.f32 %v4981_v20, %v2547_v35  ;;  %v8505_v6 = vmax.f32 %v8279_v25, 1e-24  ;;  %3814 = vst.msk [vmem:[%s6698_s6 + $0x78] sm:$0xff] %vm3798_vm13, %v3372_v45  ;;  %v3489_v19 = vpop.f32.mrf.mxu1  ;;  %vm8551_vm10 = vmor %vm2554_vm2, %vm2555_vm4  ;;  %v4984_v18 = vld [vmem:[%s5174_s23 + $0x480] sm:$0xff] }
 0x1ef   : > { %v8509_v52 = vpop.eup %4797  ;;  %v2553_v17 = vmul.f32 %v8418_v24, %v2552_v9  ;;  %v1760_v43 = vmul.f32 %v8484_v33, %v1759_v1  ;;  %vm1764_vm6 = vweird.f32 %v8400_v5  ;;  %v2559_v25 = vmul.f32 %v8497_v8, %v8403_v14  ;;  %949 = vadd.xlane.f32.xlu1 %v948_v39  ;;  %3853 = vst.msk [vmem:[%s6698_s6 + $0x1b0] sm:$0xff] %vm3798_vm13, %v3489_v19 }
 0x1f0   : > { %v1377_v32 = vsel %vm8515_vm5, %v8405_v12, %v1373_v51  ;;  %vm1765_vm8 = vweird.f32 %v8484_v33  ;;  %vm2564_vm9 = vweird.f32 %v8403_v14  ;;  %v2169_v59 = vmul.f32 %v8509_v52, %v8414_v27  ;;  %4444 = vmatmul.msk.f32.gmra.mxu3 %vm479_vm0, %v2821_v41  ;;  %v8570_v40 = vpop.xlane.xlu0 %685  ;;  %v4985_v51 = vld [vmem:[%s5174_s23 + $0x208] sm:$0xff] }
 0x1f1   : > { %v2167_v35 = vsel %vm8528_vm7, %v8396_v30, %v8490_v16  ;;  %v1761_v37 = vmul.f32 0.5, %v1760_v43  ;;  %v2560_v44 = vmul.f32 %v8497_v8, %v2559_v25  ;;  %4799 = vrsqrt.f32 %v8505_v6  ;;  %vm8586_vm14 = vmor %vm1764_vm6, %vm1765_vm8 }
 0x1f2   : > { %v2557_v50 = vsel %vm8551_vm10, %v8418_v24, %v2553_v17  ;;  %v2170_v30 = vmul.f32 %v8509_v52, %v2169_v59  ;;  %v8564_v15 = vmax.f32 %v8281_v47, 1e-24  ;;  %v8567_v3 = vmax.f32 %v8288_v49, 1e-24  ;;  %v8575_v47 = vpop.xlane.xlu2 %925  ;;  %v4987_v17 = vld [vmem:[%s5174_s23 + $0x488] sm:$0xff] }
 0x1f3   : > { %v1762_v13 = vsub.f32 1.5, %v1761_v37  ;;  %v2561_v0 = vmul.f32 0.5, %v2560_v44  ;;  %v399_v56 = vmul.f32 %v242_v57, %v242_v57  ;;  %v2704_v60 = vmul.f32 %v4982_v22, %v1377_v32  ;;  %v8580_v38 = vpop.xlane.xlu1 %808 }
 0x1f4   : > { %vm2565_vm11 = vweird.f32 %v8497_v8  ;;  %v2171_v24 = vmul.f32 0.5, %v2170_v30  ;;  %vm2175_vm12 = vweird.f32 %v8509_v52  ;;  %4801 = vrsqrt.f32 %v8564_v15  ;;  %v3612_v7 = vpop.f32.mrf.mxu2 }
 0x1f5   : > { %v1763_v49 = vmul.f32 %v8484_v33, %v1762_v13  ;;  %v2562_v42 = vsub.f32 1.5, %v2561_v0  ;;  %4803 = vrsqrt.f32 %v8567_v3  ;;  %v711_v21 = vsel %vm479_vm0, %v399_v56, 0.0  ;;  %3894 = vst.msk [vmem:[%s6698_s6 + $0x2f8] sm:$0xff] %vm3798_vm13, %v3612_v7  ;;  %vm8614_vm15 = vmor %vm2564_vm9, %vm2565_vm11 }
 0x1f6   : > { %v2172_v29 = vsub.f32 1.5, %v2171_v24  ;;  %712 = vadd.xlane.f32.xlu0 %v711_v21  ;;  %4327 = vmatmul.msk.f32.gmra.mxu0 %vm479_vm0, %v2704_v60  ;;  %v2783_v54 = vmul.f32 %v4983_v61, %v2167_v35  ;;  %v2822_v48 = vmul.f32 %v4984_v18, %v2557_v50  ;;  %v8594_v34 = vmax.f32 %v8376_v28, 1e-24  ;;  %v3375_v28 = vpop.f32.mrf.mxu0 }
 0x1f7   : > { %v8596_v63 = vpop.eup %4799  ;;  %v1767_v5 = vsel %vm8586_vm14, %v8484_v33, %v1763_v49  ;;  %v2563_v31 = vmul.f32 %v8497_v8, %v2562_v42  ;;  %v8603_v53 = vmax.f32 %v8383_v58, 1e-24  ;;  %v8606_v2 = vmax.f32 %v8389_v62, 1e-24  ;;  %3815 = vst.msk [vmem:[%s6698_s6 + $0x80] sm:$0xff] %vm3798_vm13, %v3375_v28  ;;  %v3492_v62 = vpop.f32.mrf.mxu1 }
 0x1f8   : > { %v2173_v33 = vmul.f32 %v8509_v52, %v2172_v29  ;;  %vm2174_vm1 = vweird.f32 %v8414_v27  ;;  %v1379_v58 = vmul.f32 %v8596_v63, %v8505_v6  ;;  %4406 = vmatmul.msk.f32.gmra.mxu2 %vm479_vm0, %v2783_v54  ;;  %4445 = vmatmul.msk.f32.gmra.mxu3 %vm479_vm0, %v2822_v48  ;;  %4805 = vrsqrt.f32 %v8594_v34  ;;  %3854 = vst.msk [vmem:[%s6698_s6 + $0x1b8] sm:$0xff] %vm3798_vm13, %v3492_v62  ;;  %v4988_v62 = vld [vmem:[%s5174_s23 + $0xd8] sm:$0xff] }
 0x1f9   : > { %v2567_v14 = vsel %vm8614_vm15, %v8497_v8, %v2563_v31  ;;  %vm8632_vm2 = vmor %vm2174_vm1, %vm2175_vm12  ;;  %4807 = vrsqrt.f32 %v8603_v53  ;;  %vm1384_vm3 = vweird.f32 %v8505_v6  ;;  %vm2184_vm4 = vweird.f32 %v8564_v15  ;;  %v8664_v36 = vpop.xlane.xlu0 %571 }
 0x1fa   : > { %v8639_v23 = vpop.eup %4801  ;;  %v2177_v16 = vsel %vm8632_vm2, %v8509_v52, %v2173_v33  ;;  %v1380_v9 = vmul.f32 %v8596_v63, %v1379_v58  ;;  %4809 = vrsqrt.f32 %v8606_v2  ;;  %v2743_v39 = vmul.f32 %v4985_v51, %v1767_v5  ;;  %v4986_v52 = vld [vmem:[%s5174_s23 + $0x350] sm:$0xff]  ;;  %v4990_v51 = vld [vmem:[%s5174_s23 + $0x358] sm:$0xff] }
 0x1fb   : > { %v8646_v1 = vpop.eup %4803  ;;  %v2179_v8 = vmul.f32 %v8639_v23, %v8564_v15  ;;  %v2784_v55 = vmul.f32 %v4986_v52, %v2177_v16  ;;  %v2823_v43 = vmul.f32 %v4987_v17, %v2567_v14  ;;  %vm1385_vm5 = vweird.f32 %v8596_v63 }
 0x1fc   : > { %v1381_v20 = vmul.f32 0.5, %v1380_v9  ;;  %v1769_v41 = vmul.f32 %v8646_v1, %v8567_v3  ;;  %vm1774_vm6 = vweird.f32 %v8567_v3  ;;  %4366 = vmatmul.msk.f32.gmra.mxu1 %vm479_vm0, %v2743_v39  ;;  %v8662_v45 = vmax.f32 %v8476_v26, 1e-24  ;;  %v8672_v19 = vpop.xlane.xlu2 %811  ;;  %v8674_v35 = vpop.xlane.xlu1 %688  ;;  %vm8714_vm12 = vmor %vm1384_vm3, %vm1385_vm5  ;;  %v4989_v3 = vld [vmem:[%s5174_s23 + $0x210] sm:$0xff] }
 0x1fd   : > { %v2180_v25 = vmul.f32 %v8639_v23, %v2179_v8  ;;  %vm2185_vm7 = vweird.f32 %v8639_v23  ;;  %vm1775_vm8 = vweird.f32 %v8646_v1  ;;  %vm1784_vm9 = vweird.f32 %v8603_v53  ;;  %v3729_v50 = vpop.f32.mrf.mxu3 }
 0x1fe   : > { %v8666_v32 = vpop.eup %4805  ;;  %v1382_v59 = vsub.f32 1.5, %v1381_v20  ;;  %v1770_v57 = vmul.f32 %v8646_v1, %v1769_v41  ;;  %vm2574_vm10 = vweird.f32 %v8594_v34  ;;  %4811 = vrsqrt.f32 %v8662_v45  ;;  %3933 = vst.msk [vmem:[%s6698_s6 + $0x430] sm:$0xff] %vm3798_vm13, %v3729_v50  ;;  %vm8728_vm14 = vmor %vm2184_vm4, %vm2185_vm7 }
 0x1ff   : > { %v8676_v26 = vpop.eup %4807  ;;  %v2181_v12 = vmul.f32 0.5, %v2180_v25  ;;  %v2569_v37 = vmul.f32 %v8666_v32, %v8594_v34  ;;  %v8683_v44 = vmax.f32 %v8479_v46, 1e-24  ;;  %v8693_v22 = vmax.f32 %v8482_v10, 1e-24  ;;  %v3378_v42 = vpop.f32.mrf.mxu0  ;;  %vm1776_vm15 = vmor %vm1774_vm6, %vm1775_vm8 }
 0x200   : > { %v8685_v30 = vpop.eup %4809  ;;  %v1383_v13 = vmul.f32 %v8596_v63, %v1382_v59  ;;  %v1771_v0 = vmul.f32 0.5, %v1770_v57  ;;  %v1779_v56 = vmul.f32 %v8676_v26, %v8603_v53  ;;  %4407 = vmatmul.msk.f32.gmra.mxu2 %vm479_vm0, %v2784_v55  ;;  %4446 = vmatmul.msk.f32.gmra.mxu3 %vm479_vm0, %v2823_v43  ;;  %v8701_v49 = vmax.f32 %v8570_v40, 1e-24  ;;  %3816 = vst.msk [vmem:[%s6698_s6 + $0x88] sm:$0xff] %vm3798_vm13, %v3378_v42 }
 0x201   : > { %v2182_v46 = vsub.f32 1.5, %v2181_v12  ;;  %v2570_v60 = vmul.f32 %v8666_v32, %v2569_v37  ;;  %v1389_v24 = vmul.f32 %v8685_v30, %v8606_v2  ;;  %vm2575_vm11 = vweird.f32 %v8666_v32 }
 0x202   : > { %v1772_v21 = vsub.f32 1.5, %v1771_v0  ;;  %v1780_v4 = vmul.f32 %v8676_v26, %v1779_v56  ;;  %v8706_v10 = vmax.f32 %v8575_v47, 1e-24  ;;  %4813 = vrsqrt.f32 %v8683_v44  ;;  %vm8759_vm3 = vmor %vm2574_vm10, %vm2575_vm11 }
 0x203   : > { %v2183_v40 = vmul.f32 %v8639_v23, %v2182_v46  ;;  %v2571_v61 = vmul.f32 0.5, %v2570_v60  ;;  %v1390_v54 = vmul.f32 %v8685_v30, %v1389_v24  ;;  %v1387_v47 = vsel %vm8714_vm12, %v8596_v63, %v1383_v13  ;;  %v4991_v13 = vld [vmem:[%s5174_s23 + $0xe0] sm:$0xff]  ;;  %v4993_v60 = vld [vmem:[%s5174_s23 + $0x490] sm:$0xff] }
 0x204   : > { %v1773_v18 = vmul.f32 %v8646_v1, %v1772_v21  ;;  %v1781_v48 = vmul.f32 0.5, %v1780_v4  ;;  %4815 = vrsqrt.f32 %v8693_v22  ;;  %v8734_v7 = vpop.eup %4811  ;;  %vm1785_vm1 = vweird.f32 %v8676_v26 }
 0x205   : > { %v2187_v63 = vsel %vm8728_vm14, %v8639_v23, %v2183_v40  ;;  %v2572_v15 = vsub.f32 1.5, %v2571_v61  ;;  %v1391_v5 = vmul.f32 0.5, %v1390_v54  ;;  %vm1395_vm2 = vweird.f32 %v8685_v30  ;;  %v8751_v23 = vpop.xlane.xlu0 %928  ;;  %v8753_v16 = vpop.xlane.xlu2 %691  ;;  %vm8775_vm4 = vmor %vm1784_vm9, %vm1785_vm1 }
 0x206   : > { %v1777_v31 = vsel %vm1776_vm15, %v8646_v1, %v1773_v18  ;;  %v1782_v28 = vsub.f32 1.5, %v1781_v48  ;;  %v2189_v11 = vmul.f32 %v8734_v7, %v8662_v45  ;;  %v2705_v14 = vmul.f32 %v4988_v62, %v1387_v47  ;;  %v8767_v20 = vpop.xlane.xlu1 %574  ;;  %v3615_v41 = vpop.f32.mrf.mxu2 }
 0x207   : > { %v2573_v33 = vmul.f32 %v8666_v32, %v2572_v15  ;;  %v1392_v58 = vsub.f32 1.5, %v1391_v5  ;;  %v2744_v27 = vmul.f32 %v4989_v3, %v1777_v31  ;;  %v2785_v39 = vmul.f32 %v4990_v51, %v2187_v63  ;;  %3895 = vst.msk [vmem:[%s6698_s6 + $0x300] sm:$0xff] %vm3798_vm13, %v3615_v41  ;;  %v3732_v17 = vpop.f32.mrf.mxu3  ;;  %v4999_v3 = vld [vmem:[%s5174_s23 + $0x368] sm:$0xff] }
 0x208   : > { %v1783_v1 = vmul.f32 %v8676_v26, %v1782_v28  ;;  %v2190_v8 = vmul.f32 %v8734_v7, %v2189_v11  ;;  %4817 = vrsqrt.f32 %v8701_v49  ;;  %v8769_v52 = vpop.eup %4813  ;;  %vm1394_vm5 = vweird.f32 %v8606_v2  ;;  %4328 = vmatmul.msk.f32.gmra.mxu0 %vm479_vm0, %v2705_v14  ;;  %3934 = vst.msk [vmem:[%s6698_s6 + $0x438] sm:$0xff] %vm3798_vm13, %v3732_v17  ;;  %v3495_v57 = vpop.f32.mrf.mxu1  ;;  %v4994_v28 = vld [vmem:[%s5174_s23 + $0x360] sm:$0xff] }
 0x209   : > { %v1393_v55 = vmul.f32 %v8685_v30, %v1392_v58  ;;  %4367 = vmatmul.msk.f32.gmra.mxu1 %vm479_vm0, %v2744_v27  ;;  %4819 = vrsqrt.f32 %v8706_v10  ;;  %v2577_v43 = vsel %vm8759_vm3, %v8666_v32, %v2573_v33  ;;  %vm1396_vm6 = vmor %vm1394_vm5, %vm1395_vm2  ;;  %v1399_v59 = vmul.f32 %v8769_v52, %v8683_v44  ;;  %4408 = vmatmul.msk.f32.gmra.mxu2 %vm479_vm0, %v2785_v39 }
 0x20a   : > { %v8786_v53 = vpop.eup %4815  ;;  %v1787_v2 = vsel %vm8775_vm4, %v8676_v26, %v1783_v1  ;;  %v2191_v25 = vmul.f32 0.5, %v2190_v8  ;;  %vm2194_vm7 = vweird.f32 %v8662_v45  ;;  %vm2195_vm8 = vweird.f32 %v8734_v7  ;;  %3855 = vst.msk [vmem:[%s6698_s6 + $0x1c0] sm:$0xff] %vm3798_vm13, %v3495_v57 }
 0x20b   : > { %v1397_v32 = vsel %vm1396_vm6, %v8685_v30, %v1393_v55  ;;  %v2579_v26 = vmul.f32 %v8786_v53, %v8693_v22  ;;  %v1400_v37 = vmul.f32 %v8769_v52, %v1399_v59  ;;  %v8810_v50 = vmax.f32 %v8580_v38, 1e-24  ;;  %v4992_v30 = vld [vmem:[%s5174_s23 + $0x218] sm:$0xff]  ;;  %vm8830_vm10 = vmor %vm2194_vm7, %vm2195_vm8  ;;  %v4995_v55 = vld [vmem:[%s5174_s23 + $0xe8] sm:$0xff] }
 0x20c   : > { %v2192_v12 = vsub.f32 1.5, %v2191_v25  ;;  %v2706_v0 = vmul.f32 %v4991_v13, %v1397_v32  ;;  %v2745_v46 = vmul.f32 %v4992_v30, %v1787_v2  ;;  %v2824_v24 = vmul.f32 %v4993_v60, %v2577_v43  ;;  %v4996_v2 = vld [vmem:[%s5174_s23 + $0x498] sm:$0xff] }
 0x20d   : > { %v2580_v56 = vmul.f32 %v8786_v53, %v2579_v26  ;;  %v8817_v42 = vmax.f32 %v8664_v36, 1e-24  ;;  %v1401_v29 = vmul.f32 0.5, %v1400_v37  ;;  %vm1404_vm9 = vweird.f32 %v8683_v44 }
 0x20e   : > { %v8819_v21 = vpop.eup %4817  ;;  %v2193_v4 = vmul.f32 %v8734_v7, %v2192_v12  ;;  %4821 = vrsqrt.f32 %v8810_v50  ;;  %vm2584_vm11 = vweird.f32 %v8693_v22  ;;  %4447 = vmatmul.msk.f32.gmra.mxu3 %vm479_vm0, %v2824_v24  ;;  %vm1405_vm12 = vweird.f32 %v8769_v52  ;;  %v8845_v6 = vpop.xlane.xlu0 %814 }
 0x20f   : > { %v8824_v38 = vpop.eup %4819  ;;  %v2581_v36 = vmul.f32 0.5, %v2580_v56  ;;  %v1789_v61 = vmul.f32 %v8819_v21, %v8701_v49  ;;  %4823 = vrsqrt.f32 %v8817_v42  ;;  %v1402_v45 = vsub.f32 1.5, %v1401_v29  ;;  %v8854_v63 = vpop.xlane.xlu2 %577  ;;  %vm8868_vm15 = vmor %vm1404_vm9, %vm1405_vm12 }
 0x210   : > { %v2197_v54 = vsel %vm8830_vm10, %v8734_v7, %v2193_v4  ;;  %v2589_v47 = vmul.f32 %v8824_v38, %v8706_v10  ;;  %vm2585_vm14 = vweird.f32 %v8786_v53  ;;  %4329 = vmatmul.msk.f32.gmra.mxu0 %vm479_vm0, %v2706_v0  ;;  %v8852_v7 = vmax.f32 %v8672_v19, 1e-24  ;;  %v8862_v33 = vpop.xlane.xlu1 %931  ;;  %v3618_v58 = vpop.f32.mrf.mxu2 }
 0x211   : > { %v2582_v18 = vsub.f32 1.5, %v2581_v36  ;;  %v1790_v48 = vmul.f32 %v8819_v21, %v1789_v61  ;;  %4368 = vmatmul.msk.f32.gmra.mxu1 %vm479_vm0, %v2745_v46  ;;  %v1403_v15 = vmul.f32 %v8769_v52, %v1402_v45  ;;  %v8859_v31 = vmax.f32 %v8674_v35, 1e-24  ;;  %3896 = vst.msk [vmem:[%s6698_s6 + $0x308] sm:$0xff] %vm3798_vm13, %v3618_v58  ;;  %vm8886_vm2 = vmor %vm2584_vm11, %vm2585_vm14  ;;  %v4997_v61 = vld [vmem:[%s5174_s23 + $0x220] sm:$0xff] }
 0x212   : > { %v2590_v5 = vmul.f32 %v8824_v38, %v2589_v47  ;;  %v2786_v11 = vmul.f32 %v4994_v28, %v2197_v54  ;;  %vm1794_vm1 = vweird.f32 %v8701_v49  ;;  %4825 = vrsqrt.f32 %v8852_v7  ;;  %v3735_v9 = vpop.f32.mrf.mxu3  ;;  %v3381_v1 = vpop.f32.mrf.mxu0 }
 0x213   : > { %v2583_v62 = vmul.f32 %v8786_v53, %v2582_v18  ;;  %v1791_v14 = vmul.f32 0.5, %v1790_v48  ;;  %v1407_v44 = vsel %vm8868_vm15, %v8769_v52, %v1403_v15  ;;  %vm2594_vm3 = vweird.f32 %v8706_v10  ;;  %3935 = vst.msk [vmem:[%s6698_s6 + $0x440] sm:$0xff] %vm3798_vm13, %v3735_v9  ;;  %v3498_v41 = vpop.f32.mrf.mxu1  ;;  %v4998_v18 = vld [vmem:[%s5174_s23 + $0x4a0] sm:$0xff] }
 0x214   : > { %v8877_v35 = vpop.eup %4821  ;;  %v2591_v27 = vmul.f32 0.5, %v2590_v5  ;;  %4827 = vrsqrt.f32 %v8859_v31  ;;  %4409 = vmatmul.msk.f32.gmra.mxu2 %vm479_vm0, %v2786_v11  ;;  %vm1795_vm4 = vweird.f32 %v8819_v21  ;;  %vm2595_vm5 = vweird.f32 %v8824_v38  ;;  %3817 = vst.msk [vmem:[%s6698_s6 + $0x90] sm:$0xff] %vm3798_vm13, %v3381_v1 }
 0x215   : > { %v8893_v8 = vpop.eup %4823  ;;  %v2587_v22 = vsel %vm8886_vm2, %v8786_v53, %v2583_v62  ;;  %v1792_v51 = vsub.f32 1.5, %v1791_v14  ;;  %v2199_v39 = vmul.f32 %v8877_v35, %v8810_v50  ;;  %v2707_v17 = vmul.f32 %v4995_v55, %v1407_v44  ;;  %3856 = vst.msk [vmem:[%s6698_s6 + $0x1c8] sm:$0xff] %vm3798_vm13, %v3498_v41  ;;  %vm8931_vm6 = vmor %vm1794_vm1, %vm1795_vm4 }
 0x216   : > { %v2592_v52 = vsub.f32 1.5, %v2591_v27  ;;  %v1409_v34 = vmul.f32 %v8893_v8, %v8817_v42  ;;  %v2825_v25 = vmul.f32 %v4996_v2, %v2587_v22  ;;  %v8913_v59 = vmax.f32 %v8751_v23, 1e-24  ;;  %vm8949_vm9 = vmor %vm2594_vm3, %vm2595_vm5  ;;  %v5001_v23 = vld [vmem:[%s5174_s23 + $0x228] sm:$0xff] }
 0x217   : > { %v1793_v53 = vmul.f32 %v8819_v21, %v1792_v51  ;;  %v2200_v43 = vmul.f32 %v8877_v35, %v2199_v39  ;;  %v8920_v26 = vmax.f32 %v8753_v16, 1e-24  ;;  %v8923_v12 = vmax.f32 %v8767_v20, 1e-24  ;;  %v8956_v30 = vpop.xlane.xlu0 %694 }
 0x218   : > { %v2593_v57 = vmul.f32 %v8824_v38, %v2592_v52  ;;  %v1410_v32 = vmul.f32 %v8893_v8, %v1409_v34  ;;  %v8925_v37 = vpop.eup %4825  ;;  %vm2204_vm7 = vweird.f32 %v8810_v50  ;;  %vm1414_vm8 = vweird.f32 %v8817_v42  ;;  %4330 = vmatmul.msk.f32.gmra.mxu0 %vm479_vm0, %v2707_v17  ;;  %4448 = vmatmul.msk.f32.gmra.mxu3 %vm479_vm0, %v2825_v25  ;;  %v8958_v46 = vpop.xlane.xlu2 %934 }
 0x219   : > { %v2201_v13 = vmul.f32 0.5, %v2200_v43  ;;  %4829 = vrsqrt.f32 %v8913_v59  ;;  %v1797_v49 = vsel %vm8931_vm6, %v8819_v21, %v1793_v53  ;;  %vm2205_vm10 = vweird.f32 %v8877_v35 }
 0x21a   : > { %v8940_v16 = vpop.eup %4827  ;;  %v1411_v0 = vmul.f32 0.5, %v1410_v32  ;;  %v2209_v56 = vmul.f32 %v8925_v37, %v8852_v7  ;;  %v2597_v10 = vsel %vm8949_vm9, %v8824_v38, %v2593_v57  ;;  %4831 = vrsqrt.f32 %v8920_v26  ;;  %v8969_v29 = vpop.xlane.xlu1 %817  ;;  %vm8981_vm14 = vmor %vm2204_vm7, %vm2205_vm10  ;;  %v5000_v32 = vld [vmem:[%s5174_s23 + $0xf0] sm:$0xff] }
 0x21b   : > { %v2202_v60 = vsub.f32 1.5, %v2201_v13  ;;  %v1799_v24 = vmul.f32 %v8940_v16, %v8859_v31  ;;  %vm2214_vm11 = vweird.f32 %v8852_v7  ;;  %4833 = vrsqrt.f32 %v8923_v12  ;;  %v3621_v40 = vpop.f32.mrf.mxu2 }
 0x21c   : > { %v1412_v21 = vsub.f32 1.5, %v1411_v0  ;;  %v2210_v4 = vmul.f32 %v8925_v37, %v2209_v56  ;;  %vm1804_vm12 = vweird.f32 %v8859_v31  ;;  %v2746_v54 = vmul.f32 %v4997_v61, %v1797_v49  ;;  %3897 = vst.msk [vmem:[%s6698_s6 + $0x310] sm:$0xff] %vm3798_vm13, %v3621_v40  ;;  %v3384_v5 = vpop.f32.mrf.mxu0  ;;  %v3501_v28 = vpop.f32.mrf.mxu1 }
 0x21d   : > { %v2203_v36 = vmul.f32 %v8877_v35, %v2202_v60  ;;  %v1800_v38 = vmul.f32 %v8940_v16, %v1799_v24  ;;  %vm1415_vm15 = vweird.f32 %v8893_v8  ;;  %v2826_v48 = vmul.f32 %v4998_v18, %v2597_v10  ;;  %3818 = vst.msk [vmem:[%s6698_s6 + $0x98] sm:$0xff] %vm3798_vm13, %v3384_v5 }
 0x21e   : > { %v2211_v47 = vmul.f32 0.5, %v2210_v4  ;;  %v8988_v15 = vmax.f32 %v8845_v6, 1e-24  ;;  %v1413_v58 = vmul.f32 %v8893_v8, %v1412_v21  ;;  %4369 = vmatmul.msk.f32.gmra.mxu1 %vm479_vm0, %v2746_v54  ;;  %v8998_v62 = vmax.f32 %v8854_v63, 1e-24  ;;  %3857 = vst.msk [vmem:[%s6698_s6 + $0x1d0] sm:$0xff] %vm3798_vm13, %v3501_v28  ;;  %vm9022_vm3 = vmor %vm1414_vm8, %vm1415_vm15 }
 0x21f   : > { %v8990_v11 = vpop.eup %4829  ;;  %v2207_v50 = vsel %vm8981_vm14, %v8877_v35, %v2203_v36  ;;  %v1801_v19 = vmul.f32 0.5, %v1800_v38  ;;  %vm2215_vm1 = vweird.f32 %v8925_v37  ;;  %vm1805_vm2 = vweird.f32 %v8940_v16 }
 0x220   : > { %v2212_v6 = vsub.f32 1.5, %v2211_v47  ;;  %v2599_v14 = vmul.f32 %v8990_v11, %v8913_v59  ;;  %v9008_v35 = vpop.eup %4831  ;;  %v2787_v27 = vmul.f32 %v4999_v3, %v2207_v50  ;;  %4449 = vmatmul.msk.f32.gmra.mxu3 %vm479_vm0, %v2826_v48  ;;  %4835 = vrsqrt.f32 %v8988_v15  ;;  %vm9038_vm5 = vmor %vm2214_vm11, %vm2215_vm1  ;;  %v5004_v3 = vld [vmem:[%s5174_s23 + $0x230] sm:$0xff] }
 0x221   : > { %v1802_v44 = vsub.f32 1.5, %v1801_v19  ;;  %v9014_v63 = vmax.f32 %v8862_v33, 1e-24  ;;  %v9016_v9 = vpop.eup %4833  ;;  %vm2604_vm4 = vweird.f32 %v8913_v59  ;;  %v1809_v33 = vmul.f32 %v9008_v35, %v8920_v26  ;;  %vm9054_vm6 = vmor %vm1804_vm12, %vm1805_vm2  ;;  %v9060_v17 = vpop.xlane.xlu0 %580  ;;  %v5003_v19 = vld [vmem:[%s5174_s23 + $0xf8] sm:$0xff]  ;;  %v5012_v59 = vld [vmem:[%s5174_s23 + $0x108] sm:$0xff] }
 0x222   : > { %v2213_v22 = vmul.f32 %v8925_v37, %v2212_v6  ;;  %v2600_v51 = vmul.f32 %v8990_v11, %v2599_v14  ;;  %v1417_v39 = vsel %vm9022_vm3, %v8893_v8, %v1413_v58  ;;  %v1419_v52 = vmul.f32 %v9016_v9, %v8923_v12  ;;  %4410 = vmatmul.msk.f32.gmra.mxu2 %vm479_vm0, %v2787_v27  ;;  %v9062_v53 = vpop.xlane.xlu2 %820  ;;  %v9070_v2 = vpop.xlane.xlu1 %697 }
 0x223   : > { %v1803_v41 = vmul.f32 %v8940_v16, %v1802_v44  ;;  %4837 = vrsqrt.f32 %v8998_v62  ;;  %v1810_v55 = vmul.f32 %v9008_v35, %v1809_v33  ;;  %vm1814_vm7 = vweird.f32 %v8920_v26 }
 0x224   : > { %v2217_v8 = vsel %vm9038_vm5, %v8925_v37, %v2213_v22  ;;  %v2601_v34 = vmul.f32 0.5, %v2600_v51  ;;  %vm2605_vm8 = vweird.f32 %v8990_v11  ;;  %v1420_v31 = vmul.f32 %v9016_v9, %v1419_v52  ;;  %v3738_v49 = vpop.f32.mrf.mxu3 }
 0x225   : > { %v1807_v43 = vsel %vm9054_vm6, %v8940_v16, %v1803_v41  ;;  %4839 = vrsqrt.f32 %v9014_v63  ;;  %v1811_v57 = vmul.f32 0.5, %v1810_v55  ;;  %v2708_v37 = vmul.f32 %v5000_v32, %v1417_v39  ;;  %v5002_v16 = vld [vmem:[%s5174_s23 + $0x370] sm:$0xff]  ;;  %3936 = vst.msk [vmem:[%s6698_s6 + $0x448] sm:$0xff] %vm3798_vm13, %v3738_v49  ;;  %vm9102_vm12 = vmor %vm2604_vm4, %vm2605_vm8 }
 0x226   : > { %v2602_v25 = vsub.f32 1.5, %v2601_v34  ;;  %v2747_v13 = vmul.f32 %v5001_v23, %v1807_v43  ;;  %v9074_v20 = vpop.eup %4835  ;;  %v1421_v0 = vmul.f32 0.5, %v1420_v31  ;;  %v2788_v56 = vmul.f32 %v5002_v16, %v2217_v8  ;;  %v3387_v40 = vpop.f32.mrf.mxu0 }
 0x227   : > { %v9078_v10 = vmax.f32 %v8956_v30, 1e-24  ;;  %v9081_v60 = vmax.f32 %v8958_v46, 1e-24  ;;  %v1812_v21 = vsub.f32 1.5, %v1811_v57  ;;  %vm1815_vm9 = vweird.f32 %v9008_v35  ;;  %4331 = vmatmul.msk.f32.gmra.mxu0 %vm479_vm0, %v2708_v37  ;;  %3819 = vst.msk [vmem:[%s6698_s6 + $0xa0] sm:$0xff] %vm3798_vm13, %v3387_v40 }
 0x228   : > { %v2603_v24 = vmul.f32 %v8990_v11, %v2602_v25  ;;  %v2219_v4 = vmul.f32 %v9074_v20, %v8988_v15  ;;  %4370 = vmatmul.msk.f32.gmra.mxu1 %vm479_vm0, %v2747_v13  ;;  %v1422_v36 = vsub.f32 1.5, %v1421_v0  ;;  %vm1424_vm10 = vweird.f32 %v8923_v12  ;;  %vm9120_vm15 = vmor %vm1814_vm7, %vm1815_vm9 }
 0x229   : > { %v9091_v30 = vpop.eup %4837  ;;  %vm1425_vm11 = vweird.f32 %v9016_v9  ;;  %4841 = vrsqrt.f32 %v9078_v10  ;;  %v1813_v38 = vmul.f32 %v9008_v35, %v1812_v21  ;;  %vm1434_vm14 = vweird.f32 %v8998_v62 }
 0x22a   : > { %v2220_v61 = vmul.f32 %v9074_v20, %v2219_v4  ;;  %v1429_v54 = vmul.f32 %v9091_v30, %v8998_v62  ;;  %v2607_v47 = vsel %vm9102_vm12, %v8990_v11, %v2603_v24  ;;  %v1423_v18 = vmul.f32 %v9016_v9, %v1422_v36  ;;  %4411 = vmatmul.msk.f32.gmra.mxu2 %vm479_vm0, %v2788_v56  ;;  %vm1426_vm1 = vmor %vm1424_vm10, %vm1425_vm11  ;;  %v5006_v56 = vld [vmem:[%s5174_s23 + $0x100] sm:$0xff] }
 0x22b   : > { %v9111_v45 = vpop.eup %4839  ;;  %4843 = vrsqrt.f32 %v9081_v60  ;;  %v9128_v48 = vmax.f32 %v8969_v29, 1e-24  ;;  %v1817_v5 = vsel %vm9120_vm15, %v9008_v35, %v1813_v38  ;;  %vm2225_vm2 = vweird.f32 %v9074_v20  ;;  %v938_v14 = vpop.xlane.xlu0 %937 }
 0x22c   : > { %v2221_v26 = vmul.f32 0.5, %v2220_v61  ;;  %v1430_v28 = vmul.f32 %v9091_v30, %v1429_v54  ;;  %v2609_v11 = vmul.f32 %v9111_v45, %v9014_v63  ;;  %v1427_v29 = vsel %vm1426_vm1, %v9016_v9, %v1423_v18  ;;  %v9146_v35 = vpop.xlane.xlu2 %700  ;;  %v5005_v9 = vld [vmem:[%s5174_s23 + $0x4a8] sm:$0xff]  ;;  %v9158_v33 = vpop.xlane.xlu1 %583 }
 0x22d   : > { %vm1435_vm3 = vweird.f32 %v9091_v30  ;;  %4845 = vrsqrt.f32 %v9128_v48  ;;  %v2709_v6 = vmul.f32 %v5003_v19, %v1427_v29  ;;  %v2748_v27 = vmul.f32 %v5004_v3, %v1817_v5  ;;  %v3624_v39 = vpop.f32.mrf.mxu2 }
 0x22e   : > { %v2222_v50 = vsub.f32 1.5, %v2221_v26  ;;  %v1431_v58 = vmul.f32 0.5, %v1430_v28  ;;  %v2610_v12 = vmul.f32 %v9111_v45, %v2609_v11  ;;  %v2827_v1 = vmul.f32 %v5005_v9, %v2607_v47  ;;  %3898 = vst.msk [vmem:[%s6698_s6 + $0x318] sm:$0xff] %vm3798_vm13, %v3624_v39  ;;  %v3741_v7 = vpop.f32.mrf.mxu3  ;;  %v3504_v34 = vpop.f32.mrf.mxu1  ;;  %vm9196_vm9 = vmor %vm1434_vm14, %vm1435_vm3  ;;  %v5009_v39 = vld [vmem:[%s5174_s23 + $0x238] sm:$0xff] }
 0x22f   : > { %v9148_v44 = vpop.eup %4841  ;;  %v9153_v22 = vmax.f32 %v9060_v17, 1e-24  ;;  %v9156_v51 = vmax.f32 %v9062_v53, 1e-24  ;;  %4332 = vmatmul.msk.f32.gmra.mxu0 %vm479_vm0, %v2709_v6  ;;  %vm2224_vm4 = vweird.f32 %v8988_v15  ;;  %vm2614_vm5 = vweird.f32 %v9014_v63  ;;  %3937 = vst.msk [vmem:[%s6698_s6 + $0x450] sm:$0xff] %vm3798_vm13, %v3741_v7  ;;  %v5007_v63 = vld [vmem:[%s5174_s23 + $0x378] sm:$0xff] }
 0x230   : > { %v2223_v42 = vmul.f32 %v9074_v20, %v2222_v50  ;;  %v1432_v41 = vsub.f32 1.5, %v1431_v58  ;;  %v2611_v52 = vmul.f32 0.5, %v2610_v12  ;;  %v1819_v8 = vmul.f32 %v9148_v44, %v9078_v10  ;;  %4371 = vmatmul.msk.f32.gmra.mxu1 %vm479_vm0, %v2748_v27  ;;  %4450 = vmatmul.msk.f32.gmra.mxu3 %vm479_vm0, %v2827_v1  ;;  %vm9178_vm7 = vmor %vm2224_vm4, %vm2225_vm2  ;;  %3858 = vst.msk [vmem:[%s6698_s6 + $0x1d8] sm:$0xff] %vm3798_vm13, %v3504_v34 }
 0x231   : > { %v9166_v55 = vpop.eup %4843  ;;  %vm1824_vm6 = vweird.f32 %v9078_v10  ;;  %4847 = vrsqrt.f32 %v9153_v22  ;;  %vm2615_vm8 = vweird.f32 %v9111_v45  ;;  %v9204_v37 = vmax.f32 %v9070_v2, 1e-24 }
 0x232   : > { %v1433_v15 = vmul.f32 %v9091_v30, %v1432_v41  ;;  %v2612_v53 = vsub.f32 1.5, %v2611_v52  ;;  %v1820_v43 = vmul.f32 %v9148_v44, %v1819_v8  ;;  %v2227_v25 = vsel %vm9178_vm7, %v9074_v20, %v2223_v42  ;;  %vm2616_vm10 = vmor %vm2614_vm5, %vm2615_vm8 }
 0x233   : > { %v9187_v31 = vpop.eup %4845  ;;  %v2619_v32 = vmul.f32 %v9166_v55, %v9081_v60  ;;  %4849 = vrsqrt.f32 %v9156_v51  ;;  %vm1825_vm11 = vweird.f32 %v9148_v44  ;;  %vm2624_vm12 = vweird.f32 %v9081_v60 }
 0x234   : > { %v1437_v23 = vsel %vm9196_vm9, %v9091_v30, %v1433_v15  ;;  %v2613_v62 = vmul.f32 %v9111_v45, %v2612_v53  ;;  %v1821_v13 = vmul.f32 0.5, %v1820_v43  ;;  %v2229_v49 = vmul.f32 %v9187_v31, %v9128_v48  ;;  %v5008_v30 = vld [vmem:[%s5174_s23 + $0x4b0] sm:$0xff]  ;;  %vm9238_vm15 = vmor %vm1824_vm6, %vm1825_vm11  ;;  %v5011_v15 = vld [vmem:[%s5174_s23 + $0x4b8] sm:$0xff] }
 0x235   : > { %v2620_v2 = vmul.f32 %v9166_v55, %v2619_v32  ;;  %4851 = vrsqrt.f32 %v9204_v37  ;;  %v2710_v24 = vmul.f32 %v5006_v56, %v1437_v23  ;;  %v2789_v40 = vmul.f32 %v5007_v63, %v2227_v25 }
 0x236   : > { %v2617_v20 = vsel %vm2616_vm10, %v9111_v45, %v2613_v62  ;;  %v1822_v0 = vsub.f32 1.5, %v1821_v13  ;;  %v2230_v16 = vmul.f32 %v9187_v31, %v2229_v49  ;;  %v9225_v46 = vmax.f32 %v938_v14, 1e-24  ;;  %v824_v45 = vpop.xlane.xlu0 %823  ;;  %v587_v26 = vpop.xlane.xlu2 %586 }
 0x237   : > { %v9221_v21 = vpop.eup %4847  ;;  %v2621_v4 = vmul.f32 0.5, %v2620_v2  ;;  %v2828_v36 = vmul.f32 %v5008_v30, %v2617_v20  ;;  %vm2625_vm14 = vweird.f32 %v9166_v55  ;;  %4333 = vmatmul.msk.f32.gmra.mxu0 %vm479_vm0, %v2710_v24  ;;  %vm2235_vm1 = vweird.f32 %v9187_v31  ;;  %4412 = vmatmul.msk.f32.gmra.mxu2 %vm479_vm0, %v2789_v40  ;;  %v941_v28 = vpop.xlane.xlu1 %940 }
 0x238   : > { %v1823_v38 = vmul.f32 %v9148_v44, %v1822_v0  ;;  %v2231_v61 = vmul.f32 0.5, %v2230_v16  ;;  %v1439_v54 = vmul.f32 %v9221_v21, %v9153_v22  ;;  %4853 = vrsqrt.f32 %v9225_v46  ;;  %v3627_v58 = vpop.f32.mrf.mxu2  ;;  %v3744_v12 = vpop.f32.mrf.mxu3  ;;  %vm9267_vm4 = vmor %vm2624_vm12, %vm2625_vm14 }
 0x239   : > { %v9232_v47 = vpop.eup %4849  ;;  %v2622_v18 = vsub.f32 1.5, %v2621_v4  ;;  %4451 = vmatmul.msk.f32.gmra.mxu3 %vm479_vm0, %v2828_v36  ;;  %v9247_v5 = vmax.f32 %v9146_v35, 1e-24  ;;  %vm2234_vm2 = vweird.f32 %v9128_v48  ;;  %vm2244_vm3 = vweird.f32 %v9156_v51  ;;  %3899 = vst.msk [vmem:[%s6698_s6 + $0x320] sm:$0xff] %vm3798_vm13, %v3627_v58  ;;  %v3390_v14 = vpop.f32.mrf.mxu0 }
 0x23a   : > { %v1827_v10 = vsel %vm9238_vm15, %v9148_v44, %v1823_v38  ;;  %v2232_v11 = vsub.f32 1.5, %v2231_v61  ;;  %v1440_v29 = vmul.f32 %v9221_v21, %v1439_v54  ;;  %v2239_v50 = vmul.f32 %v9232_v47, %v9156_v51  ;;  %3938 = vst.msk [vmem:[%s6698_s6 + $0x458] sm:$0xff] %vm3798_vm13, %v3744_v12  ;;  %vm9282_vm5 = vmor %vm2234_vm2, %vm2235_vm1 }
 0x23b   : > { %v9255_v19 = vpop.eup %4851  ;;  %v2623_v6 = vmul.f32 %v9166_v55, %v2622_v18  ;;  %4855 = vrsqrt.f32 %v9247_v5  ;;  %vm1445_vm6 = vweird.f32 %v9221_v21  ;;  %v9288_v1 = vmax.f32 %v9158_v33, 1e-24  ;;  %3820 = vst.msk [vmem:[%s6698_s6 + $0xa8] sm:$0xff] %vm3798_vm13, %v3390_v14  ;;  %v5010_v33 = vld [vmem:[%s5174_s23 + $0x380] sm:$0xff] }
 0x23c   : > { %v2233_v44 = vmul.f32 %v9187_v31, %v2232_v11  ;;  %v1441_v3 = vmul.f32 0.5, %v1440_v29  ;;  %v2240_v48 = vmul.f32 %v9232_v47, %v2239_v50  ;;  %v1829_v27 = vmul.f32 %v9255_v19, %v9204_v37  ;;  %v3507_v41 = vpop.f32.mrf.mxu1 }
 0x23d   : > { %v2627_v9 = vsel %vm9267_vm4, %v9166_v55, %v2623_v6  ;;  %v2749_v42 = vmul.f32 %v5009_v39, %v1827_v10  ;;  %3859 = vst.msk [vmem:[%s6698_s6 + $0x1e0] sm:$0xff] %vm3798_vm13, %v3507_v41  ;;  %vm2245_vm7 = vweird.f32 %v9232_v47  ;;  %4857 = vrsqrt.f32 %v9288_v1  ;;  %v5014_v10 = vld [vmem:[%s5174_s23 + $0x388] sm:$0xff] }
 0x23e   : > { %v2237_v52 = vsel %vm9282_vm5, %v9187_v31, %v2233_v44  ;;  %v1442_v8 = vsub.f32 1.5, %v1441_v3  ;;  %v2241_v7 = vmul.f32 0.5, %v2240_v48  ;;  %v1830_v34 = vmul.f32 %v9255_v19, %v1829_v27  ;;  %v9299_v55 = vpop.eup %4853  ;;  %vm9336_vm11 = vmor %vm2244_vm3, %vm2245_vm7  ;;  %v5019_v27 = vld [vmem:[%s5174_s23 + $0x390] sm:$0xff] }
 0x23f   : > { %4372 = vmatmul.msk.f32.gmra.mxu1 %vm479_vm0, %v2749_v42  ;;  %v2790_v17 = vmul.f32 %v5010_v33, %v2237_v52  ;;  %v2829_v53 = vmul.f32 %v5011_v15, %v2627_v9  ;;  %v2629_v57 = vmul.f32 %v9299_v55, %v9225_v46  ;;  %vm1444_vm8 = vweird.f32 %v9153_v22 }
 0x240   : > { %v1443_v43 = vmul.f32 %v9221_v21, %v1442_v8  ;;  %v2242_v31 = vsub.f32 1.5, %v2241_v7  ;;  %v1831_v25 = vmul.f32 0.5, %v1830_v34  ;;  %v9314_v23 = vmax.f32 %v824_v45, 1e-24  ;;  %vm9322_vm9 = vmor %vm1444_vm8, %vm1445_vm6 }
 0x241   : > { %v9309_v32 = vpop.eup %4855  ;;  %4413 = vmatmul.msk.f32.gmra.mxu2 %vm479_vm0, %v2790_v17  ;;  %4452 = vmatmul.msk.f32.gmra.mxu3 %vm479_vm0, %v2829_v53  ;;  %v9316_v62 = vmax.f32 %v587_v26, 1e-24  ;;  %v9318_v13 = vmax.f32 %v941_v28, 1e-24  ;;  %vm1835_vm10 = vweird.f32 %v9255_v19  ;;  %v2630_v22 = vmul.f32 %v9299_v55, %v2629_v57  ;;  %v704_v0 = vpop.xlane.xlu0 %703  ;;  %v5013_v26 = vld [vmem:[%s5174_s23 + $0x240] sm:$0xff]  ;;  %v5015_v57 = vld [vmem:[%s5174_s23 + $0x248] sm:$0xff] }
 0x242   : > { %v2243_v2 = vmul.f32 %v9232_v47, %v2242_v31  ;;  %v1832_v20 = vsub.f32 1.5, %v1831_v25  ;;  %v1447_v16 = vsel %vm9322_vm9, %v9221_v21, %v1443_v43  ;;  %vm1834_vm12 = vweird.f32 %v9204_v37  ;;  %v944_v4 = vpop.xlane.xlu2 %943  ;;  %v827_v40 = vpop.xlane.xlu1 %826 }
 0x243   : > { %v1839_v24 = vmul.f32 %v9309_v32, %v9247_v5  ;;  %4859 = vrsqrt.f32 %v9314_v23  ;;  %v2631_v51 = vmul.f32 0.5, %v2630_v22  ;;  %v3630_v30 = vpop.f32.mrf.mxu2  ;;  %v9349_v37 = vpop.eup %4857  ;;  %vm1836_vm14 = vmor %vm1834_vm12, %vm1835_vm10  ;;  %vm2634_vm15 = vweird.f32 %v9225_v46 }
 0x244   : > { %v2247_v21 = vsel %vm9336_vm11, %v9232_v47, %v2243_v2  ;;  %v1833_v63 = vmul.f32 %v9255_v19, %v1832_v20  ;;  %4861 = vrsqrt.f32 %v9316_v62  ;;  %3900 = vst.msk [vmem:[%s6698_s6 + $0x328] sm:$0xff] %vm3798_vm13, %v3630_v30  ;;  %vm1844_vm1 = vweird.f32 %v9247_v5 }
 0x245   : > { %v1840_v36 = vmul.f32 %v9309_v32, %v1839_v24  ;;  %4863 = vrsqrt.f32 %v9318_v13  ;;  %v2632_v61 = vsub.f32 1.5, %v2631_v51  ;;  %v1449_v54 = vmul.f32 %v9349_v37, %v9288_v1  ;;  %v3393_v45 = vpop.f32.mrf.mxu0  ;;  %v3510_v29 = vpop.f32.mrf.mxu1  ;;  %v5017_v24 = vld [vmem:[%s5174_s23 + $0x110] sm:$0xff] }
 0x246   : > { %v1837_v38 = vsel %vm1836_vm14, %v9255_v19, %v1833_v63  ;;  %v2711_v18 = vmul.f32 %v5012_v59, %v1447_v16  ;;  %v2791_v11 = vmul.f32 %v5014_v10, %v2247_v21  ;;  %3821 = vst.msk [vmem:[%s6698_s6 + $0xb0] sm:$0xff] %vm3798_vm13, %v3393_v45  ;;  %vm2635_vm2 = vweird.f32 %v9299_v55 }
 0x247   : > { %v1841_v47 = vmul.f32 0.5, %v1840_v36  ;;  %v2750_v28 = vmul.f32 %v5013_v26, %v1837_v38  ;;  %v1450_v50 = vmul.f32 %v9349_v37, %v1449_v54  ;;  %vm1454_vm3 = vweird.f32 %v9288_v1  ;;  %3860 = vst.msk [vmem:[%s6698_s6 + $0x1e8] sm:$0xff] %vm3798_vm13, %v3510_v29  ;;  %vm9395_vm7 = vmor %vm2634_vm15, %vm2635_vm2  ;;  %v5016_v1 = vld [vmem:[%s5174_s23 + $0x4c0] sm:$0xff] }
 0x248   : > { %v9370_v58 = vmax.f32 %v704_v0, 1e-24  ;;  %v2633_v19 = vmul.f32 %v9299_v55, %v2632_v61  ;;  %vm1845_vm4 = vweird.f32 %v9309_v32  ;;  %4334 = vmatmul.msk.f32.gmra.mxu0 %vm479_vm0, %v2711_v18  ;;  %v9380_v14 = vmax.f32 %v944_v4, 1e-24 }
 0x249   : > { %v9374_v12 = vpop.eup %4859  ;;  %v1842_v6 = vsub.f32 1.5, %v1841_v47  ;;  %4373 = vmatmul.msk.f32.gmra.mxu1 %vm479_vm0, %v2750_v28  ;;  %v1451_v44 = vmul.f32 0.5, %v1450_v50  ;;  %vm2254_vm5 = vweird.f32 %v9314_v23  ;;  %vm1464_vm6 = vweird.f32 %v9316_v62  ;;  %4414 = vmatmul.msk.f32.gmra.mxu2 %vm479_vm0, %v2791_v11  ;;  %vm9409_vm8 = vmor %vm1844_vm1, %vm1845_vm4 }
 0x24a   : > { %v9382_v35 = vpop.eup %4861  ;;  %v2249_v3 = vmul.f32 %v9374_v12, %v9314_v23  ;;  %4865 = vrsqrt.f32 %v9370_v58  ;;  %v9403_v39 = vmax.f32 %v827_v40, 1e-24  ;;  %vm1455_vm9 = vweird.f32 %v9349_v37 }
 0x24b   : > { %v9389_v48 = vpop.eup %4863  ;;  %v1843_v9 = vmul.f32 %v9309_v32, %v1842_v6  ;;  %v1459_v60 = vmul.f32 %v9382_v35, %v9316_v62  ;;  %v1452_v46 = vsub.f32 1.5, %v1451_v44  ;;  %v590_v8 = vpop.xlane.xlu0 %589  ;;  %v2637_v7 = vsel %vm9395_vm7, %v9299_v55, %v2633_v19  ;;  %vm9434_vm11 = vmor %vm1454_vm3, %vm1455_vm9  ;;  %v5018_v19 = vld [vmem:[%s5174_s23 + $0x118] sm:$0xff] }
 0x24c   : > { %v2250_v41 = vmul.f32 %v9374_v12, %v2249_v3  ;;  %v2639_v52 = vmul.f32 %v9389_v48, %v9318_v13  ;;  %4867 = vrsqrt.f32 %v9380_v14  ;;  %v830_v33 = vpop.xlane.xlu2 %829  ;;  %v3747_v17 = vpop.f32.mrf.mxu3  ;;  %vm2255_vm10 = vweird.f32 %v9374_v12 }
 0x24d   : > { %v1847_v5 = vsel %vm9409_vm8, %v9309_v32, %v1843_v9  ;;  %v1460_v34 = vmul.f32 %v9382_v35, %v1459_v60  ;;  %v1453_v15 = vmul.f32 %v9349_v37, %v1452_v46  ;;  %v707_v43 = vpop.xlane.xlu1 %706  ;;  %3939 = vst.msk [vmem:[%s6698_s6 + $0x460] sm:$0xff] %vm3798_vm13, %v3747_v17  ;;  %vm1465_vm12 = vweird.f32 %v9382_v35  ;;  %vm9466_vm15 = vmor %vm2254_vm5, %vm2255_vm10  ;;  %v5020_v46 = vld [vmem:[%s5174_s23 + $0x4c8] sm:$0xff] }
 0x24e   : > { %v2251_v53 = vmul.f32 0.5, %v2250_v41  ;;  %v2640_v55 = vmul.f32 %v9389_v48, %v2639_v52  ;;  %4869 = vrsqrt.f32 %v9403_v39  ;;  %v2751_v32 = vmul.f32 %v5015_v57, %v1847_v5  ;;  %v3396_v49 = vpop.f32.mrf.mxu0  ;;  %vm9478_vm2 = vmor %vm1464_vm6, %vm1465_vm12 }
 0x24f   : > { %v1461_v25 = vmul.f32 0.5, %v1460_v34  ;;  %v1457_v2 = vsel %vm9434_vm11, %v9349_v37, %v1453_v15  ;;  %v2830_v0 = vmul.f32 %v5016_v1, %v2637_v7  ;;  %3822 = vst.msk [vmem:[%s6698_s6 + $0xb8] sm:$0xff] %vm3798_vm13, %v3396_v49  ;;  %v9451_v21 = vmax.f32 %v590_v8, 1e-24 }
 0x250   : > { %v2252_v20 = vsub.f32 1.5, %v2251_v53  ;;  %v2641_v22 = vmul.f32 0.5, %v2640_v55  ;;  %v9447_v16 = vpop.eup %4865  ;;  %v2712_v4 = vmul.f32 %v5017_v24, %v1457_v2  ;;  %v9453_v63 = vmax.f32 %v830_v33, 1e-24 }
 0x251   : > { %v1462_v56 = vsub.f32 1.5, %v1461_v25  ;;  %4374 = vmatmul.msk.f32.gmra.mxu1 %vm479_vm0, %v2751_v32  ;;  %vm2645_vm14 = vweird.f32 %v9389_v48  ;;  %v1849_v30 = vmul.f32 %v9447_v16, %v9370_v58  ;;  %4453 = vmatmul.msk.f32.gmra.mxu3 %vm479_vm0, %v2830_v0  ;;  %vm2644_vm1 = vweird.f32 %v9318_v13 }
 0x252   : > { %v2253_v51 = vmul.f32 %v9374_v12, %v2252_v20  ;;  %v2642_v40 = vsub.f32 1.5, %v2641_v22  ;;  %v9460_v37 = vpop.eup %4867  ;;  %4335 = vmatmul.msk.f32.gmra.mxu0 %vm479_vm0, %v2712_v4  ;;  %4871 = vrsqrt.f32 %v9451_v21  ;;  %vm1854_vm3 = vweird.f32 %v9370_v58  ;;  %v3633_v45 = vpop.f32.mrf.mxu2  ;;  %vm9497_vm4 = vmor %vm2644_vm1, %vm2645_vm14 }
 0x253   : > { %v1463_v38 = vmul.f32 %v9382_v35, %v1462_v56  ;;  %v1850_v54 = vmul.f32 %v9447_v16, %v1849_v30  ;;  %v2649_v13 = vmul.f32 %v9460_v37, %v9380_v14  ;;  %4873 = vrsqrt.f32 %v9453_v63  ;;  %3901 = vst.msk [vmem:[%s6698_s6 + $0x330] sm:$0xff] %vm3798_vm13, %v3633_v45  ;;  %v5022_v30 = vld [vmem:[%s5174_s23 + $0x4d0] sm:$0xff] }
 0x254   : > { %v2643_v23 = vmul.f32 %v9389_v48, %v2642_v40  ;;  %v9487_v47 = vpop.eup %4869  ;;  %v2257_v62 = vsel %vm9466_vm15, %v9374_v12, %v2253_v51  ;;  %v9502_v26 = vmax.f32 %v707_v43, 1e-24  ;;  %vm1855_vm5 = vweird.f32 %v9447_v16 }
 0x255   : > { %v1467_v59 = vsel %vm9478_vm2, %v9382_v35, %v1463_v38  ;;  %v1851_v10 = vmul.f32 0.5, %v1850_v54  ;;  %v2650_v11 = vmul.f32 %v9460_v37, %v2649_v13  ;;  %v2259_v29 = vmul.f32 %v9487_v47, %v9403_v39  ;;  %v947_v50 = vpop.xlane.xlu0 %946  ;;  %v3750_v12 = vpop.f32.mrf.mxu3  ;;  %vm9538_vm8 = vmor %vm1854_vm3, %vm1855_vm5  ;;  %v5023_v54 = vld [vmem:[%s5174_s23 + $0x398] sm:$0xff] }
 0x256   : > { %v2647_v28 = vsel %vm9497_vm4, %v9389_v48, %v2643_v23  ;;  %vm2654_vm6 = vweird.f32 %v9380_v14  ;;  %4875 = vrsqrt.f32 %v9502_v26  ;;  %v2713_v6 = vmul.f32 %v5018_v19, %v1467_v59  ;;  %v710_v35 = vpop.xlane.xlu2 %709  ;;  %3940 = vst.msk [vmem:[%s6698_s6 + $0x468] sm:$0xff] %vm3798_vm13, %v3750_v12 }
 0x257   : > { %v1852_v44 = vsub.f32 1.5, %v1851_v10  ;;  %v2651_v3 = vmul.f32 0.5, %v2650_v11  ;;  %v2260_v48 = vmul.f32 %v9487_v47, %v2259_v29  ;;  %v2792_v9 = vmul.f32 %v5019_v27, %v2257_v62  ;;  %v593_v60 = vpop.xlane.xlu1 %592 }
 0x258   : > { %v9520_v42 = vpop.eup %4871  ;;  %vm2655_vm7 = vweird.f32 %v9460_v37  ;;  %v2831_v41 = vmul.f32 %v5020_v46, %v2647_v28  ;;  %v9524_v52 = vmax.f32 %v947_v50, 1e-24  ;;  %v9526_v8 = vmax.f32 %v710_v35, 1e-24 }
 0x259   : > { %v1853_v7 = vmul.f32 %v9447_v16, %v1852_v44  ;;  %v2652_v5 = vsub.f32 1.5, %v2651_v3  ;;  %v2261_v34 = vmul.f32 0.5, %v2260_v48  ;;  %v1469_v33 = vmul.f32 %v9520_v42, %v9451_v21  ;;  %4415 = vmatmul.msk.f32.gmra.mxu2 %vm479_vm0, %v2792_v9  ;;  %v9532_v15 = vpop.eup %4873  ;;  %vm9562_vm11 = vmor %vm2654_vm6, %vm2655_vm7 }
 0x25a   : > { %v3513_v17 = vpop.f32.mrf.mxu1  ;;  %vm2264_vm9 = vweird.f32 %v9403_v39  ;;  %vm2265_vm10 = vweird.f32 %v9487_v47  ;;  %4336 = vmatmul.msk.f32.gmra.mxu0 %vm479_vm0, %v2713_v6  ;;  %4454 = vmatmul.msk.f32.gmra.mxu3 %vm479_vm0, %v2831_v41  ;;  %4877 = vrsqrt.f32 %v9524_v52  ;;  %v9547_v55 = vmax.f32 %v593_v60, 1e-24 }
 0x25b   : > { %3861 = vst.msk [vmem:[%s6698_s6 + $0x1f0] sm:$0xff] %vm3798_vm13, %v3513_v17  ;;  %v1857_v58 = vsel %vm9538_vm8, %v9447_v16, %v1853_v7  ;;  %v2653_v43 = vmul.f32 %v9460_v37, %v2652_v5  ;;  %v2262_v31 = vsub.f32 1.5, %v2261_v34  ;;  %v1470_v25 = vmul.f32 %v9520_v42, %v1469_v33  ;;  %vm9581_vm15 = vmor %vm2264_vm9, %vm2265_vm10  ;;  %v5021_v16 = vld [vmem:[%s5174_s23 + $0x250] sm:$0xff]  ;;  %v5024_v17 = vld [vmem:[%s5174_s23 + $0x120] sm:$0xff] }
 0x25c   : > { %v9556_v57 = vpop.eup %4875  ;;  %vm1474_vm12 = vweird.f32 %v9451_v21  ;;  %v2269_v49 = vmul.f32 %v9532_v15, %v9453_v63  ;;  %vm2274_vm14 = vweird.f32 %v9453_v63  ;;  %4879 = vrsqrt.f32 %v9526_v8 }
 0x25d   : > { %v2657_v2 = vsel %vm9562_vm11, %v9460_v37, %v2653_v43  ;;  %v2263_v14 = vmul.f32 %v9487_v47, %v2262_v31  ;;  %v1471_v20 = vmul.f32 0.5, %v1470_v25  ;;  %v1859_v22 = vmul.f32 %v9556_v57, %v9502_v26 }
 0x25e   : > { %vm1475_vm1 = vweird.f32 %v9520_v42  ;;  %v2270_v0 = vmul.f32 %v9532_v15, %v2269_v49  ;;  %4881 = vrsqrt.f32 %v9547_v55  ;;  %v2752_v56 = vmul.f32 %v5021_v16, %v1857_v58  ;;  %v3636_v24 = vpop.f32.mrf.mxu2  ;;  %v5026_v58 = vld [vmem:[%s5174_s23 + $0x3a0] sm:$0xff] }
 0x25f   : > { %v3753_v4 = vpop.f32.mrf.mxu3  ;;  %v2267_v39 = vsel %vm9581_vm15, %v9487_v47, %v2263_v14  ;;  %v1472_v51 = vsub.f32 1.5, %v1471_v20  ;;  %v1860_v40 = vmul.f32 %v9556_v57, %v1859_v22  ;;  %v2832_v37 = vmul.f32 %v5022_v30, %v2657_v2  ;;  %3902 = vst.msk [vmem:[%s6698_s6 + $0x338] sm:$0xff] %vm3798_vm13, %v3636_v24  ;;  %vm9623_vm5 = vmor %vm1474_vm12, %vm1475_vm1 }
 0x260   : > { %v833_v36 = vpop.xlane.xlu0 %832  ;;  %v596_v38 = vpop.xlane.xlu2 %595  ;;  %v2271_v23 = vmul.f32 0.5, %v2270_v0  ;;  %4375 = vmatmul.msk.f32.gmra.mxu1 %vm479_vm0, %v2752_v56  ;;  %v2793_v13 = vmul.f32 %v5023_v54, %v2267_v39  ;;  %3941 = vst.msk [vmem:[%s6698_s6 + $0x470] sm:$0xff] %vm3798_vm13, %v3753_v4  ;;  %vm1864_vm2 = vweird.f32 %v9502_v26  ;;  %vm2275_vm3 = vweird.f32 %v9532_v15 }
 0x261   : > { %v9596_v61 = vpop.eup %4877  ;;  %v9600_v45 = vmax.f32 %v833_v36, 1e-24  ;;  %v9602_v47 = vmax.f32 %v596_v38, 1e-24  ;;  %v1473_v62 = vmul.f32 %v9520_v42, %v1472_v51  ;;  %v1861_v59 = vmul.f32 0.5, %v1860_v40  ;;  %v3399_v10 = vpop.f32.mrf.mxu0  ;;  %vm9646_vm7 = vmor %vm2274_vm14, %vm2275_vm3  ;;  %v5028_v38 = vld [vmem:[%s5174_s23 + $0x4d8] sm:$0xff] }
 0x262   : > { %v2659_v18 = vmul.f32 %v9596_v61, %v9524_v52  ;;  %v950_v28 = vpop.xlane.xlu1 %949  ;;  %v9610_v11 = vpop.eup %4879  ;;  %v2272_v29 = vsub.f32 1.5, %v2271_v23  ;;  %vm2664_vm4 = vweird.f32 %v9524_v52  ;;  %4416 = vmatmul.msk.f32.gmra.mxu2 %vm479_vm0, %v2793_v13  ;;  %4455 = vmatmul.msk.f32.gmra.mxu3 %vm479_vm0, %v2832_v37  ;;  %3823 = vst.msk [vmem:[%s6698_s6 + $0xc0] sm:$0xff] %vm3798_vm13, %v3399_v10  ;;  %vm1865_vm6 = vweird.f32 %v9556_v57 }
 0x263   : > { %4883 = vrsqrt.f32 %v9600_v45  ;;  %v3516_v50 = vpop.f32.mrf.mxu1  ;;  %v1862_v19 = vsub.f32 1.5, %v1861_v59  ;;  %v1869_v35 = vmul.f32 %v9610_v11, %v9526_v8  ;;  %v1477_v21 = vsel %vm9623_vm5, %v9520_v42, %v1473_v62  ;;  %vm1866_vm8 = vmor %vm1864_vm2, %vm1865_vm6  ;;  %v5029_v59 = vld [vmem:[%s5174_s23 + $0x128] sm:$0xff] }
 0x264   : > { %v2660_v6 = vmul.f32 %v9596_v61, %v2659_v18  ;;  %3862 = vst.msk [vmem:[%s6698_s6 + $0x1f8] sm:$0xff] %vm3798_vm13, %v3516_v50  ;;  %v9633_v44 = vpop.eup %4881  ;;  %v2273_v3 = vmul.f32 %v9532_v15, %v2272_v29  ;;  %4885 = vrsqrt.f32 %v9602_v47  ;;  %v9640_v48 = vmax.f32 %v950_v28, 1e-24 }
 0x265   : > { %v1863_v9 = vmul.f32 %v9556_v57, %v1862_v19  ;;  %v1870_v42 = vmul.f32 %v9610_v11, %v1869_v35  ;;  %v1479_v46 = vmul.f32 %v9633_v44, %v9547_v55  ;;  %vm2665_vm9 = vweird.f32 %v9596_v61 }
 0x266   : > { %v2661_v60 = vmul.f32 0.5, %v2660_v6  ;;  %v2277_v41 = vsel %vm9646_vm7, %v9532_v15, %v2273_v3  ;;  %vm1874_vm10 = vweird.f32 %v9526_v8  ;;  %4887 = vrsqrt.f32 %v9640_v48  ;;  %v5025_v15 = vld [vmem:[%s5174_s23 + $0x258] sm:$0xff]  ;;  %vm9683_vm12 = vmor %vm2664_vm4, %vm2665_vm9 }
 0x267   : > { %v1867_v63 = vsel %vm1866_vm8, %v9556_v57, %v1863_v9  ;;  %v1871_v5 = vmul.f32 0.5, %v1870_v42  ;;  %v1480_v34 = vmul.f32 %v9633_v44, %v1479_v46  ;;  %vm1875_vm11 = vweird.f32 %v9610_v11 }
 0x268   : > { %v2662_v7 = vsub.f32 1.5, %v2661_v60  ;;  %v2714_v26 = vmul.f32 %v5024_v17, %v1477_v21  ;;  %v2753_v53 = vmul.f32 %v5025_v15, %v1867_v63  ;;  %v2794_v43 = vmul.f32 %v5026_v58, %v2277_v41  ;;  %v3639_v25 = vpop.f32.mrf.mxu2  ;;  %vm1876_vm15 = vmor %vm1874_vm10, %vm1875_vm11  ;;  %v5030_v21 = vld [vmem:[%s5174_s23 + $0x3a8] sm:$0xff]  ;;  %v5031_v41 = vld [vmem:[%s5174_s23 + $0x130] sm:$0xff] }
 0x269   : > { %v9666_v33 = vpop.eup %4883  ;;  %v713_v31 = vpop.xlane.xlu0 %712  ;;  %v1872_v57 = vsub.f32 1.5, %v1871_v5  ;;  %v1481_v49 = vmul.f32 0.5, %v1480_v34  ;;  %3903 = vst.msk [vmem:[%s6698_s6 + $0x340] sm:$0xff] %vm3798_vm13, %v3639_v25  ;;  %vm1485_vm14 = vweird.f32 %v9633_v44  ;;  %vm1484_vm1 = vweird.f32 %v9547_v55  ;;  %v5027_v55 = vld [vmem:[%s5174_s23 + $0x260] sm:$0xff]  ;;  %v5033_v15 = vld [vmem:[%s5174_s23 + $0x268] sm:$0xff] }
 0x26a   : > { %v2663_v32 = vmul.f32 %v9596_v61, %v2662_v7  ;;  %v2279_v2 = vmul.f32 %v9666_v33, %v9600_v45  ;;  %v9677_v14 = vpop.eup %4885  ;;  %4337 = vmatmul.msk.f32.gmra.mxu0 %vm479_vm0, %v2714_v26  ;;  %4376 = vmatmul.msk.f32.gmra.mxu1 %vm479_vm0, %v2753_v53  ;;  %v9690_v22 = vmax.f32 %v713_v31, 1e-24  ;;  %vm1486_vm2 = vmor %vm1484_vm1, %vm1485_vm14  ;;  %vm2285_vm3 = vweird.f32 %v9666_v33  ;;  %v5032_v7 = vld [vmem:[%s5174_s23 + $0x4e0] sm:$0xff] }
 0x26b   : > { %v3402_v1 = vpop.f32.mrf.mxu0  ;;  %v3519_v0 = vpop.f32.mrf.mxu1  ;;  %v1873_v52 = vmul.f32 %v9610_v11, %v1872_v57  ;;  %v1482_v56 = vsub.f32 1.5, %v1481_v49  ;;  %4417 = vmatmul.msk.f32.gmra.mxu2 %vm479_vm0, %v2794_v43  ;;  %v1489_v39 = vmul.f32 %v9677_v14, %v9602_v47  ;;  %vm2284_vm4 = vweird.f32 %v9600_v45 }
 0x26c   : > { %v2667_v16 = vsel %vm9683_vm12, %v9596_v61, %v2663_v32  ;;  %v2280_v24 = vmul.f32 %v9666_v33, %v2279_v2  ;;  %3824 = vst.msk [vmem:[%s6698_s6 + $0xc8] sm:$0xff] %vm3798_vm13, %v3402_v1  ;;  %v4888_v4 = vpop.eup %4887  ;;  %4889 = vrsqrt.f32 %v9690_v22  ;;  %vm9724_vm5 = vmor %vm2284_vm4, %vm2285_vm3  ;;  %vm1494_vm6 = vweird.f32 %v9602_v47 }
 0x26d   : > { %3863 = vst.msk [vmem:[%s6698_s6 + $0x200] sm:$0xff] %vm3798_vm13, %v3519_v0  ;;  %v1877_v51 = vsel %vm1876_vm15, %v9610_v11, %v1873_v52  ;;  %v1483_v40 = vmul.f32 %v9633_v44, %v1482_v56  ;;  %v2669_v37 = vmul.f32 %v4888_v4, %v9640_v48  ;;  %v1490_v8 = vmul.f32 %v9677_v14, %v1489_v39 }
 0x26e   : > { %v2281_v30 = vmul.f32 0.5, %v2280_v24  ;;  %v2754_v36 = vmul.f32 %v5027_v55, %v1877_v51  ;;  %v2833_v61 = vmul.f32 %v5028_v38, %v2667_v16  ;;  %vm1495_vm7 = vweird.f32 %v9677_v14 }
 0x26f   : > { %v1487_v23 = vsel %vm1486_vm2, %v9633_v44, %v1483_v40  ;;  %v2670_v13 = vmul.f32 %v4888_v4, %v2669_v37  ;;  %v1491_v62 = vmul.f32 0.5, %v1490_v8  ;;  %vm2675_vm8 = vweird.f32 %v4888_v4  ;;  %vm1496_vm9 = vmor %vm1494_vm6, %vm1495_vm7 }
 0x270   : > { %v2282_v54 = vsub.f32 1.5, %v2281_v30  ;;  %v2715_v18 = vmul.f32 %v5029_v59, %v1487_v23  ;;  %4456 = vmatmul.msk.f32.gmra.mxu3 %vm479_vm0, %v2833_v61  ;;  %vm2674_vm10 = vweird.f32 %v9640_v48  ;;  %vm1884_vm14 = vweird.f32 %v9690_v22 }
 0x271   : > { %v2671_v10 = vmul.f32 0.5, %v2670_v13  ;;  %v1492_v50 = vsub.f32 1.5, %v1491_v62  ;;  %vm2676_vm11 = vmor %vm2674_vm10, %vm2675_vm8 }
 0x272   : > { %v2283_v28 = vmul.f32 %v9666_v33, %v2282_v54  ;;  %v4890_v11 = vpop.eup %4889  ;;  %4338 = vmatmul.msk.f32.gmra.mxu0 %vm479_vm0, %v2715_v18  ;;  %4377 = vmatmul.msk.f32.gmra.mxu1 %vm479_vm0, %v2754_v36 }
 0x273   : > { %v3756_v12 = vpop.f32.mrf.mxu3  ;;  %v3405_v19 = vpop.f32.mrf.mxu0  ;;  %v2672_v6 = vsub.f32 1.5, %v2671_v10  ;;  %v1879_v35 = vmul.f32 %v4890_v11, %v9690_v22  ;;  %v1493_v44 = vmul.f32 %v9677_v14, %v1492_v50  ;;  %vm1885_vm12 = vweird.f32 %v4890_v11 }
 0x274   : > { %v2287_v45 = vsel %vm9724_vm5, %v9666_v33, %v2283_v28  ;;  %3942 = vst.msk [vmem:[%s6698_s6 + $0x478] sm:$0xff] %vm3798_vm13, %v3756_v12  ;;  %vm1886_vm15 = vmor %vm1884_vm14, %vm1885_vm12 }
 0x275   : > { %3825 = vst.msk [vmem:[%s6698_s6 + $0xd0] sm:$0xff] %vm3798_vm13, %v3405_v19  ;;  %v2795_v3 = vmul.f32 %v5030_v21, %v2287_v45  ;;  %v2673_v27 = vmul.f32 %v4888_v4, %v2672_v6  ;;  %v1880_v9 = vmul.f32 %v4890_v11, %v1879_v35  ;;  %v1497_v60 = vsel %vm1496_vm9, %v9677_v14, %v1493_v44 }
 0x276   : > { %v2716_v63 = vmul.f32 %v5031_v41, %v1497_v60 }
 0x277   : > { %4418 = vmatmul.msk.f32.gmra.mxu2 %vm479_vm0, %v2795_v3  ;;  %v2677_v42 = vsel %vm2676_vm11, %v4888_v4, %v2673_v27  ;;  %v1881_v46 = vmul.f32 0.5, %v1880_v9 }
 0x278   : > { %v2834_v47 = vmul.f32 %v5032_v7, %v2677_v42 }
 0x279   : > { %v1882_v5 = vsub.f32 1.5, %v1881_v46  ;;  %v3522_v34 = vpop.f32.mrf.mxu1 }
 0x27a   : > { %4339 = vmatmul.msk.f32.gmra.mxu0 %vm479_vm0, %v2716_v63  ;;  %4457 = vmatmul.msk.f32.gmra.mxu3 %vm479_vm0, %v2834_v47  ;;  %3864 = vst.msk [vmem:[%s6698_s6 + $0x208] sm:$0xff] %vm3798_vm13, %v3522_v34 }
 0x27b   : > { %v3642_v48 = vpop.f32.mrf.mxu2  ;;  %v3759_v33 = vpop.f32.mrf.mxu3  ;;  %v1883_v17 = vmul.f32 %v4890_v11, %v1882_v5 }
 0x27c   : > { %3904 = vst.msk [vmem:[%s6698_s6 + $0x348] sm:$0xff] %vm3798_vm13, %v3642_v48 }
 0x27d   : > { %3943 = vst.msk [vmem:[%s6698_s6 + $0x480] sm:$0xff] %vm3798_vm13, %v3759_v33  ;;  %v1887_v26 = vsel %vm1886_vm15, %v4890_v11, %v1883_v17 }
 0x27e   : > { %v2755_v53 = vmul.f32 %v5033_v15, %v1887_v26 }
 0x280   : > { %4378 = vmatmul.msk.f32.gmra.mxu1 %vm479_vm0, %v2755_v53 }
 0x283   : > { %v3645_v58 = vpop.f32.mrf.mxu2  ;;  %v3762_v43 = vpop.f32.mrf.mxu3 }
 0x284   : > { %3905 = vst.msk [vmem:[%s6698_s6 + $0x350] sm:$0xff] %vm3798_vm13, %v3645_v58 }
 0x285   : > { %3944 = vst.msk [vmem:[%s6698_s6 + $0x488] sm:$0xff] %vm3798_vm13, %v3762_v43  ;;  %v3408_v31 = vpop.f32.mrf.mxu0 }
 0x286   : > { %v3525_v25 = vpop.f32.mrf.mxu1  ;;  %3826 = vst.msk [vmem:[%s6698_s6 + $0xd8] sm:$0xff] %vm3798_vm13, %v3408_v31 }
 0x287   : > { %3865 = vst.msk [vmem:[%s6698_s6 + $0x210] sm:$0xff] %vm3798_vm13, %v3525_v25 }
 0x28c   : > { %v3648_v32 = vpop.f32.mrf.mxu2 }
 0x28d   : > { %3906 = vst.msk [vmem:[%s6698_s6 + $0x358] sm:$0xff] %vm3798_vm13, %v3648_v32  ;;  %v3411_v57 = vpop.f32.mrf.mxu0 }
 0x28e   : > { %v3528_v49 = vpop.f32.mrf.mxu1  ;;  %3827 = vst.msk [vmem:[%s6698_s6 + $0xe0] sm:$0xff] %vm3798_vm13, %v3411_v57 }
 0x28f   : > { %3866 = vst.msk [vmem:[%s6698_s6 + $0x218] sm:$0xff] %vm3798_vm13, %v3528_v49 }
 0x291   : > { %v3765_v2 = vpop.f32.mrf.mxu3 }
 0x292   : > { %3945 = vst.msk [vmem:[%s6698_s6 + $0x490] sm:$0xff] %vm3798_vm13, %v3765_v2 }
 0x295   : > { %v3414_v14 = vpop.f32.mrf.mxu0 }
 0x296   : > { %3828 = vst.msk [vmem:[%s6698_s6 + $0xe8] sm:$0xff] %vm3798_vm13, %v3414_v14 }
 0x297   : > { %v3651_v20 = vpop.f32.mrf.mxu2 }
 0x298   : > { %3907 = vst.msk [vmem:[%s6698_s6 + $0x360] sm:$0xff] %vm3798_vm13, %v3651_v20 }
 0x29b   : > { %v3768_v22 = vpop.f32.mrf.mxu3  ;;  %v3531_v1 = vpop.f32.mrf.mxu1 }
 0x29c   : > { %3946 = vst.msk [vmem:[%s6698_s6 + $0x498] sm:$0xff] %vm3798_vm13, %v3768_v22 }
 0x29d   : > { %3867 = vst.msk [vmem:[%s6698_s6 + $0x220] sm:$0xff] %vm3798_vm13, %v3531_v1 }
 0x2a3   : > { %v3771_v0 = vpop.f32.mrf.mxu3 }
 0x2a4   : > { %3947 = vst.msk [vmem:[%s6698_s6 + $0x4a0] sm:$0xff] %vm3798_vm13, %v3771_v0  ;;  %v3417_v16 = vpop.f32.mrf.mxu0 }
 0x2a5   : > { %v3534_v52 = vpop.f32.mrf.mxu1  ;;  %v3654_v56 = vpop.f32.mrf.mxu2  ;;  %3829 = vst.msk [vmem:[%s6698_s6 + $0xf0] sm:$0xff] %vm3798_vm13, %v3417_v16 }
 0x2a6   : > { %3908 = vst.msk [vmem:[%s6698_s6 + $0x368] sm:$0xff] %vm3798_vm13, %v3654_v56 }
 0x2a7   : > { %3868 = vst.msk [vmem:[%s6698_s6 + $0x228] sm:$0xff] %vm3798_vm13, %v3534_v52 }
 0x2ac   : > { %v3420_v24 = vpop.f32.mrf.mxu0 }
 0x2ad   : > { %v3657_v4 = vpop.f32.mrf.mxu2  ;;  %3830 = vst.msk [vmem:[%s6698_s6 + $0xf8] sm:$0xff] %vm3798_vm13, %v3420_v24  ;;  %v3537_v39 = vpop.f32.mrf.mxu1 }
 0x2ae   : > { %3909 = vst.msk [vmem:[%s6698_s6 + $0x370] sm:$0xff] %vm3798_vm13, %v3657_v4 }
 0x2af   : > { %3869 = vst.msk [vmem:[%s6698_s6 + $0x230] sm:$0xff] %vm3798_vm13, %v3537_v39 }
 0x2b3   : > { %v3774_v51 = vpop.f32.mrf.mxu3 }
 0x2b4   : > { %3948 = vst.msk [vmem:[%s6698_s6 + $0x4a8] sm:$0xff] %vm3798_vm13, %v3774_v51  ;;  %v3423_v40 = vpop.f32.mrf.mxu0 }
 0x2b5   : > { %3831 = vst.msk [vmem:[%s6698_s6 + $0x100] sm:$0xff] %vm3798_vm13, %v3423_v40 }
 0x2ba   : > { %v3660_v30 = vpop.f32.mrf.mxu2 }
 0x2bb   : > { %3910 = vst.msk [vmem:[%s6698_s6 + $0x378] sm:$0xff] %vm3798_vm13, %v3660_v30 }
 0x2bc   : > { %v3777_v37 = vpop.f32.mrf.mxu3  ;;  %v3540_v8 = vpop.f32.mrf.mxu1 }
 0x2bd   : > { %3949 = vst.msk [vmem:[%s6698_s6 + $0x4b0] sm:$0xff] %vm3798_vm13, %v3777_v37 }
 0x2be   : > { %3870 = vst.msk [vmem:[%s6698_s6 + $0x238] sm:$0xff] %vm3798_vm13, %v3540_v8 }
 0x2c4   : > { %v3663_v55 = vpop.f32.mrf.mxu2  ;;  %v3780_v36 = vpop.f32.mrf.mxu3 }
 0x2c5   : > { %3911 = vst.msk [vmem:[%s6698_s6 + $0x380] sm:$0xff] %vm3798_vm13, %v3663_v55  ;;  %v3426_v38 = vpop.f32.mrf.mxu0 }
 0x2c6   : > { %3950 = vst.msk [vmem:[%s6698_s6 + $0x4b8] sm:$0xff] %vm3798_vm13, %v3780_v36  ;;  %v3543_v61 = vpop.f32.mrf.mxu1 }
 0x2c7   : > { %3832 = vst.msk [vmem:[%s6698_s6 + $0x108] sm:$0xff] %vm3798_vm13, %v3426_v38 }
 0x2c8   : > { %3871 = vst.msk [vmem:[%s6698_s6 + $0x240] sm:$0xff] %vm3798_vm13, %v3543_v61 }
 0x2cc   : > { %v3666_v23 = vpop.f32.mrf.mxu2 }
 0x2cd   : > { %3912 = vst.msk [vmem:[%s6698_s6 + $0x388] sm:$0xff] %vm3798_vm13, %v3666_v23 }
 0x2ce   : > { %v3546_v54 = vpop.f32.mrf.mxu1 }
 0x2cf   : > { %3872 = vst.msk [vmem:[%s6698_s6 + $0x248] sm:$0xff] %vm3798_vm13, %v3546_v54  ;;  %v3429_v13 = vpop.f32.mrf.mxu0 }
 0x2d0   : > { %3833 = vst.msk [vmem:[%s6698_s6 + $0x110] sm:$0xff] %vm3798_vm13, %v3429_v13 }
 0x2d4   : > { %v3783_v62 = vpop.f32.mrf.mxu3 }
 0x2d5   : > { %3951 = vst.msk [vmem:[%s6698_s6 + $0x4c0] sm:$0xff] %vm3798_vm13, %v3783_v62 }
 0x2d7   : > { %v3432_v59 = vpop.f32.mrf.mxu0 }
 0x2d8   : > { %3834 = vst.msk [vmem:[%s6698_s6 + $0x118] sm:$0xff] %vm3798_vm13, %v3432_v59 }
 0x2dc   : > { %v3669_v18 = vpop.f32.mrf.mxu2 }
 0x2dd   : > { %3913 = vst.msk [vmem:[%s6698_s6 + $0x390] sm:$0xff] %vm3798_vm13, %v3669_v18  ;;  %v3786_v28 = vpop.f32.mrf.mxu3  ;;  %v3549_v10 = vpop.f32.mrf.mxu1 }
 0x2de   : > { %3952 = vst.msk [vmem:[%s6698_s6 + $0x4c8] sm:$0xff] %vm3798_vm13, %v3786_v28 }
 0x2df   : > { %3873 = vst.msk [vmem:[%s6698_s6 + $0x250] sm:$0xff] %vm3798_vm13, %v3549_v10 }
 0x2e5   : > { %v3672_v11 = vpop.f32.mrf.mxu2  ;;  %v3789_v29 = vpop.f32.mrf.mxu3 }
 0x2e6   : > { %3914 = vst.msk [vmem:[%s6698_s6 + $0x398] sm:$0xff] %vm3798_vm13, %v3672_v11 }
 0x2e7   : > { %3953 = vst.msk [vmem:[%s6698_s6 + $0x4d0] sm:$0xff] %vm3798_vm13, %v3789_v29  ;;  %v3435_v50 = vpop.f32.mrf.mxu0  ;;  %v3552_v12 = vpop.f32.mrf.mxu1 }
 0x2e8   : > { %3835 = vst.msk [vmem:[%s6698_s6 + $0x120] sm:$0xff] %vm3798_vm13, %v3435_v50 }
 0x2e9   : > { %3874 = vst.msk [vmem:[%s6698_s6 + $0x258] sm:$0xff] %vm3798_vm13, %v3552_v12 }
 0x2ee   : > { %v3675_v19 = vpop.f32.mrf.mxu2 }
 0x2ef   : > { %3915 = vst.msk [vmem:[%s6698_s6 + $0x3a0] sm:$0xff] %vm3798_vm13, %v3675_v19  ;;  %v3438_v45 = vpop.f32.mrf.mxu0  ;;  %v3555_v6 = vpop.f32.mrf.mxu1 }
 0x2f0   : > { %3836 = vst.msk [vmem:[%s6698_s6 + $0x128] sm:$0xff] %vm3798_vm13, %v3438_v45 }
 0x2f1   : > { %3875 = vst.msk [vmem:[%s6698_s6 + $0x260] sm:$0xff] %vm3798_vm13, %v3555_v6 }
 0x2f3   : > { %v3792_v35 = vpop.f32.mrf.mxu3 }
 0x2f4   : > { %3954 = vst.msk [vmem:[%s6698_s6 + $0x4d8] sm:$0xff] %vm3798_vm13, %v3792_v35 }
 0x2f7   : > { %v3441_v44 = vpop.f32.mrf.mxu0 }
 0x2f8   : > { %3837 = vst.msk [vmem:[%s6698_s6 + $0x130] sm:$0xff] %vm3798_vm13, %v3441_v44 }
 0x2fa   : > { %v3678_v21 = vpop.f32.mrf.mxu2 }
 0x2fb   : > { %3916 = vst.msk [vmem:[%s6698_s6 + $0x3a8] sm:$0xff] %vm3798_vm13, %v3678_v21  ;;  %3962 = sbr.rel (!%p5162_p4) target bundleno = 832 (0x340), region = 32 }
 0x2fd   : > { %v3795_v3 = vpop.f32.mrf.mxu3  ;;  %v3558_v27 = vpop.f32.mrf.mxu1 }
 0x2fe   : > { %3955 = vst.msk [vmem:[%s6698_s6 + $0x4e0] sm:$0xff] %vm3798_vm13, %v3795_v3 }
 0x2ff   : > { %3876 = vst.msk [vmem:[%s6698_s6 + $0x268] sm:$0xff] %vm3798_vm13, %v3558_v27 }
 0x300   : > { %s10275_s7 = smov (!%p3965_p8, %s3964_s7), 157 }
 0x301   : > { %s4458_s15 = sshll.u32 %s10275_s7, 3 }
 0x302   : > { %p4461_p9 = scmp.eq.s32.totalorder %s4458_s15, 0 }
 0x303   : > { %s9869_s19 = sshrl.u32 (!%p4461_p9), %s10275_s7, 5 }
 0x304   : > { %3973 = sbr.rel (%p4461_p9) target bundleno = 832 (0x340), region = 36  ;;  %p4462_p10 = scmp.le.s32.totalorder (!%p4461_p9), %s9869_s19, 0 }
 0x309   : > { %4252 = sbr.rel (%p4462_p10) target bundleno = 815 (0x32f), region = 112  ;;  %s10266_s12 = smov (!%p4462_p10), %s9863_s14 }
 0x30a   : > { %s10267_s17 = smov (!%p4462_p10), %s6698_s6  ;;  %s9878_s18 = smov (!%p4462_p10), 0  }
 0x30b   : > { %s9880_s20 = smov (!%p4462_p10), 0  }
 0x30e LB: >> { %v4098_v9 = vld [vmem:[%s5096_s17] sm:$0xff]  ;;  %v4100_v60 = vld [vmem:[%s5096_s17 + $0x8] sm:$0xff]  ;;  %v4102_v42 = vld [vmem:[%s5096_s17 + $0x10] sm:$0xff]  ;;  %s4162_s21 = sadd.s32 1, %s5100_s18  ;;  %s4092_s20 = sadd.s32 1, %s5104_s20   ;;  %s5104_s20 = sphi %s9880_s20, %s4092_s20   ;;  %s5100_s18 = sphi %s9878_s18, %s10270_s18   ;;  %s5096_s17 = sphi %s10267_s17, %s10269_s17   ;;  %s5092_s12 = sphi %s10266_s12, %s10268_s12  }
 0x30f   : >> { %4099 = vst [vmem:[%s5092_s12] sm:$0xff] %v4098_v9  ;;  %v4104_v46 = vld [vmem:[%s5096_s17 + $0x18] sm:$0xff]  ;;  %p4163_p11 = scmp.ge.s32.totalorder %s4162_s21, %s9869_s19  ;;  %v4106_v41 = vld [vmem:[%s5096_s17 + $0x20] sm:$0xff]  ;;  %v4108_v63 = vld [vmem:[%s5096_s17 + $0x28] sm:$0xff]  ;;  %p4091_p12 = scmp.ge.s32.totalorder %s4092_s20, %s9869_s19 }
 0x310   : >> { %4101 = vst [vmem:[%s5092_s12 + $0x8] sm:$0xff] %v4100_v60  ;;  %v4110_v7 = vld [vmem:[%s5096_s17 + $0x30] sm:$0xff]  ;;  %v4112_v47 = vld [vmem:[%s5096_s17 + $0x38] sm:$0xff]  ;;  %v4114_v5 = vld [vmem:[%s5096_s17 + $0x40] sm:$0xff] }
 0x311   : >> { %4103 = vst [vmem:[%s5092_s12 + $0x10] sm:$0xff] %v4102_v42  ;;  %s10277_s21 = smov (%p4163_p11, %s4162_s21), 0  ;;  %v4116_v34 = vld [vmem:[%s5096_s17 + $0x48] sm:$0xff]  ;;  %v4118_v48 = vld [vmem:[%s5096_s17 + $0x50] sm:$0xff]  ;;  %v4120_v33 = vld [vmem:[%s5096_s17 + $0x58] sm:$0xff] }
 0x312   : >> { %4105 = vst [vmem:[%s5092_s12 + $0x18] sm:$0xff] %v4104_v46  ;;  %s4463_s22 = sshll.u32 %s10277_s21, 8  ;;  %v4122_v17 = vld [vmem:[%s5096_s17 + $0x60] sm:$0xff]  ;;  %v4124_v26 = vld [vmem:[%s5096_s17 + $0x68] sm:$0xff]  ;;  %v4126_v15 = vld [vmem:[%s5096_s17 + $0x70] sm:$0xff]  ;;  %s10270_s18 = smov %s10277_s21 }
 0x313   : >> { %4107 = vst [vmem:[%s5092_s12 + $0x20] sm:$0xff] %v4106_v41  ;;  %s9912_s23 = scalar_lea.vmem %s6698_s6, %s4463_s22 [#allocation2]   ;;  %s9915_s24 = scalar_lea.vmem %s9863_s14, %s4463_s22   ;;  %v4128_v53 = vld [vmem:[%s5096_s17 + $0x78] sm:$0xff]  ;;  %v4130_v58 = vld [vmem:[%s5096_s17 + $0x80] sm:$0xff]  ;;  %v4132_v43 = vld [vmem:[%s5096_s17 + $0x88] sm:$0xff] }
 0x314   : >> { %4109 = vst [vmem:[%s5092_s12 + $0x28] sm:$0xff] %v4108_v63  ;;  %v4134_v31 = vld [vmem:[%s5096_s17 + $0x90] sm:$0xff]  ;;  %v4136_v25 = vld [vmem:[%s5096_s17 + $0x98] sm:$0xff]  ;;  %v4138_v32 = vld [vmem:[%s5096_s17 + $0xa0] sm:$0xff] }
 0x315   : >> { %4111 = vst [vmem:[%s5092_s12 + $0x30] sm:$0xff] %v4110_v7  ;;  %v4140_v57 = vld [vmem:[%s5096_s17 + $0xa8] sm:$0xff]  ;;  %v4142_v49 = vld [vmem:[%s5096_s17 + $0xb0] sm:$0xff]  ;;  %v4144_v2 = vld [vmem:[%s5096_s17 + $0xb8] sm:$0xff] }
 0x316   : >> { %4113 = vst [vmem:[%s5092_s12 + $0x38] sm:$0xff] %v4112_v47  ;;  %v4146_v14 = vld [vmem:[%s5096_s17 + $0xc0] sm:$0xff]  ;;  %v4148_v20 = vld [vmem:[%s5096_s17 + $0xc8] sm:$0xff]  ;;  %v4150_v22 = vld [vmem:[%s5096_s17 + $0xd0] sm:$0xff] }
 0x317   : >> { %4115 = vst [vmem:[%s5092_s12 + $0x40] sm:$0xff] %v4114_v5  ;;  %v4152_v1 = vld [vmem:[%s5096_s17 + $0xd8] sm:$0xff]  ;;  %v4154_v0 = vld [vmem:[%s5096_s17 + $0xe0] sm:$0xff]  ;;  %v4156_v16 = vld [vmem:[%s5096_s17 + $0xe8] sm:$0xff] }
 0x318   : >> { %4117 = vst [vmem:[%s5092_s12 + $0x48] sm:$0xff] %v4116_v34  ;;  %v4158_v52 = vld [vmem:[%s5096_s17 + $0xf0] sm:$0xff]  ;;  %v4160_v56 = vld [vmem:[%s5096_s17 + $0xf8] sm:$0xff]  ;;  %s10269_s17 = smov %s9912_s23 }
 0x319   : >> { %4119 = vst [vmem:[%s5092_s12 + $0x50] sm:$0xff] %v4118_v48 }
 0x31a   : >> { %4121 = vst [vmem:[%s5092_s12 + $0x58] sm:$0xff] %v4120_v33 }
 0x31b   : >> { %4123 = vst [vmem:[%s5092_s12 + $0x60] sm:$0xff] %v4122_v17 }
 0x31c   : >> { %4125 = vst [vmem:[%s5092_s12 + $0x68] sm:$0xff] %v4124_v26 }
 0x31d   : >> { %4127 = vst [vmem:[%s5092_s12 + $0x70] sm:$0xff] %v4126_v15 }
 0x31e   : >> { %4129 = vst [vmem:[%s5092_s12 + $0x78] sm:$0xff] %v4128_v53 }
 0x31f   : >> { %4131 = vst [vmem:[%s5092_s12 + $0x80] sm:$0xff] %v4130_v58 }
 0x320   : >> { %4133 = vst [vmem:[%s5092_s12 + $0x88] sm:$0xff] %v4132_v43 }
 0x321   : >> { %4135 = vst [vmem:[%s5092_s12 + $0x90] sm:$0xff] %v4134_v31 }
 0x322   : >> { %4137 = vst [vmem:[%s5092_s12 + $0x98] sm:$0xff] %v4136_v25 }
 0x323   : >> { %4139 = vst [vmem:[%s5092_s12 + $0xa0] sm:$0xff] %v4138_v32 }
 0x324   : >> { %4141 = vst [vmem:[%s5092_s12 + $0xa8] sm:$0xff] %v4140_v57 }
 0x325   : >> { %4143 = vst [vmem:[%s5092_s12 + $0xb0] sm:$0xff] %v4142_v49 }
 0x326   : >> { %4145 = vst [vmem:[%s5092_s12 + $0xb8] sm:$0xff] %v4144_v2 }
 0x327   : >> { %4147 = vst [vmem:[%s5092_s12 + $0xc0] sm:$0xff] %v4146_v14 }
 0x328   : >> { %4149 = vst [vmem:[%s5092_s12 + $0xc8] sm:$0xff] %v4148_v20 }
 0x329   : >> { %4151 = vst [vmem:[%s5092_s12 + $0xd0] sm:$0xff] %v4150_v22 }
 0x32a   : >> { %4153 = vst [vmem:[%s5092_s12 + $0xd8] sm:$0xff] %v4152_v1  ;;  %4094 = sbr.rel (!%p4091_p12) target bundleno = 782 (0x30e), region = 118 }
 0x32b   : >> { %4155 = vst [vmem:[%s5092_s12 + $0xe0] sm:$0xff] %v4154_v0 }
 0x32c   : >> { %4157 = vst [vmem:[%s5092_s12 + $0xe8] sm:$0xff] %v4156_v16 }
 0x32d   : >> { %4159 = vst [vmem:[%s5092_s12 + $0xf0] sm:$0xff] %v4158_v52 }
 0x32e   : >> { %4161 = vst [vmem:[%s5092_s12 + $0xf8] sm:$0xff] %v4160_v56  ;;  %s10268_s12 = smov %s9915_s24 }
 0x32f PF: > { %s9980_s25 = sand.u32 31, %s10275_s7   ;;  %s4474_s26 = sshll.u32 %s9869_s19, 8 }
 0x330   : > { %s4173_s27 = scalar_lea.vmem %s6698_s6, %s4474_s26 [#allocation2]   ;;  %s4175_s28 = scalar_lea.vmem %s9863_s14, %s4474_s26  }
 0x331   : > { %p4468_p13 = scmp.le.s32.totalorder %s9980_s25, 0 }
 0x332   : > { %s5106_s29 = smov (!%p4468_p13), %s4175_s28   ;;  %s5110_s30 = smov (!%p4468_p13), %s4173_s27  }
 0x333   : > { %4266 = sbr.rel (%p4468_p13) target bundleno = 832 (0x340), region = 123  ;;  %s5114_s3 = smov (!%p4468_p13), 0  }
 0x334   : > { %s5118_s4 = smov (!%p4468_p13), 0  }
 0x338 LB: >> { %v4185_v24 = vld [vmem:[%s5112_s30] sm:$0xff]  ;;  %s4187_s5 = sadd.s32 1, %s5116_s3  ;;  %s4179_s4 = sadd.s32 1, %s5120_s4   ;;  %s5120_s4 = sphi %s5118_s4, %s4179_s4   ;;  %s5116_s3 = sphi %s5114_s3, %s5115_s3   ;;  %s5112_s30 = sphi %s5110_s30, %s4192_s30   ;;  %s5108_s29 = sphi %s5106_s29, %s4193_s29  }
 0x339   : >> { %4186 = vst [vmem:[%s5108_s29] sm:$0xff] %v4185_v24  ;;  %p4188_p0 = scmp.ge.s32.totalorder %s4187_s5, %s9980_s25  ;;  %p4178_p1 = scmp.ge.s32.totalorder %s4179_s4, %s9980_s25 }
 0x33b   : >> { %s10279_s5 = smov (%p4188_p0, %s4187_s5), 0  ;;  %4181 = sbr.rel (!%p4178_p1) target bundleno = 824 (0x338), region = 129 }
 0x33c   : >> { %s4469_s6 = sshll.u32 %s10279_s5, 3  ;;  %s5115_s3 = smov %s10279_s5  }
 0x33d   : >> { %s4192_s30 = scalar_lea.vmem %s4173_s27, %s4469_s6 [#allocation2]   ;;  %s4193_s29 = scalar_lea.vmem %s4175_s28, %s4469_s6  }
 0x340 PF: > { %p9_p2 = scmp.ge.s32.totalorder %s5152_s13, 4   ;;  %s10271_s9 = smov %s5084_s10 }
 0x341   : > { %s10272_s10 = smov %s5160_s16  ;;  %s10273_s11 = smov %s5152_s13 }
 0x342   :  { %11 = sbr.rel (!%p9_p2) target bundleno = 2 (0x2), region = 140 }

</bundles_post_ra>
